<compile_context>
chip_gen: v7x
topology: tpu7x:2x2x1
jax: 0.10.0
libtpu: 0.0.40
codegen_flags: <defaults>
</compile_context>

<pallas_src>
from functools import partial

import jax
import jax.numpy as jnp
from jax import lax
from jax.experimental import pallas as pl
from jax.experimental.pallas import tpu as pltpu


# ---------------------------------------------------------------------------
# Fused BasicBlock Pallas kernel (one batch element per grid step)
# ---------------------------------------------------------------------------

def _basic_block_kernel(x_ref, w1_ref, b1_ref, w2_ref, b2_ref, wd_ref, bd_ref,
                        o_ref, y1p_ref, *, stride, pad, Hq, Ho, Wo, Cin, CP):
    """One full ResNet BasicBlock for a single batch element.

    x_ref  : (stride*stride*Hq, Wq, Cin) f32  phase-decomposed padded input
    w1_ref : (9, Cin, CP)  bf16   conv1 3x3 weights (BN scale folded, Cout->CP)
    b1_ref : (1, CP)       f32    conv1 folded BN bias (padded with zeros)
    w2_ref : (9, CP, CP)   bf16   conv2 3x3 weights (K and Cout padded to CP)
    b2_ref : (1, CP)       f32    conv2 folded BN bias
    wd_ref : (Cin, CP)     bf16   1x1 downsample conv+BN, or identity embedding
    bd_ref : (1, CP)       f32    downsample bias (zeros for identity shortcut)
    o_ref  : (Ho*Wo, CP)   f32    lane-dense output block
    y1p_ref: (Ho+2p, Wo+2p, CP) f32  VMEM staging buffer for padded conv1 output
    """
    M = Ho * Wo

    def tap(kh, kw):
        # Patch feeding 3x3 tap (kh, kw): x_pad[stride*i + kh, stride*j + kw].
        # With the phase decomposition this is a contiguous (Ho, Wo) slice.
        ph, oh = kh % stride, kh // stride
        pw, ow = kw % stride, kw // stride
        r0 = (ph * stride + pw) * Hq + oh
        xs = x_ref[r0:r0 + Ho, ow:ow + Wo, :]            # (Ho, Wo, Cin) f32
        return xs.reshape(M, Cin).astype(jnp.bfloat16)   # bf16 MXU operand

    # ---- conv1 (3x3, stride) + folded BN + ReLU ---------------------------
    acc1 = jnp.zeros((M, CP), jnp.float32)
    for kh in range(3):
        for kw in range(3):
            acc1 += jnp.dot(tap(kh, kw), w1_ref[kh * 3 + kw],
                            preferred_element_type=jnp.float32)
    y1 = jnp.maximum(acc1 + b1_ref[...], 0.0)

    # Stage the zero-padded conv1 output in VMEM so conv2 taps are plain slices
    # (no HBM traffic for the intermediate activation).
    y1p_ref[...] = jnp.zeros_like(y1p_ref)
    y1p_ref[pad:pad + Ho, pad:pad + Wo, :] = y1.reshape(Ho, Wo, CP)

    # ---- shortcut: 1x1(stride) conv + BN downsample, or identity ----------
    # (identity is expressed as a padded identity matrix -> single code path;
    #  one extra MXU pass, negligible)
    sc = jnp.dot(tap(pad, pad), wd_ref[...],
                 preferred_element_type=jnp.float32) + bd_ref[...]

    # ---- conv2 (3x3, stride 1) + folded BN + residual + ReLU --------------
    acc2 = jnp.zeros((M, CP), jnp.float32)
    for kh in range(3):
        for kw in range(3):
            ys = y1p_ref[kh:kh + Ho, kw:kw + Wo, :]
            acc2 += jnp.dot(ys.reshape(M, CP).astype(jnp.bfloat16),
                            w2_ref[kh * 3 + kw],
                            preferred_element_type=jnp.float32)

    o_ref[...] = jnp.maximum(acc2 + b2_ref[...] + sc, 0.0).astype(o_ref.dtype)


# ---------------------------------------------------------------------------
# Wrapper: phase decomposition + pallas_call per block
# ---------------------------------------------------------------------------

def _phase_decompose(x_nhwc, stride, pad):
    """Zero-pad spatially and regroup into stride x stride phases so that every
    3x3 tap of a stride-`stride` conv is a contiguous (Ho, Wo) window.
    Returns (N*stride*stride*Hq, Wq, C), plus (Hq, Wq).  Total bytes ~= x_pad
    (no 9x im2col expansion)."""
    N, H, W, C = x_nhwc.shape
    Hp, Wp = H + 2 * pad, W + 2 * pad
    Hq, Wq = -(-Hp // stride), -(-Wp // stride)
    xp = jnp.pad(x_nhwc, ((0, 0),
                          (pad, pad + Hq * stride - Hp),
                          (pad, pad + Wq * stride - Wp),
                          (0, 0)))
    xp = xp.reshape(N, Hq, stride, Wq, stride, C)
    xp = jnp.transpose(xp, (0, 2, 4, 1, 3, 5))       # (N, ph, pw, Hq, Wq, C)
    return xp.reshape(N * stride * stride * Hq, Wq, C), Hq, Wq


def basic_block_forward(x_nhwc, kp):
    stride, pad = kp["stride"], 1
    N, H, W, Cin = x_nhwc.shape
    assert Cin == kp["cin"]
    CP = kp["cp"]
    Ho = (H + 2 * pad - 3) // stride + 1
    Wo = (W + 2 * pad - 3) // stride + 1
    M = Ho * Wo

    xph, Hq, Wq = _phase_decompose(x_nhwc, stride, pad)
    PH = stride * stride * Hq
    # every 3x3 tap window must stay inside the per-phase plane
    assert 2 // stride + Ho <= Hq and 2 // stride + Wo <= Wq

    kernel = partial(_basic_block_kernel, stride=stride, pad=pad, Hq=Hq,
                     Ho=Ho, Wo=Wo, Cin=Cin, CP=CP)

    # NOTE: for realistic sizes (Cin >= 128 or large H*W) one would add a grid
    # axis over output rows and a K-reduction axis with a pl.when-initialized
    # f32 accumulator; at these shapes a single (per-image) block is optimal.
    out = pl.pallas_call(
        kernel,
        grid=(N,),
        in_specs=[
            pl.BlockSpec((PH, Wq, Cin), lambda n: (n, 0, 0)),   # activations
            pl.BlockSpec((9, Cin, CP), lambda n: (0, 0, 0)),    # w1
            pl.BlockSpec((1, CP), lambda n: (0, 0)),            # b1
            pl.BlockSpec((9, CP, CP), lambda n: (0, 0, 0)),     # w2
            pl.BlockSpec((1, CP), lambda n: (0, 0)),            # b2
            pl.BlockSpec((Cin, CP), lambda n: (0, 0)),          # wd / identity
            pl.BlockSpec((1, CP), lambda n: (0, 0)),            # bd
        ],
        out_specs=pl.BlockSpec((M, CP), lambda n: (n, 0)),
        out_shape=jax.ShapeDtypeStruct((N * M, CP), jnp.float32),
        scratch_shapes=[pltpu.VMEM((Ho + 2 * pad, Wo + 2 * pad, CP),
                                   jnp.float32)],
        compiler_params=pltpu.CompilerParams(
            dimension_semantics=("parallel",),        # grid=(N,)>=2 -> megacore
            vmem_limit_bytes=32 * 1024 * 1024),       # explicit budget (v7x ok)
    )(xph, kp["w1"], kp["b1"], kp["w2"], kp["b2"], kp["wd"], kp["bd"])

    return out.reshape(N, Ho, Wo, CP)[..., :kp["cout"]]


def resnet_each_conv_forward(x_nchw, kparams):
    x = jnp.transpose(x_nchw, (0, 2, 3, 1))   # NCHW -> NHWC
    for kp in kparams:
        x = basic_block_forward(x, kp)
    return jnp.transpose(x, (0, 3, 1, 2))     # NHWC -> NCHW


# ---------------------------------------------------------------------------
# Parameters: init (PyTorch-like), BN folding, kernel-format preparation
# ---------------------------------------------------------------------------

def fold_bn(gamma, beta, mean, var, eps=1e-5):
    scale = gamma / jnp.sqrt(var + eps)
    return scale, beta - mean * scale


def make_bn_params(c):
    gamma = jnp.linspace(0.9, 1.1, c, dtype=jnp.float32)
    beta = jnp.linspace(-0.1, 0.1, c, dtype=jnp.float32)
    mean = jnp.linspace(-0.05, 0.05, c, dtype=jnp.float32)
    var = jnp.linspace(0.5, 1.5, c, dtype=jnp.float32)
    return fold_bn(gamma, beta, mean, var)


def init_basic_block(key, cin, cout, stride):
    k1, k2, k3 = jax.random.split(key, 3)
    p = {"stride": stride,
         "w1": jax.random.normal(k1, (cout, cin, 3, 3), jnp.float32) * 0.1,
         "w2": jax.random.normal(k2, (cout, cout, 3, 3), jnp.float32) * 0.1}
    p["s1"], p["b1"] = make_bn_params(cout)
    p["s2"], p["b2"] = make_bn_params(cout)
    if stride != 1 or cin != cout:
        p["wd"] = jax.random.normal(k3, (cout, cin, 1, 1), jnp.float32) * 0.1
        p["sd"], p["bd"] = make_bn_params(cout)
    return p


def init_resnet_each_conv(key, input_channel, output_channel, block_num=2,
                          stride=2):
    keys = jax.random.split(key, block_num)
    params = [init_basic_block(keys[0], input_channel, output_channel, stride)]
    for i in range(block_num - 1):
        params.append(init_basic_block(keys[i + 1], output_channel,
                                       output_channel, 1))
    return params


def prepare_block_params(p):
    """Host-side prep: fold BN scale into conv weights, zero-pad output channels
    (and conv2's contraction dim) to a lane-dense 128 multiple, cast MXU
    operands to bf16.  Biases stay f32."""
    cout, cin = p["w1"].shape[0], p["w1"].shape[1]
    CP = max(128, ((cout + 127) // 128) * 128)

    def fmt_conv3x3(w_oihw, scale):
        co, ci = w_oihw.shape[0], w_oihw.shape[1]
        w = jnp.transpose(w_oihw, (2, 3, 1, 0)).reshape(9, ci, co)
        w = w * scale[None, None, :]
        return jnp.pad(w, ((0, 0), (0, 0), (0, CP - co))).astype(jnp.bfloat16)

    def fmt_bias(b):
        return jnp.pad(b, (0, CP - b.shape[0])).reshape(1, CP).astype(jnp.float32)

    kp = {"stride": p["stride"], "cin": cin, "cout": cout, "cp": CP}
    kp["w1"] = fmt_conv3x3(p["w1"], p["s1"])                    # (9, Cin, CP)
    kp["b1"] = fmt_bias(p["b1"])
    w2 = fmt_conv3x3(p["w2"], p["s2"])                          # (9, Cout, CP)
    kp["w2"] = jnp.pad(w2, ((0, 0), (0, CP - cout), (0, 0)))    # (9, CP, CP)
    kp["b2"] = fmt_bias(p["b2"])
    if "wd" in p:
        wd = jnp.transpose(p["wd"], (2, 3, 1, 0)).reshape(cin, cout)
        wd = wd * p["sd"][None, :]
        kp["wd"] = jnp.pad(wd, ((0, 0), (0, CP - cout))).astype(jnp.bfloat16)
        kp["bd"] = fmt_bias(p["bd"])
    else:
        # identity shortcut as a padded identity embedding -> uniform kernel path
        kp["wd"] = jnp.pad(jnp.eye(cin, cout, dtype=jnp.float32),
                           ((0, 0), (0, CP - cout))).astype(jnp.bfloat16)
        kp["bd"] = jnp.zeros((1, CP), jnp.float32)
    return kp


# ---------------------------------------------------------------------------
# Pure-JAX references (lax.conv) for correctness checking
# ---------------------------------------------------------------------------

def _ref_conv(x_nhwc, w_oihw, stride, pad, use_bf16):
    w = jnp.transpose(w_oihw, (2, 3, 1, 0))
    if use_bf16:
        x_nhwc = x_nhwc.astype(jnp.bfloat16)
        w = w.astype(jnp.bfloat16)
    return lax.conv_general_dilated(
        x_nhwc, w, window_strides=(stride, stride),
        padding=((pad, pad), (pad, pad)),
        dimension_numbers=("NHWC", "HWIO", "NHWC"),
        preferred_element_type=jnp.float32)


def _ref_block(x, p, use_bf16):
    s = p["stride"]
    y = jnp.maximum(
        _ref_conv(x, p["w1"] * p["s1"][:, None, None, None], s, 1, use_bf16)
        + p["b1"], 0.0)
    y = _ref_conv(y, p["w2"] * p["s2"][:, None, None, None], 1, 1, use_bf16) + p["b2"]
    if "wd" in p:
        sc = _ref_conv(x, p["wd"] * p["sd"][:, None, None, None], s, 0, use_bf16)
        sc = sc + p["bd"]
    else:
        sc = x.astype(jnp.bfloat16).astype(jnp.float32) if use_bf16 else x
    return jnp.maximum(y + sc, 0.0)


def _ref_forward(x_nchw, params, use_bf16):
    x = jnp.transpose(x_nchw, (0, 2, 3, 1))
    for p in params:
        x = _ref_block(x, p, use_bf16)
    return jnp.transpose(x, (0, 3, 1, 2))


# ---------------------------------------------------------------------------

if __name__ == "__main__":
    key = jax.random.PRNGKey(0)
    k_x, k_p = jax.random.split(key)

    # ResNet_Each_Conv(block=BasicBlock, input_channel=4, output_channel=8,
    #                  block_num=2, stride=2) on a (2, 4, 16, 16) NCHW input.
    input_channel, output_channel, block_num, stride = 4, 8, 2, 2
    x = jax.random.normal(k_x, (2, input_channel, 16, 16), jnp.float32)

    raw_params = init_resnet_each_conv(k_p, input_channel, output_channel,
                                       block_num=block_num, stride=stride)
    kparams = [prepare_block_params(p) for p in raw_params]

    fwd = jax.jit(lambda inp: resnet_each_conv_forward(inp, kparams))
    out = jax.block_until_ready(fwd(x))

    assert out.shape == (2, output_channel, 16 // stride, 16 // stride), out.shape

    # Tight check vs a reference using the same bf16-operand / f32-accumulate math.
    ref_bf16 = jax.block_until_ready(_ref_forward(x, raw_params, use_bf16=True))
    assert jnp.allclose(out, ref_bf16, rtol=5e-3, atol=5e-3), \
        float(jnp.max(jnp.abs(out - ref_bf16)))

    # Loose check vs the pure-f32 module semantics (bf16 MXU precision choice).
    ref_f32 = jax.block_until_ready(_ref_forward(x, raw_params, use_bf16=False))
    assert jnp.allclose(out, ref_f32, rtol=5e-2, atol=5e-2), \
        float(jnp.max(jnp.abs(out - ref_f32)))

    print("KERNEL_OK")
</pallas_src>

<mosaic_0001>
module attributes {stable_mosaic.version = 11 : i64} {
  func.func @_basic_block_kernel(%arg0: i32, %arg1: memref<36x9x4xf32, #tpu.memory_space<vmem>>, %arg2: memref<9x4x128xbf16, #tpu.memory_space<vmem>>, %arg3: memref<1x128xf32, #tpu.memory_space<vmem>>, %arg4: memref<9x128x128xbf16, #tpu.memory_space<vmem>>, %arg5: memref<1x128xf32, #tpu.memory_space<vmem>>, %arg6: memref<4x128xbf16, #tpu.memory_space<vmem>>, %arg7: memref<1x128xf32, #tpu.memory_space<vmem>>, %arg8: memref<64x128xf32, #tpu.memory_space<vmem>>, %arg9: memref<10x10x128xf32, #tpu.memory_space<vmem>>) attributes {dimension_semantics = [#tpu.dimension_semantics<parallel>], iteration_bounds = array<i64: 2>, scalar_prefetch = 0 : i64, scratch_operands = 1 : i64, tpu.core_type = #tpu.core_type<tc>, window_params = [{transform_indices = @transform_0, window_bounds = array<i64: 36, 9, 4>}, {pipeline_mode = #tpu.pipeline_mode<synchronous>, transform_indices = @transform_1, window_bounds = array<i64: 9, 4, 128>}, {pipeline_mode = #tpu.pipeline_mode<synchronous>, transform_indices = @transform_2, window_bounds = array<i64: 1, 128>}, {pipeline_mode = #tpu.pipeline_mode<synchronous>, transform_indices = @transform_3, window_bounds = array<i64: 9, 128, 128>}, {pipeline_mode = #tpu.pipeline_mode<synchronous>, transform_indices = @transform_4, window_bounds = array<i64: 1, 128>}, {pipeline_mode = #tpu.pipeline_mode<synchronous>, transform_indices = @transform_5, window_bounds = array<i64: 4, 128>}, {pipeline_mode = #tpu.pipeline_mode<synchronous>, transform_indices = @transform_6, window_bounds = array<i64: 1, 128>}, {transform_indices = @transform_7, window_bounds = array<i64: 64, 128>}]} {
    %cst = arith.constant 0.000000e+00 : f32
    %0 = vector.broadcast %cst : f32 to vector<64x128xf32>
    %c0 = arith.constant 0 : index
    %c0_0 = arith.constant 0 : index
    %c0_1 = arith.constant 0 : index
    %1 = vector.load %arg1[%c0, %c0_0, %c0_1] : memref<36x9x4xf32, #tpu.memory_space<vmem>>, vector<8x8x4xf32>
    %2 = vector.shape_cast %1 : vector<8x8x4xf32> to vector<64x4xf32>
    %3 = arith.truncf %2 : vector<64x4xf32> to vector<64x4xbf16>
    %c0_2 = arith.constant 0 : index
    %c0_3 = arith.constant 0 : index
    %c0_4 = arith.constant 0 : index
    %4 = vector.load %arg2[%c0_2, %c0_3, %c0_4] : memref<9x4x128xbf16, #tpu.memory_space<vmem>>, vector<1x4x128xbf16>
    %5 = vector.shape_cast %4 : vector<1x4x128xbf16> to vector<4x128xbf16>
    %cst_5 = arith.constant dense<0.000000e+00> : vector<64x128xf32>
    %6 = tpu.matmul %3, %5, %cst_5 {dimension_numbers = #tpu.dot_dimension_numbers<[1], [0], [0], [1], [0, 0, 1, 1], [], []>} : vector<64x4xbf16>, vector<4x128xbf16>, vector<64x128xf32> -> vector<64x128xf32>
    %7 = arith.addf %0, %6 : vector<64x128xf32>
    %c9 = arith.constant 9 : index
    %c0_6 = arith.constant 0 : index
    %c0_7 = arith.constant 0 : index
    %8 = vector.load %arg1[%c9, %c0_6, %c0_7] : memref<36x9x4xf32, #tpu.memory_space<vmem>>, vector<8x8x4xf32>
    %9 = vector.shape_cast %8 : vector<8x8x4xf32> to vector<64x4xf32>
    %10 = arith.truncf %9 : vector<64x4xf32> to vector<64x4xbf16>
    %c1 = arith.constant 1 : index
    %c0_8 = arith.constant 0 : index
    %c0_9 = arith.constant 0 : index
    %11 = vector.load %arg2[%c1, %c0_8, %c0_9] : memref<9x4x128xbf16, #tpu.memory_space<vmem>>, vector<1x4x128xbf16>
    %12 = vector.shape_cast %11 : vector<1x4x128xbf16> to vector<4x128xbf16>
    %cst_10 = arith.constant dense<0.000000e+00> : vector<64x128xf32>
    %13 = tpu.matmul %10, %12, %cst_10 {dimension_numbers = #tpu.dot_dimension_numbers<[1], [0], [0], [1], [0, 0, 1, 1], [], []>} : vector<64x4xbf16>, vector<4x128xbf16>, vector<64x128xf32> -> vector<64x128xf32>
    %14 = arith.addf %7, %13 : vector<64x128xf32>
    %c0_11 = arith.constant 0 : index
    %c1_12 = arith.constant 1 : index
    %c0_13 = arith.constant 0 : index
    %15 = vector.load %arg1[%c0_11, %c1_12, %c0_13] : memref<36x9x4xf32, #tpu.memory_space<vmem>>, vector<8x8x4xf32>
    %16 = vector.shape_cast %15 : vector<8x8x4xf32> to vector<64x4xf32>
    %17 = arith.truncf %16 : vector<64x4xf32> to vector<64x4xbf16>
    %c2 = arith.constant 2 : index
    %c0_14 = arith.constant 0 : index
    %c0_15 = arith.constant 0 : index
    %18 = vector.load %arg2[%c2, %c0_14, %c0_15] : memref<9x4x128xbf16, #tpu.memory_space<vmem>>, vector<1x4x128xbf16>
    %19 = vector.shape_cast %18 : vector<1x4x128xbf16> to vector<4x128xbf16>
    %cst_16 = arith.constant dense<0.000000e+00> : vector<64x128xf32>
    %20 = tpu.matmul %17, %19, %cst_16 {dimension_numbers = #tpu.dot_dimension_numbers<[1], [0], [0], [1], [0, 0, 1, 1], [], []>} : vector<64x4xbf16>, vector<4x128xbf16>, vector<64x128xf32> -> vector<64x128xf32>
    %21 = arith.addf %14, %20 : vector<64x128xf32>
    %c18 = arith.constant 18 : index
    %c0_17 = arith.constant 0 : index
    %c0_18 = arith.constant 0 : index
    %22 = vector.load %arg1[%c18, %c0_17, %c0_18] : memref<36x9x4xf32, #tpu.memory_space<vmem>>, vector<8x8x4xf32>
    %23 = vector.shape_cast %22 : vector<8x8x4xf32> to vector<64x4xf32>
    %24 = arith.truncf %23 : vector<64x4xf32> to vector<64x4xbf16>
    %c3 = arith.constant 3 : index
    %c0_19 = arith.constant 0 : index
    %c0_20 = arith.constant 0 : index
    %25 = vector.load %arg2[%c3, %c0_19, %c0_20] : memref<9x4x128xbf16, #tpu.memory_space<vmem>>, vector<1x4x128xbf16>
    %26 = vector.shape_cast %25 : vector<1x4x128xbf16> to vector<4x128xbf16>
    %cst_21 = arith.constant dense<0.000000e+00> : vector<64x128xf32>
    %27 = tpu.matmul %24, %26, %cst_21 {dimension_numbers = #tpu.dot_dimension_numbers<[1], [0], [0], [1], [0, 0, 1, 1], [], []>} : vector<64x4xbf16>, vector<4x128xbf16>, vector<64x128xf32> -> vector<64x128xf32>
    %28 = arith.addf %21, %27 : vector<64x128xf32>
    %c27 = arith.constant 27 : index
    %c0_22 = arith.constant 0 : index
    %c0_23 = arith.constant 0 : index
    %29 = vector.load %arg1[%c27, %c0_22, %c0_23] : memref<36x9x4xf32, #tpu.memory_space<vmem>>, vector<8x8x4xf32>
    %30 = vector.shape_cast %29 : vector<8x8x4xf32> to vector<64x4xf32>
    %31 = arith.truncf %30 : vector<64x4xf32> to vector<64x4xbf16>
    %c4 = arith.constant 4 : index
    %c0_24 = arith.constant 0 : index
    %c0_25 = arith.constant 0 : index
    %32 = vector.load %arg2[%c4, %c0_24, %c0_25] : memref<9x4x128xbf16, #tpu.memory_space<vmem>>, vector<1x4x128xbf16>
    %33 = vector.shape_cast %32 : vector<1x4x128xbf16> to vector<4x128xbf16>
    %cst_26 = arith.constant dense<0.000000e+00> : vector<64x128xf32>
    %34 = tpu.matmul %31, %33, %cst_26 {dimension_numbers = #tpu.dot_dimension_numbers<[1], [0], [0], [1], [0, 0, 1, 1], [], []>} : vector<64x4xbf16>, vector<4x128xbf16>, vector<64x128xf32> -> vector<64x128xf32>
    %35 = arith.addf %28, %34 : vector<64x128xf32>
    %c18_27 = arith.constant 18 : index
    %c1_28 = arith.constant 1 : index
    %c0_29 = arith.constant 0 : index
    %36 = vector.load %arg1[%c18_27, %c1_28, %c0_29] : memref<36x9x4xf32, #tpu.memory_space<vmem>>, vector<8x8x4xf32>
    %37 = vector.shape_cast %36 : vector<8x8x4xf32> to vector<64x4xf32>
    %38 = arith.truncf %37 : vector<64x4xf32> to vector<64x4xbf16>
    %c5 = arith.constant 5 : index
    %c0_30 = arith.constant 0 : index
    %c0_31 = arith.constant 0 : index
    %39 = vector.load %arg2[%c5, %c0_30, %c0_31] : memref<9x4x128xbf16, #tpu.memory_space<vmem>>, vector<1x4x128xbf16>
    %40 = vector.shape_cast %39 : vector<1x4x128xbf16> to vector<4x128xbf16>
    %cst_32 = arith.constant dense<0.000000e+00> : vector<64x128xf32>
    %41 = tpu.matmul %38, %40, %cst_32 {dimension_numbers = #tpu.dot_dimension_numbers<[1], [0], [0], [1], [0, 0, 1, 1], [], []>} : vector<64x4xbf16>, vector<4x128xbf16>, vector<64x128xf32> -> vector<64x128xf32>
    %42 = arith.addf %35, %41 : vector<64x128xf32>
    %c1_33 = arith.constant 1 : index
    %c0_34 = arith.constant 0 : index
    %c0_35 = arith.constant 0 : index
    %43 = vector.load %arg1[%c1_33, %c0_34, %c0_35] : memref<36x9x4xf32, #tpu.memory_space<vmem>>, vector<8x8x4xf32>
    %44 = vector.shape_cast %43 : vector<8x8x4xf32> to vector<64x4xf32>
    %45 = arith.truncf %44 : vector<64x4xf32> to vector<64x4xbf16>
    %c6 = arith.constant 6 : index
    %c0_36 = arith.constant 0 : index
    %c0_37 = arith.constant 0 : index
    %46 = vector.load %arg2[%c6, %c0_36, %c0_37] : memref<9x4x128xbf16, #tpu.memory_space<vmem>>, vector<1x4x128xbf16>
    %47 = vector.shape_cast %46 : vector<1x4x128xbf16> to vector<4x128xbf16>
    %cst_38 = arith.constant dense<0.000000e+00> : vector<64x128xf32>
    %48 = tpu.matmul %45, %47, %cst_38 {dimension_numbers = #tpu.dot_dimension_numbers<[1], [0], [0], [1], [0, 0, 1, 1], [], []>} : vector<64x4xbf16>, vector<4x128xbf16>, vector<64x128xf32> -> vector<64x128xf32>
    %49 = arith.addf %42, %48 : vector<64x128xf32>
    %c10 = arith.constant 10 : index
    %c0_39 = arith.constant 0 : index
    %c0_40 = arith.constant 0 : index
    %50 = vector.load %arg1[%c10, %c0_39, %c0_40] : memref<36x9x4xf32, #tpu.memory_space<vmem>>, vector<8x8x4xf32>
    %51 = vector.shape_cast %50 : vector<8x8x4xf32> to vector<64x4xf32>
    %52 = arith.truncf %51 : vector<64x4xf32> to vector<64x4xbf16>
    %c7 = arith.constant 7 : index
    %c0_41 = arith.constant 0 : index
    %c0_42 = arith.constant 0 : index
    %53 = vector.load %arg2[%c7, %c0_41, %c0_42] : memref<9x4x128xbf16, #tpu.memory_space<vmem>>, vector<1x4x128xbf16>
    %54 = vector.shape_cast %53 : vector<1x4x128xbf16> to vector<4x128xbf16>
    %cst_43 = arith.constant dense<0.000000e+00> : vector<64x128xf32>
    %55 = tpu.matmul %52, %54, %cst_43 {dimension_numbers = #tpu.dot_dimension_numbers<[1], [0], [0], [1], [0, 0, 1, 1], [], []>} : vector<64x4xbf16>, vector<4x128xbf16>, vector<64x128xf32> -> vector<64x128xf32>
    %56 = arith.addf %49, %55 : vector<64x128xf32>
    %c1_44 = arith.constant 1 : index
    %c1_45 = arith.constant 1 : index
    %c0_46 = arith.constant 0 : index
    %57 = vector.load %arg1[%c1_44, %c1_45, %c0_46] : memref<36x9x4xf32, #tpu.memory_space<vmem>>, vector<8x8x4xf32>
    %58 = vector.shape_cast %57 : vector<8x8x4xf32> to vector<64x4xf32>
    %59 = arith.truncf %58 : vector<64x4xf32> to vector<64x4xbf16>
    %c8 = arith.constant 8 : index
    %c0_47 = arith.constant 0 : index
    %c0_48 = arith.constant 0 : index
    %60 = vector.load %arg2[%c8, %c0_47, %c0_48] : memref<9x4x128xbf16, #tpu.memory_space<vmem>>, vector<1x4x128xbf16>
    %61 = vector.shape_cast %60 : vector<1x4x128xbf16> to vector<4x128xbf16>
    %cst_49 = arith.constant dense<0.000000e+00> : vector<64x128xf32>
    %62 = tpu.matmul %59, %61, %cst_49 {dimension_numbers = #tpu.dot_dimension_numbers<[1], [0], [0], [1], [0, 0, 1, 1], [], []>} : vector<64x4xbf16>, vector<4x128xbf16>, vector<64x128xf32> -> vector<64x128xf32>
    %63 = arith.addf %56, %62 : vector<64x128xf32>
    %c0_50 = arith.constant 0 : index
    %c0_51 = arith.constant 0 : index
    %64 = vector.load %arg3[%c0_50, %c0_51] : memref<1x128xf32, #tpu.memory_space<vmem>>, vector<1x128xf32>
    %65 = vector.broadcast %64 : vector<1x128xf32> to vector<64x128xf32>
    %66 = arith.addf %63, %65 : vector<64x128xf32>
    %cst_52 = arith.constant 0.000000e+00 : f32
    %67 = vector.broadcast %cst_52 : f32 to vector<64x128xf32>
    %68 = arith.maximumf %66, %67 : vector<64x128xf32>
    %cst_53 = arith.constant 0.000000e+00 : f32
    %69 = vector.broadcast %cst_53 : f32 to vector<10x10x128xf32>
    %c0_54 = arith.constant 0 : index
    %c0_55 = arith.constant 0 : index
    %c0_56 = arith.constant 0 : index
    %70 = vector.load %arg9[%c0_54, %c0_55, %c0_56] : memref<10x10x128xf32, #tpu.memory_space<vmem>>, vector<10x10x128xf32>
    tpu.vector_store %arg9[%c0_54, %c0_55, %c0_56], %69 {strides = array<i32>} : memref<10x10x128xf32, #tpu.memory_space<vmem>>, vector<10x10x128xf32>,
    %71 = vector.shape_cast %68 : vector<64x128xf32> to vector<8x8x128xf32>
    %c1_57 = arith.constant 1 : index
    %c1_58 = arith.constant 1 : index
    %c0_59 = arith.constant 0 : index
    %72 = vector.load %arg9[%c1_57, %c1_58, %c0_59] : memref<10x10x128xf32, #tpu.memory_space<vmem>>, vector<8x8x128xf32>
    tpu.vector_store %arg9[%c1_57, %c1_58, %c0_59], %71 {strides = array<i32>} : memref<10x10x128xf32, #tpu.memory_space<vmem>>, vector<8x8x128xf32>,
    %c27_60 = arith.constant 27 : index
    %c0_61 = arith.constant 0 : index
    %c0_62 = arith.constant 0 : index
    %73 = vector.load %arg1[%c27_60, %c0_61, %c0_62] : memref<36x9x4xf32, #tpu.memory_space<vmem>>, vector<8x8x4xf32>
    %74 = vector.shape_cast %73 : vector<8x8x4xf32> to vector<64x4xf32>
    %75 = arith.truncf %74 : vector<64x4xf32> to vector<64x4xbf16>
    %c0_63 = arith.constant 0 : index
    %c0_64 = arith.constant 0 : index
    %76 = vector.load %arg6[%c0_63, %c0_64] : memref<4x128xbf16, #tpu.memory_space<vmem>>, vector<4x128xbf16>
    %cst_65 = arith.constant dense<0.000000e+00> : vector<64x128xf32>
    %77 = tpu.matmul %75, %76, %cst_65 {dimension_numbers = #tpu.dot_dimension_numbers<[1], [0], [0], [1], [0, 0, 1, 1], [], []>} : vector<64x4xbf16>, vector<4x128xbf16>, vector<64x128xf32> -> vector<64x128xf32>
    %c0_66 = arith.constant 0 : index
    %c0_67 = arith.constant 0 : index
    %78 = vector.load %arg7[%c0_66, %c0_67] : memref<1x128xf32, #tpu.memory_space<vmem>>, vector<1x128xf32>
    %79 = vector.broadcast %78 : vector<1x128xf32> to vector<64x128xf32>
    %80 = arith.addf %77, %79 : vector<64x128xf32>
    %cst_68 = arith.constant 0.000000e+00 : f32
    %81 = vector.broadcast %cst_68 : f32 to vector<64x128xf32>
    %c0_69 = arith.constant 0 : index
    %c0_70 = arith.constant 0 : index
    %c0_71 = arith.constant 0 : index
    %82 = vector.load %arg9[%c0_69, %c0_70, %c0_71] : memref<10x10x128xf32, #tpu.memory_space<vmem>>, vector<8x8x128xf32>
    %83 = vector.shape_cast %82 : vector<8x8x128xf32> to vector<64x128xf32>
    %84 = arith.truncf %83 : vector<64x128xf32> to vector<64x128xbf16>
    %c0_72 = arith.constant 0 : index
    %c0_73 = arith.constant 0 : index
    %c0_74 = arith.constant 0 : index
    %85 = vector.load %arg4[%c0_72, %c0_73, %c0_74] : memref<9x128x128xbf16, #tpu.memory_space<vmem>>, vector<1x128x128xbf16>
    %86 = vector.shape_cast %85 : vector<1x128x128xbf16> to vector<128x128xbf16>
    %cst_75 = arith.constant dense<0.000000e+00> : vector<64x128xf32>
    %87 = tpu.matmul %84, %86, %cst_75 {dimension_numbers = #tpu.dot_dimension_numbers<[1], [0], [0], [1], [0, 0, 1, 1], [], []>} : vector<64x128xbf16>, vector<128x128xbf16>, vector<64x128xf32> -> vector<64x128xf32>
    %88 = arith.addf %81, %87 : vector<64x128xf32>
    %c0_76 = arith.constant 0 : index
    %c1_77 = arith.constant 1 : index
    %c0_78 = arith.constant 0 : index
    %89 = vector.load %arg9[%c0_76, %c1_77, %c0_78] : memref<10x10x128xf32, #tpu.memory_space<vmem>>, vector<8x8x128xf32>
    %90 = vector.shape_cast %89 : vector<8x8x128xf32> to vector<64x128xf32>
    %91 = arith.truncf %90 : vector<64x128xf32> to vector<64x128xbf16>
    %c1_79 = arith.constant 1 : index
    %c0_80 = arith.constant 0 : index
    %c0_81 = arith.constant 0 : index
    %92 = vector.load %arg4[%c1_79, %c0_80, %c0_81] : memref<9x128x128xbf16, #tpu.memory_space<vmem>>, vector<1x128x128xbf16>
    %93 = vector.shape_cast %92 : vector<1x128x128xbf16> to vector<128x128xbf16>
    %cst_82 = arith.constant dense<0.000000e+00> : vector<64x128xf32>
    %94 = tpu.matmul %91, %93, %cst_82 {dimension_numbers = #tpu.dot_dimension_numbers<[1], [0], [0], [1], [0, 0, 1, 1], [], []>} : vector<64x128xbf16>, vector<128x128xbf16>, vector<64x128xf32> -> vector<64x128xf32>
    %95 = arith.addf %88, %94 : vector<64x128xf32>
    %c0_83 = arith.constant 0 : index
    %c2_84 = arith.constant 2 : index
    %c0_85 = arith.constant 0 : index
    %96 = vector.load %arg9[%c0_83, %c2_84, %c0_85] : memref<10x10x128xf32, #tpu.memory_space<vmem>>, vector<8x8x128xf32>
    %97 = vector.shape_cast %96 : vector<8x8x128xf32> to vector<64x128xf32>
    %98 = arith.truncf %97 : vector<64x128xf32> to vector<64x128xbf16>
    %c2_86 = arith.constant 2 : index
    %c0_87 = arith.constant 0 : index
    %c0_88 = arith.constant 0 : index
    %99 = vector.load %arg4[%c2_86, %c0_87, %c0_88] : memref<9x128x128xbf16, #tpu.memory_space<vmem>>, vector<1x128x128xbf16>
    %100 = vector.shape_cast %99 : vector<1x128x128xbf16> to vector<128x128xbf16>
    %cst_89 = arith.constant dense<0.000000e+00> : vector<64x128xf32>
    %101 = tpu.matmul %98, %100, %cst_89 {dimension_numbers = #tpu.dot_dimension_numbers<[1], [0], [0], [1], [0, 0, 1, 1], [], []>} : vector<64x128xbf16>, vector<128x128xbf16>, vector<64x128xf32> -> vector<64x128xf32>
    %102 = arith.addf %95, %101 : vector<64x128xf32>
    %c1_90 = arith.constant 1 : index
    %c0_91 = arith.constant 0 : index
    %c0_92 = arith.constant 0 : index
    %103 = vector.load %arg9[%c1_90, %c0_91, %c0_92] : memref<10x10x128xf32, #tpu.memory_space<vmem>>, vector<8x8x128xf32>
    %104 = vector.shape_cast %103 : vector<8x8x128xf32> to vector<64x128xf32>
    %105 = arith.truncf %104 : vector<64x128xf32> to vector<64x128xbf16>
    %c3_93 = arith.constant 3 : index
    %c0_94 = arith.constant 0 : index
    %c0_95 = arith.constant 0 : index
    %106 = vector.load %arg4[%c3_93, %c0_94, %c0_95] : memref<9x128x128xbf16, #tpu.memory_space<vmem>>, vector<1x128x128xbf16>
    %107 = vector.shape_cast %106 : vector<1x128x128xbf16> to vector<128x128xbf16>
    %cst_96 = arith.constant dense<0.000000e+00> : vector<64x128xf32>
    %108 = tpu.matmul %105, %107, %cst_96 {dimension_numbers = #tpu.dot_dimension_numbers<[1], [0], [0], [1], [0, 0, 1, 1], [], []>} : vector<64x128xbf16>, vector<128x128xbf16>, vector<64x128xf32> -> vector<64x128xf32>
    %109 = arith.addf %102, %108 : vector<64x128xf32>
    %c1_97 = arith.constant 1 : index
    %c1_98 = arith.constant 1 : index
    %c0_99 = arith.constant 0 : index
    %110 = vector.load %arg9[%c1_97, %c1_98, %c0_99] : memref<10x10x128xf32, #tpu.memory_space<vmem>>, vector<8x8x128xf32>
    %111 = vector.shape_cast %110 : vector<8x8x128xf32> to vector<64x128xf32>
    %112 = arith.truncf %111 : vector<64x128xf32> to vector<64x128xbf16>
    %c4_100 = arith.constant 4 : index
    %c0_101 = arith.constant 0 : index
    %c0_102 = arith.constant 0 : index
    %113 = vector.load %arg4[%c4_100, %c0_101, %c0_102] : memref<9x128x128xbf16, #tpu.memory_space<vmem>>, vector<1x128x128xbf16>
    %114 = vector.shape_cast %113 : vector<1x128x128xbf16> to vector<128x128xbf16>
    %cst_103 = arith.constant dense<0.000000e+00> : vector<64x128xf32>
    %115 = tpu.matmul %112, %114, %cst_103 {dimension_numbers = #tpu.dot_dimension_numbers<[1], [0], [0], [1], [0, 0, 1, 1], [], []>} : vector<64x128xbf16>, vector<128x128xbf16>, vector<64x128xf32> -> vector<64x128xf32>
    %116 = arith.addf %109, %115 : vector<64x128xf32>
    %c1_104 = arith.constant 1 : index
    %c2_105 = arith.constant 2 : index
    %c0_106 = arith.constant 0 : index
    %117 = vector.load %arg9[%c1_104, %c2_105, %c0_106] : memref<10x10x128xf32, #tpu.memory_space<vmem>>, vector<8x8x128xf32>
    %118 = vector.shape_cast %117 : vector<8x8x128xf32> to vector<64x128xf32>
    %119 = arith.truncf %118 : vector<64x128xf32> to vector<64x128xbf16>
    %c5_107 = arith.constant 5 : index
    %c0_108 = arith.constant 0 : index
    %c0_109 = arith.constant 0 : index
    %120 = vector.load %arg4[%c5_107, %c0_108, %c0_109] : memref<9x128x128xbf16, #tpu.memory_space<vmem>>, vector<1x128x128xbf16>
    %121 = vector.shape_cast %120 : vector<1x128x128xbf16> to vector<128x128xbf16>
    %cst_110 = arith.constant dense<0.000000e+00> : vector<64x128xf32>
    %122 = tpu.matmul %119, %121, %cst_110 {dimension_numbers = #tpu.dot_dimension_numbers<[1], [0], [0], [1], [0, 0, 1, 1], [], []>} : vector<64x128xbf16>, vector<128x128xbf16>, vector<64x128xf32> -> vector<64x128xf32>
    %123 = arith.addf %116, %122 : vector<64x128xf32>
    %c2_111 = arith.constant 2 : index
    %c0_112 = arith.constant 0 : index
    %c0_113 = arith.constant 0 : index
    %124 = vector.load %arg9[%c2_111, %c0_112, %c0_113] : memref<10x10x128xf32, #tpu.memory_space<vmem>>, vector<8x8x128xf32>
    %125 = vector.shape_cast %124 : vector<8x8x128xf32> to vector<64x128xf32>
    %126 = arith.truncf %125 : vector<64x128xf32> to vector<64x128xbf16>
    %c6_114 = arith.constant 6 : index
    %c0_115 = arith.constant 0 : index
    %c0_116 = arith.constant 0 : index
    %127 = vector.load %arg4[%c6_114, %c0_115, %c0_116] : memref<9x128x128xbf16, #tpu.memory_space<vmem>>, vector<1x128x128xbf16>
    %128 = vector.shape_cast %127 : vector<1x128x128xbf16> to vector<128x128xbf16>
    %cst_117 = arith.constant dense<0.000000e+00> : vector<64x128xf32>
    %129 = tpu.matmul %126, %128, %cst_117 {dimension_numbers = #tpu.dot_dimension_numbers<[1], [0], [0], [1], [0, 0, 1, 1], [], []>} : vector<64x128xbf16>, vector<128x128xbf16>, vector<64x128xf32> -> vector<64x128xf32>
    %130 = arith.addf %123, %129 : vector<64x128xf32>
    %c2_118 = arith.constant 2 : index
    %c1_119 = arith.constant 1 : index
    %c0_120 = arith.constant 0 : index
    %131 = vector.load %arg9[%c2_118, %c1_119, %c0_120] : memref<10x10x128xf32, #tpu.memory_space<vmem>>, vector<8x8x128xf32>
    %132 = vector.shape_cast %131 : vector<8x8x128xf32> to vector<64x128xf32>
    %133 = arith.truncf %132 : vector<64x128xf32> to vector<64x128xbf16>
    %c7_121 = arith.constant 7 : index
    %c0_122 = arith.constant 0 : index
    %c0_123 = arith.constant 0 : index
    %134 = vector.load %arg4[%c7_121, %c0_122, %c0_123] : memref<9x128x128xbf16, #tpu.memory_space<vmem>>, vector<1x128x128xbf16>
    %135 = vector.shape_cast %134 : vector<1x128x128xbf16> to vector<128x128xbf16>
    %cst_124 = arith.constant dense<0.000000e+00> : vector<64x128xf32>
    %136 = tpu.matmul %133, %135, %cst_124 {dimension_numbers = #tpu.dot_dimension_numbers<[1], [0], [0], [1], [0, 0, 1, 1], [], []>} : vector<64x128xbf16>, vector<128x128xbf16>, vector<64x128xf32> -> vector<64x128xf32>
    %137 = arith.addf %130, %136 : vector<64x128xf32>
    %c2_125 = arith.constant 2 : index
    %c2_126 = arith.constant 2 : index
    %c0_127 = arith.constant 0 : index
    %138 = vector.load %arg9[%c2_125, %c2_126, %c0_127] : memref<10x10x128xf32, #tpu.memory_space<vmem>>, vector<8x8x128xf32>
    %139 = vector.shape_cast %138 : vector<8x8x128xf32> to vector<64x128xf32>
    %140 = arith.truncf %139 : vector<64x128xf32> to vector<64x128xbf16>
    %c8_128 = arith.constant 8 : index
    %c0_129 = arith.constant 0 : index
    %c0_130 = arith.constant 0 : index
    %141 = vector.load %arg4[%c8_128, %c0_129, %c0_130] : memref<9x128x128xbf16, #tpu.memory_space<vmem>>, vector<1x128x128xbf16>
    %142 = vector.shape_cast %141 : vector<1x128x128xbf16> to vector<128x128xbf16>
    %cst_131 = arith.constant dense<0.000000e+00> : vector<64x128xf32>
    %143 = tpu.matmul %140, %142, %cst_131 {dimension_numbers = #tpu.dot_dimension_numbers<[1], [0], [0], [1], [0, 0, 1, 1], [], []>} : vector<64x128xbf16>, vector<128x128xbf16>, vector<64x128xf32> -> vector<64x128xf32>
    %144 = arith.addf %137, %143 : vector<64x128xf32>
    %c0_132 = arith.constant 0 : index
    %c0_133 = arith.constant 0 : index
    %145 = vector.load %arg5[%c0_132, %c0_133] : memref<1x128xf32, #tpu.memory_space<vmem>>, vector<1x128xf32>
    %146 = vector.broadcast %145 : vector<1x128xf32> to vector<64x128xf32>
    %147 = arith.addf %144, %146 : vector<64x128xf32>
    %148 = arith.addf %147, %80 : vector<64x128xf32>
    %cst_134 = arith.constant 0.000000e+00 : f32
    %149 = vector.broadcast %cst_134 : f32 to vector<64x128xf32>
    %150 = arith.maximumf %148, %149 : vector<64x128xf32>
    %c0_135 = arith.constant 0 : index
    %c0_136 = arith.constant 0 : index
    %151 = vector.load %arg8[%c0_135, %c0_136] : memref<64x128xf32, #tpu.memory_space<vmem>>, vector<64x128xf32>
    tpu.vector_store %arg8[%c0_135, %c0_136], %150 {strides = array<i32>} : memref<64x128xf32, #tpu.memory_space<vmem>>, vector<64x128xf32>,
    return
  }
  func.func @transform_0(%arg0: i32) -> (i32, i32, i32) {
    %c0_i32 = arith.constant 0 : i32
    %c0_i32_0 = arith.constant 0 : i32
    %c0_i32_1 = arith.constant 0 : i32
    return %arg0, %c0_i32, %c0_i32_0 : i32, i32, i32
  }
  func.func @transform_1(%arg0: i32) -> (i32, i32, i32) {
    %c0_i32 = arith.constant 0 : i32
    %c0_i32_0 = arith.constant 0 : i32
    %c0_i32_1 = arith.constant 0 : i32
    %c0_i32_2 = arith.constant 0 : i32
    return %c0_i32, %c0_i32_0, %c0_i32_1 : i32, i32, i32
  }
  func.func @transform_2(%arg0: i32) -> (i32, i32) {
    %c0_i32 = arith.constant 0 : i32
    %c0_i32_0 = arith.constant 0 : i32
    %c0_i32_1 = arith.constant 0 : i32
    return %c0_i32, %c0_i32_0 : i32, i32
  }
  func.func @transform_3(%arg0: i32) -> (i32, i32, i32) {
    %c0_i32 = arith.constant 0 : i32
    %c0_i32_0 = arith.constant 0 : i32
    %c0_i32_1 = arith.constant 0 : i32
    %c0_i32_2 = arith.constant 0 : i32
    return %c0_i32, %c0_i32_0, %c0_i32_1 : i32, i32, i32
  }
  func.func @transform_4(%arg0: i32) -> (i32, i32) {
    %c0_i32 = arith.constant 0 : i32
    %c0_i32_0 = arith.constant 0 : i32
    %c0_i32_1 = arith.constant 0 : i32
    return %c0_i32, %c0_i32_0 : i32, i32
  }
  func.func @transform_5(%arg0: i32) -> (i32, i32) {
    %c0_i32 = arith.constant 0 : i32
    %c0_i32_0 = arith.constant 0 : i32
    %c0_i32_1 = arith.constant 0 : i32
    return %c0_i32, %c0_i32_0 : i32, i32
  }
  func.func @transform_6(%arg0: i32) -> (i32, i32) {
    %c0_i32 = arith.constant 0 : i32
    %c0_i32_0 = arith.constant 0 : i32
    %c0_i32_1 = arith.constant 0 : i32
    return %c0_i32, %c0_i32_0 : i32, i32
  }
  func.func @transform_7(%arg0: i32) -> (i32, i32) {
    %c0_i32 = arith.constant 0 : i32
    %c0_i32_0 = arith.constant 0 : i32
    return %arg0, %c0_i32 : i32, i32
  }
}

module attributes {stable_mosaic.version = 11 : i64} {
  func.func @_basic_block_kernel(%arg0: i32, %arg1: memref<10x10x8xf32, #tpu.memory_space<vmem>>, %arg2: memref<9x8x128xbf16, #tpu.memory_space<vmem>>, %arg3: memref<1x128xf32, #tpu.memory_space<vmem>>, %arg4: memref<9x128x128xbf16, #tpu.memory_space<vmem>>, %arg5: memref<1x128xf32, #tpu.memory_space<vmem>>, %arg6: memref<8x128xbf16, #tpu.memory_space<vmem>>, %arg7: memref<1x128xf32, #tpu.memory_space<vmem>>, %arg8: memref<64x128xf32, #tpu.memory_space<vmem>>, %arg9: memref<10x10x128xf32, #tpu.memory_space<vmem>>) attributes {dimension_semantics = [#tpu.dimension_semantics<parallel>], iteration_bounds = array<i64: 2>, scalar_prefetch = 0 : i64, scratch_operands = 1 : i64, tpu.core_type = #tpu.core_type<tc>, window_params = [{transform_indices = @transform_0, window_bounds = array<i64: 10, 10, 8>}, {pipeline_mode = #tpu.pipeline_mode<synchronous>, transform_indices = @transform_1, window_bounds = array<i64: 9, 8, 128>}, {pipeline_mode = #tpu.pipeline_mode<synchronous>, transform_indices = @transform_2, window_bounds = array<i64: 1, 128>}, {pipeline_mode = #tpu.pipeline_mode<synchronous>, transform_indices = @transform_3, window_bounds = array<i64: 9, 128, 128>}, {pipeline_mode = #tpu.pipeline_mode<synchronous>, transform_indices = @transform_4, window_bounds = array<i64: 1, 128>}, {pipeline_mode = #tpu.pipeline_mode<synchronous>, transform_indices = @transform_5, window_bounds = array<i64: 8, 128>}, {pipeline_mode = #tpu.pipeline_mode<synchronous>, transform_indices = @transform_6, window_bounds = array<i64: 1, 128>}, {transform_indices = @transform_7, window_bounds = array<i64: 64, 128>}]} {
    %cst = arith.constant 0.000000e+00 : f32
    %0 = vector.broadcast %cst : f32 to vector<64x128xf32>
    %c0 = arith.constant 0 : index
    %c0_0 = arith.constant 0 : index
    %c0_1 = arith.constant 0 : index
    %1 = vector.load %arg1[%c0, %c0_0, %c0_1] : memref<10x10x8xf32, #tpu.memory_space<vmem>>, vector<8x8x8xf32>
    %2 = vector.shape_cast %1 : vector<8x8x8xf32> to vector<64x8xf32>
    %3 = arith.truncf %2 : vector<64x8xf32> to vector<64x8xbf16>
    %c0_2 = arith.constant 0 : index
    %c0_3 = arith.constant 0 : index
    %c0_4 = arith.constant 0 : index
    %4 = vector.load %arg2[%c0_2, %c0_3, %c0_4] : memref<9x8x128xbf16, #tpu.memory_space<vmem>>, vector<1x8x128xbf16>
    %5 = vector.shape_cast %4 : vector<1x8x128xbf16> to vector<8x128xbf16>
    %cst_5 = arith.constant dense<0.000000e+00> : vector<64x128xf32>
    %6 = tpu.matmul %3, %5, %cst_5 {dimension_numbers = #tpu.dot_dimension_numbers<[1], [0], [0], [1], [0, 0, 1, 1], [], []>} : vector<64x8xbf16>, vector<8x128xbf16>, vector<64x128xf32> -> vector<64x128xf32>
    %7 = arith.addf %0, %6 : vector<64x128xf32>
    %c0_6 = arith.constant 0 : index
    %c1 = arith.constant 1 : index
    %c0_7 = arith.constant 0 : index
    %8 = vector.load %arg1[%c0_6, %c1, %c0_7] : memref<10x10x8xf32, #tpu.memory_space<vmem>>, vector<8x8x8xf32>
    %9 = vector.shape_cast %8 : vector<8x8x8xf32> to vector<64x8xf32>
    %10 = arith.truncf %9 : vector<64x8xf32> to vector<64x8xbf16>
    %c1_8 = arith.constant 1 : index
    %c0_9 = arith.constant 0 : index
    %c0_10 = arith.constant 0 : index
    %11 = vector.load %arg2[%c1_8, %c0_9, %c0_10] : memref<9x8x128xbf16, #tpu.memory_space<vmem>>, vector<1x8x128xbf16>
    %12 = vector.shape_cast %11 : vector<1x8x128xbf16> to vector<8x128xbf16>
    %cst_11 = arith.constant dense<0.000000e+00> : vector<64x128xf32>
    %13 = tpu.matmul %10, %12, %cst_11 {dimension_numbers = #tpu.dot_dimension_numbers<[1], [0], [0], [1], [0, 0, 1, 1], [], []>} : vector<64x8xbf16>, vector<8x128xbf16>, vector<64x128xf32> -> vector<64x128xf32>
    %14 = arith.addf %7, %13 : vector<64x128xf32>
    %c0_12 = arith.constant 0 : index
    %c2 = arith.constant 2 : index
    %c0_13 = arith.constant 0 : index
    %15 = vector.load %arg1[%c0_12, %c2, %c0_13] : memref<10x10x8xf32, #tpu.memory_space<vmem>>, vector<8x8x8xf32>
    %16 = vector.shape_cast %15 : vector<8x8x8xf32> to vector<64x8xf32>
    %17 = arith.truncf %16 : vector<64x8xf32> to vector<64x8xbf16>
    %c2_14 = arith.constant 2 : index
    %c0_15 = arith.constant 0 : index
    %c0_16 = arith.constant 0 : index
    %18 = vector.load %arg2[%c2_14, %c0_15, %c0_16] : memref<9x8x128xbf16, #tpu.memory_space<vmem>>, vector<1x8x128xbf16>
    %19 = vector.shape_cast %18 : vector<1x8x128xbf16> to vector<8x128xbf16>
    %cst_17 = arith.constant dense<0.000000e+00> : vector<64x128xf32>
    %20 = tpu.matmul %17, %19, %cst_17 {dimension_numbers = #tpu.dot_dimension_numbers<[1], [0], [0], [1], [0, 0, 1, 1], [], []>} : vector<64x8xbf16>, vector<8x128xbf16>, vector<64x128xf32> -> vector<64x128xf32>
    %21 = arith.addf %14, %20 : vector<64x128xf32>
    %c1_18 = arith.constant 1 : index
    %c0_19 = arith.constant 0 : index
    %c0_20 = arith.constant 0 : index
    %22 = vector.load %arg1[%c1_18, %c0_19, %c0_20] : memref<10x10x8xf32, #tpu.memory_space<vmem>>, vector<8x8x8xf32>
    %23 = vector.shape_cast %22 : vector<8x8x8xf32> to vector<64x8xf32>
    %24 = arith.truncf %23 : vector<64x8xf32> to vector<64x8xbf16>
    %c3 = arith.constant 3 : index
    %c0_21 = arith.constant 0 : index
    %c0_22 = arith.constant 0 : index
    %25 = vector.load %arg2[%c3, %c0_21, %c0_22] : memref<9x8x128xbf16, #tpu.memory_space<vmem>>, vector<1x8x128xbf16>
    %26 = vector.shape_cast %25 : vector<1x8x128xbf16> to vector<8x128xbf16>
    %cst_23 = arith.constant dense<0.000000e+00> : vector<64x128xf32>
    %27 = tpu.matmul %24, %26, %cst_23 {dimension_numbers = #tpu.dot_dimension_numbers<[1], [0], [0], [1], [0, 0, 1, 1], [], []>} : vector<64x8xbf16>, vector<8x128xbf16>, vector<64x128xf32> -> vector<64x128xf32>
    %28 = arith.addf %21, %27 : vector<64x128xf32>
    %c1_24 = arith.constant 1 : index
    %c1_25 = arith.constant 1 : index
    %c0_26 = arith.constant 0 : index
    %29 = vector.load %arg1[%c1_24, %c1_25, %c0_26] : memref<10x10x8xf32, #tpu.memory_space<vmem>>, vector<8x8x8xf32>
    %30 = vector.shape_cast %29 : vector<8x8x8xf32> to vector<64x8xf32>
    %31 = arith.truncf %30 : vector<64x8xf32> to vector<64x8xbf16>
    %c4 = arith.constant 4 : index
    %c0_27 = arith.constant 0 : index
    %c0_28 = arith.constant 0 : index
    %32 = vector.load %arg2[%c4, %c0_27, %c0_28] : memref<9x8x128xbf16, #tpu.memory_space<vmem>>, vector<1x8x128xbf16>
    %33 = vector.shape_cast %32 : vector<1x8x128xbf16> to vector<8x128xbf16>
    %cst_29 = arith.constant dense<0.000000e+00> : vector<64x128xf32>
    %34 = tpu.matmul %31, %33, %cst_29 {dimension_numbers = #tpu.dot_dimension_numbers<[1], [0], [0], [1], [0, 0, 1, 1], [], []>} : vector<64x8xbf16>, vector<8x128xbf16>, vector<64x128xf32> -> vector<64x128xf32>
    %35 = arith.addf %28, %34 : vector<64x128xf32>
    %c1_30 = arith.constant 1 : index
    %c2_31 = arith.constant 2 : index
    %c0_32 = arith.constant 0 : index
    %36 = vector.load %arg1[%c1_30, %c2_31, %c0_32] : memref<10x10x8xf32, #tpu.memory_space<vmem>>, vector<8x8x8xf32>
    %37 = vector.shape_cast %36 : vector<8x8x8xf32> to vector<64x8xf32>
    %38 = arith.truncf %37 : vector<64x8xf32> to vector<64x8xbf16>
    %c5 = arith.constant 5 : index
    %c0_33 = arith.constant 0 : index
    %c0_34 = arith.constant 0 : index
    %39 = vector.load %arg2[%c5, %c0_33, %c0_34] : memref<9x8x128xbf16, #tpu.memory_space<vmem>>, vector<1x8x128xbf16>
    %40 = vector.shape_cast %39 : vector<1x8x128xbf16> to vector<8x128xbf16>
    %cst_35 = arith.constant dense<0.000000e+00> : vector<64x128xf32>
    %41 = tpu.matmul %38, %40, %cst_35 {dimension_numbers = #tpu.dot_dimension_numbers<[1], [0], [0], [1], [0, 0, 1, 1], [], []>} : vector<64x8xbf16>, vector<8x128xbf16>, vector<64x128xf32> -> vector<64x128xf32>
    %42 = arith.addf %35, %41 : vector<64x128xf32>
    %c2_36 = arith.constant 2 : index
    %c0_37 = arith.constant 0 : index
    %c0_38 = arith.constant 0 : index
    %43 = vector.load %arg1[%c2_36, %c0_37, %c0_38] : memref<10x10x8xf32, #tpu.memory_space<vmem>>, vector<8x8x8xf32>
    %44 = vector.shape_cast %43 : vector<8x8x8xf32> to vector<64x8xf32>
    %45 = arith.truncf %44 : vector<64x8xf32> to vector<64x8xbf16>
    %c6 = arith.constant 6 : index
    %c0_39 = arith.constant 0 : index
    %c0_40 = arith.constant 0 : index
    %46 = vector.load %arg2[%c6, %c0_39, %c0_40] : memref<9x8x128xbf16, #tpu.memory_space<vmem>>, vector<1x8x128xbf16>
    %47 = vector.shape_cast %46 : vector<1x8x128xbf16> to vector<8x128xbf16>
    %cst_41 = arith.constant dense<0.000000e+00> : vector<64x128xf32>
    %48 = tpu.matmul %45, %47, %cst_41 {dimension_numbers = #tpu.dot_dimension_numbers<[1], [0], [0], [1], [0, 0, 1, 1], [], []>} : vector<64x8xbf16>, vector<8x128xbf16>, vector<64x128xf32> -> vector<64x128xf32>
    %49 = arith.addf %42, %48 : vector<64x128xf32>
    %c2_42 = arith.constant 2 : index
    %c1_43 = arith.constant 1 : index
    %c0_44 = arith.constant 0 : index
    %50 = vector.load %arg1[%c2_42, %c1_43, %c0_44] : memref<10x10x8xf32, #tpu.memory_space<vmem>>, vector<8x8x8xf32>
    %51 = vector.shape_cast %50 : vector<8x8x8xf32> to vector<64x8xf32>
    %52 = arith.truncf %51 : vector<64x8xf32> to vector<64x8xbf16>
    %c7 = arith.constant 7 : index
    %c0_45 = arith.constant 0 : index
    %c0_46 = arith.constant 0 : index
    %53 = vector.load %arg2[%c7, %c0_45, %c0_46] : memref<9x8x128xbf16, #tpu.memory_space<vmem>>, vector<1x8x128xbf16>
    %54 = vector.shape_cast %53 : vector<1x8x128xbf16> to vector<8x128xbf16>
    %cst_47 = arith.constant dense<0.000000e+00> : vector<64x128xf32>
    %55 = tpu.matmul %52, %54, %cst_47 {dimension_numbers = #tpu.dot_dimension_numbers<[1], [0], [0], [1], [0, 0, 1, 1], [], []>} : vector<64x8xbf16>, vector<8x128xbf16>, vector<64x128xf32> -> vector<64x128xf32>
    %56 = arith.addf %49, %55 : vector<64x128xf32>
    %c2_48 = arith.constant 2 : index
    %c2_49 = arith.constant 2 : index
    %c0_50 = arith.constant 0 : index
    %57 = vector.load %arg1[%c2_48, %c2_49, %c0_50] : memref<10x10x8xf32, #tpu.memory_space<vmem>>, vector<8x8x8xf32>
    %58 = vector.shape_cast %57 : vector<8x8x8xf32> to vector<64x8xf32>
    %59 = arith.truncf %58 : vector<64x8xf32> to vector<64x8xbf16>
    %c8 = arith.constant 8 : index
    %c0_51 = arith.constant 0 : index
    %c0_52 = arith.constant 0 : index
    %60 = vector.load %arg2[%c8, %c0_51, %c0_52] : memref<9x8x128xbf16, #tpu.memory_space<vmem>>, vector<1x8x128xbf16>
    %61 = vector.shape_cast %60 : vector<1x8x128xbf16> to vector<8x128xbf16>
    %cst_53 = arith.constant dense<0.000000e+00> : vector<64x128xf32>
    %62 = tpu.matmul %59, %61, %cst_53 {dimension_numbers = #tpu.dot_dimension_numbers<[1], [0], [0], [1], [0, 0, 1, 1], [], []>} : vector<64x8xbf16>, vector<8x128xbf16>, vector<64x128xf32> -> vector<64x128xf32>
    %63 = arith.addf %56, %62 : vector<64x128xf32>
    %c0_54 = arith.constant 0 : index
    %c0_55 = arith.constant 0 : index
    %64 = vector.load %arg3[%c0_54, %c0_55] : memref<1x128xf32, #tpu.memory_space<vmem>>, vector<1x128xf32>
    %65 = vector.broadcast %64 : vector<1x128xf32> to vector<64x128xf32>
    %66 = arith.addf %63, %65 : vector<64x128xf32>
    %cst_56 = arith.constant 0.000000e+00 : f32
    %67 = vector.broadcast %cst_56 : f32 to vector<64x128xf32>
    %68 = arith.maximumf %66, %67 : vector<64x128xf32>
    %cst_57 = arith.constant 0.000000e+00 : f32
    %69 = vector.broadcast %cst_57 : f32 to vector<10x10x128xf32>
    %c0_58 = arith.constant 0 : index
    %c0_59 = arith.constant 0 : index
    %c0_60 = arith.constant 0 : index
    %70 = vector.load %arg9[%c0_58, %c0_59, %c0_60] : memref<10x10x128xf32, #tpu.memory_space<vmem>>, vector<10x10x128xf32>
    tpu.vector_store %arg9[%c0_58, %c0_59, %c0_60], %69 {strides = array<i32>} : memref<10x10x128xf32, #tpu.memory_space<vmem>>, vector<10x10x128xf32>,
    %71 = vector.shape_cast %68 : vector<64x128xf32> to vector<8x8x128xf32>
    %c1_61 = arith.constant 1 : index
    %c1_62 = arith.constant 1 : index
    %c0_63 = arith.constant 0 : index
    %72 = vector.load %arg9[%c1_61, %c1_62, %c0_63] : memref<10x10x128xf32, #tpu.memory_space<vmem>>, vector<8x8x128xf32>
    tpu.vector_store %arg9[%c1_61, %c1_62, %c0_63], %71 {strides = array<i32>} : memref<10x10x128xf32, #tpu.memory_space<vmem>>, vector<8x8x128xf32>,
    %c1_64 = arith.constant 1 : index
    %c1_65 = arith.constant 1 : index
    %c0_66 = arith.constant 0 : index
    %73 = vector.load %arg1[%c1_64, %c1_65, %c0_66] : memref<10x10x8xf32, #tpu.memory_space<vmem>>, vector<8x8x8xf32>
    %74 = vector.shape_cast %73 : vector<8x8x8xf32> to vector<64x8xf32>
    %75 = arith.truncf %74 : vector<64x8xf32> to vector<64x8xbf16>
    %c0_67 = arith.constant 0 : index
    %c0_68 = arith.constant 0 : index
    %76 = vector.load %arg6[%c0_67, %c0_68] : memref<8x128xbf16, #tpu.memory_space<vmem>>, vector<8x128xbf16>
    %cst_69 = arith.constant dense<0.000000e+00> : vector<64x128xf32>
    %77 = tpu.matmul %75, %76, %cst_69 {dimension_numbers = #tpu.dot_dimension_numbers<[1], [0], [0], [1], [0, 0, 1, 1], [], []>} : vector<64x8xbf16>, vector<8x128xbf16>, vector<64x128xf32> -> vector<64x128xf32>
    %c0_70 = arith.constant 0 : index
    %c0_71 = arith.constant 0 : index
    %78 = vector.load %arg7[%c0_70, %c0_71] : memref<1x128xf32, #tpu.memory_space<vmem>>, vector<1x128xf32>
    %79 = vector.broadcast %78 : vector<1x128xf32> to vector<64x128xf32>
    %80 = arith.addf %77, %79 : vector<64x128xf32>
    %cst_72 = arith.constant 0.000000e+00 : f32
    %81 = vector.broadcast %cst_72 : f32 to vector<64x128xf32>
    %c0_73 = arith.constant 0 : index
    %c0_74 = arith.constant 0 : index
    %c0_75 = arith.constant 0 : index
    %82 = vector.load %arg9[%c0_73, %c0_74, %c0_75] : memref<10x10x128xf32, #tpu.memory_space<vmem>>, vector<8x8x128xf32>
    %83 = vector.shape_cast %82 : vector<8x8x128xf32> to vector<64x128xf32>
    %84 = arith.truncf %83 : vector<64x128xf32> to vector<64x128xbf16>
    %c0_76 = arith.constant 0 : index
    %c0_77 = arith.constant 0 : index
    %c0_78 = arith.constant 0 : index
    %85 = vector.load %arg4[%c0_76, %c0_77, %c0_78] : memref<9x128x128xbf16, #tpu.memory_space<vmem>>, vector<1x128x128xbf16>
    %86 = vector.shape_cast %85 : vector<1x128x128xbf16> to vector<128x128xbf16>
    %cst_79 = arith.constant dense<0.000000e+00> : vector<64x128xf32>
    %87 = tpu.matmul %84, %86, %cst_79 {dimension_numbers = #tpu.dot_dimension_numbers<[1], [0], [0], [1], [0, 0, 1, 1], [], []>} : vector<64x128xbf16>, vector<128x128xbf16>, vector<64x128xf32> -> vector<64x128xf32>
    %88 = arith.addf %81, %87 : vector<64x128xf32>
    %c0_80 = arith.constant 0 : index
    %c1_81 = arith.constant 1 : index
    %c0_82 = arith.constant 0 : index
    %89 = vector.load %arg9[%c0_80, %c1_81, %c0_82] : memref<10x10x128xf32, #tpu.memory_space<vmem>>, vector<8x8x128xf32>
    %90 = vector.shape_cast %89 : vector<8x8x128xf32> to vector<64x128xf32>
    %91 = arith.truncf %90 : vector<64x128xf32> to vector<64x128xbf16>
    %c1_83 = arith.constant 1 : index
    %c0_84 = arith.constant 0 : index
    %c0_85 = arith.constant 0 : index
    %92 = vector.load %arg4[%c1_83, %c0_84, %c0_85] : memref<9x128x128xbf16, #tpu.memory_space<vmem>>, vector<1x128x128xbf16>
    %93 = vector.shape_cast %92 : vector<1x128x128xbf16> to vector<128x128xbf16>
    %cst_86 = arith.constant dense<0.000000e+00> : vector<64x128xf32>
    %94 = tpu.matmul %91, %93, %cst_86 {dimension_numbers = #tpu.dot_dimension_numbers<[1], [0], [0], [1], [0, 0, 1, 1], [], []>} : vector<64x128xbf16>, vector<128x128xbf16>, vector<64x128xf32> -> vector<64x128xf32>
    %95 = arith.addf %88, %94 : vector<64x128xf32>
    %c0_87 = arith.constant 0 : index
    %c2_88 = arith.constant 2 : index
    %c0_89 = arith.constant 0 : index
    %96 = vector.load %arg9[%c0_87, %c2_88, %c0_89] : memref<10x10x128xf32, #tpu.memory_space<vmem>>, vector<8x8x128xf32>
    %97 = vector.shape_cast %96 : vector<8x8x128xf32> to vector<64x128xf32>
    %98 = arith.truncf %97 : vector<64x128xf32> to vector<64x128xbf16>
    %c2_90 = arith.constant 2 : index
    %c0_91 = arith.constant 0 : index
    %c0_92 = arith.constant 0 : index
    %99 = vector.load %arg4[%c2_90, %c0_91, %c0_92] : memref<9x128x128xbf16, #tpu.memory_space<vmem>>, vector<1x128x128xbf16>
    %100 = vector.shape_cast %99 : vector<1x128x128xbf16> to vector<128x128xbf16>
    %cst_93 = arith.constant dense<0.000000e+00> : vector<64x128xf32>
    %101 = tpu.matmul %98, %100, %cst_93 {dimension_numbers = #tpu.dot_dimension_numbers<[1], [0], [0], [1], [0, 0, 1, 1], [], []>} : vector<64x128xbf16>, vector<128x128xbf16>, vector<64x128xf32> -> vector<64x128xf32>
    %102 = arith.addf %95, %101 : vector<64x128xf32>
    %c1_94 = arith.constant 1 : index
    %c0_95 = arith.constant 0 : index
    %c0_96 = arith.constant 0 : index
    %103 = vector.load %arg9[%c1_94, %c0_95, %c0_96] : memref<10x10x128xf32, #tpu.memory_space<vmem>>, vector<8x8x128xf32>
    %104 = vector.shape_cast %103 : vector<8x8x128xf32> to vector<64x128xf32>
    %105 = arith.truncf %104 : vector<64x128xf32> to vector<64x128xbf16>
    %c3_97 = arith.constant 3 : index
    %c0_98 = arith.constant 0 : index
    %c0_99 = arith.constant 0 : index
    %106 = vector.load %arg4[%c3_97, %c0_98, %c0_99] : memref<9x128x128xbf16, #tpu.memory_space<vmem>>, vector<1x128x128xbf16>
    %107 = vector.shape_cast %106 : vector<1x128x128xbf16> to vector<128x128xbf16>
    %cst_100 = arith.constant dense<0.000000e+00> : vector<64x128xf32>
    %108 = tpu.matmul %105, %107, %cst_100 {dimension_numbers = #tpu.dot_dimension_numbers<[1], [0], [0], [1], [0, 0, 1, 1], [], []>} : vector<64x128xbf16>, vector<128x128xbf16>, vector<64x128xf32> -> vector<64x128xf32>
    %109 = arith.addf %102, %108 : vector<64x128xf32>
    %c1_101 = arith.constant 1 : index
    %c1_102 = arith.constant 1 : index
    %c0_103 = arith.constant 0 : index
    %110 = vector.load %arg9[%c1_101, %c1_102, %c0_103] : memref<10x10x128xf32, #tpu.memory_space<vmem>>, vector<8x8x128xf32>
    %111 = vector.shape_cast %110 : vector<8x8x128xf32> to vector<64x128xf32>
    %112 = arith.truncf %111 : vector<64x128xf32> to vector<64x128xbf16>
    %c4_104 = arith.constant 4 : index
    %c0_105 = arith.constant 0 : index
    %c0_106 = arith.constant 0 : index
    %113 = vector.load %arg4[%c4_104, %c0_105, %c0_106] : memref<9x128x128xbf16, #tpu.memory_space<vmem>>, vector<1x128x128xbf16>
    %114 = vector.shape_cast %113 : vector<1x128x128xbf16> to vector<128x128xbf16>
    %cst_107 = arith.constant dense<0.000000e+00> : vector<64x128xf32>
    %115 = tpu.matmul %112, %114, %cst_107 {dimension_numbers = #tpu.dot_dimension_numbers<[1], [0], [0], [1], [0, 0, 1, 1], [], []>} : vector<64x128xbf16>, vector<128x128xbf16>, vector<64x128xf32> -> vector<64x128xf32>
    %116 = arith.addf %109, %115 : vector<64x128xf32>
    %c1_108 = arith.constant 1 : index
    %c2_109 = arith.constant 2 : index
    %c0_110 = arith.constant 0 : index
    %117 = vector.load %arg9[%c1_108, %c2_109, %c0_110] : memref<10x10x128xf32, #tpu.memory_space<vmem>>, vector<8x8x128xf32>
    %118 = vector.shape_cast %117 : vector<8x8x128xf32> to vector<64x128xf32>
    %119 = arith.truncf %118 : vector<64x128xf32> to vector<64x128xbf16>
    %c5_111 = arith.constant 5 : index
    %c0_112 = arith.constant 0 : index
    %c0_113 = arith.constant 0 : index
    %120 = vector.load %arg4[%c5_111, %c0_112, %c0_113] : memref<9x128x128xbf16, #tpu.memory_space<vmem>>, vector<1x128x128xbf16>
    %121 = vector.shape_cast %120 : vector<1x128x128xbf16> to vector<128x128xbf16>
    %cst_114 = arith.constant dense<0.000000e+00> : vector<64x128xf32>
    %122 = tpu.matmul %119, %121, %cst_114 {dimension_numbers = #tpu.dot_dimension_numbers<[1], [0], [0], [1], [0, 0, 1, 1], [], []>} : vector<64x128xbf16>, vector<128x128xbf16>, vector<64x128xf32> -> vector<64x128xf32>
    %123 = arith.addf %116, %122 : vector<64x128xf32>
    %c2_115 = arith.constant 2 : index
    %c0_116 = arith.constant 0 : index
    %c0_117 = arith.constant 0 : index
    %124 = vector.load %arg9[%c2_115, %c0_116, %c0_117] : memref<10x10x128xf32, #tpu.memory_space<vmem>>, vector<8x8x128xf32>
    %125 = vector.shape_cast %124 : vector<8x8x128xf32> to vector<64x128xf32>
    %126 = arith.truncf %125 : vector<64x128xf32> to vector<64x128xbf16>
    %c6_118 = arith.constant 6 : index
    %c0_119 = arith.constant 0 : index
    %c0_120 = arith.constant 0 : index
    %127 = vector.load %arg4[%c6_118, %c0_119, %c0_120] : memref<9x128x128xbf16, #tpu.memory_space<vmem>>, vector<1x128x128xbf16>
    %128 = vector.shape_cast %127 : vector<1x128x128xbf16> to vector<128x128xbf16>
    %cst_121 = arith.constant dense<0.000000e+00> : vector<64x128xf32>
    %129 = tpu.matmul %126, %128, %cst_121 {dimension_numbers = #tpu.dot_dimension_numbers<[1], [0], [0], [1], [0, 0, 1, 1], [], []>} : vector<64x128xbf16>, vector<128x128xbf16>, vector<64x128xf32> -> vector<64x128xf32>
    %130 = arith.addf %123, %129 : vector<64x128xf32>
    %c2_122 = arith.constant 2 : index
    %c1_123 = arith.constant 1 : index
    %c0_124 = arith.constant 0 : index
    %131 = vector.load %arg9[%c2_122, %c1_123, %c0_124] : memref<10x10x128xf32, #tpu.memory_space<vmem>>, vector<8x8x128xf32>
    %132 = vector.shape_cast %131 : vector<8x8x128xf32> to vector<64x128xf32>
    %133 = arith.truncf %132 : vector<64x128xf32> to vector<64x128xbf16>
    %c7_125 = arith.constant 7 : index
    %c0_126 = arith.constant 0 : index
    %c0_127 = arith.constant 0 : index
    %134 = vector.load %arg4[%c7_125, %c0_126, %c0_127] : memref<9x128x128xbf16, #tpu.memory_space<vmem>>, vector<1x128x128xbf16>
    %135 = vector.shape_cast %134 : vector<1x128x128xbf16> to vector<128x128xbf16>
    %cst_128 = arith.constant dense<0.000000e+00> : vector<64x128xf32>
    %136 = tpu.matmul %133, %135, %cst_128 {dimension_numbers = #tpu.dot_dimension_numbers<[1], [0], [0], [1], [0, 0, 1, 1], [], []>} : vector<64x128xbf16>, vector<128x128xbf16>, vector<64x128xf32> -> vector<64x128xf32>
    %137 = arith.addf %130, %136 : vector<64x128xf32>
    %c2_129 = arith.constant 2 : index
    %c2_130 = arith.constant 2 : index
    %c0_131 = arith.constant 0 : index
    %138 = vector.load %arg9[%c2_129, %c2_130, %c0_131] : memref<10x10x128xf32, #tpu.memory_space<vmem>>, vector<8x8x128xf32>
    %139 = vector.shape_cast %138 : vector<8x8x128xf32> to vector<64x128xf32>
    %140 = arith.truncf %139 : vector<64x128xf32> to vector<64x128xbf16>
    %c8_132 = arith.constant 8 : index
    %c0_133 = arith.constant 0 : index
    %c0_134 = arith.constant 0 : index
    %141 = vector.load %arg4[%c8_132, %c0_133, %c0_134] : memref<9x128x128xbf16, #tpu.memory_space<vmem>>, vector<1x128x128xbf16>
    %142 = vector.shape_cast %141 : vector<1x128x128xbf16> to vector<128x128xbf16>
    %cst_135 = arith.constant dense<0.000000e+00> : vector<64x128xf32>
    %143 = tpu.matmul %140, %142, %cst_135 {dimension_numbers = #tpu.dot_dimension_numbers<[1], [0], [0], [1], [0, 0, 1, 1], [], []>} : vector<64x128xbf16>, vector<128x128xbf16>, vector<64x128xf32> -> vector<64x128xf32>
    %144 = arith.addf %137, %143 : vector<64x128xf32>
    %c0_136 = arith.constant 0 : index
    %c0_137 = arith.constant 0 : index
    %145 = vector.load %arg5[%c0_136, %c0_137] : memref<1x128xf32, #tpu.memory_space<vmem>>, vector<1x128xf32>
    %146 = vector.broadcast %145 : vector<1x128xf32> to vector<64x128xf32>
    %147 = arith.addf %144, %146 : vector<64x128xf32>
    %148 = arith.addf %147, %80 : vector<64x128xf32>
    %cst_138 = arith.constant 0.000000e+00 : f32
    %149 = vector.broadcast %cst_138 : f32 to vector<64x128xf32>
    %150 = arith.maximumf %148, %149 : vector<64x128xf32>
    %c0_139 = arith.constant 0 : index
    %c0_140 = arith.constant 0 : index
    %151 = vector.load %arg8[%c0_139, %c0_140] : memref<64x128xf32, #tpu.memory_space<vmem>>, vector<64x128xf32>
    tpu.vector_store %arg8[%c0_139, %c0_140], %150 {strides = array<i32>} : memref<64x128xf32, #tpu.memory_space<vmem>>, vector<64x128xf32>,
    return
  }
  func.func @transform_0(%arg0: i32) -> (i32, i32, i32) {
    %c0_i32 = arith.constant 0 : i32
    %c0_i32_0 = arith.constant 0 : i32
    %c0_i32_1 = arith.constant 0 : i32
    return %arg0, %c0_i32, %c0_i32_0 : i32, i32, i32
  }
  func.func @transform_1(%arg0: i32) -> (i32, i32, i32) {
    %c0_i32 = arith.constant 0 : i32
    %c0_i32_0 = arith.constant 0 : i32
    %c0_i32_1 = arith.constant 0 : i32
    %c0_i32_2 = arith.constant 0 : i32
    return %c0_i32, %c0_i32_0, %c0_i32_1 : i32, i32, i32
  }
  func.func @transform_2(%arg0: i32) -> (i32, i32) {
    %c0_i32 = arith.constant 0 : i32
    %c0_i32_0 = arith.constant 0 : i32
    %c0_i32_1 = arith.constant 0 : i32
    return %c0_i32, %c0_i32_0 : i32, i32
  }
  func.func @transform_3(%arg0: i32) -> (i32, i32, i32) {
    %c0_i32 = arith.constant 0 : i32
    %c0_i32_0 = arith.constant 0 : i32
    %c0_i32_1 = arith.constant 0 : i32
    %c0_i32_2 = arith.constant 0 : i32
    return %c0_i32, %c0_i32_0, %c0_i32_1 : i32, i32, i32
  }
  func.func @transform_4(%arg0: i32) -> (i32, i32) {
    %c0_i32 = arith.constant 0 : i32
    %c0_i32_0 = arith.constant 0 : i32
    %c0_i32_1 = arith.constant 0 : i32
    return %c0_i32, %c0_i32_0 : i32, i32
  }
  func.func @transform_5(%arg0: i32) -> (i32, i32) {
    %c0_i32 = arith.constant 0 : i32
    %c0_i32_0 = arith.constant 0 : i32
    %c0_i32_1 = arith.constant 0 : i32
    return %c0_i32, %c0_i32_0 : i32, i32
  }
  func.func @transform_6(%arg0: i32) -> (i32, i32) {
    %c0_i32 = arith.constant 0 : i32
    %c0_i32_0 = arith.constant 0 : i32
    %c0_i32_1 = arith.constant 0 : i32
    return %c0_i32, %c0_i32_0 : i32, i32
  }
  func.func @transform_7(%arg0: i32) -> (i32, i32) {
    %c0_i32 = arith.constant 0 : i32
    %c0_i32_0 = arith.constant 0 : i32
    return %arg0, %c0_i32 : i32, i32
  }
}

</mosaic_0001>

<bundles_post_ra>
// kernel: _lambda_.2
= control target key start
LH: loop header
LB: loop body
LE: loop exit
PB: predicated region body
PF: predicated region fallthrough
CT: control target
= control target key end

     0   :  { %s3884_s24 = smov 0   ;;  %s4647_s0 = inlined_call_operand.vmem [shape: f32[72,9,4], index: 0, kind: input, shape index: {}]   ;;  %s4648_s1 = inlined_call_operand.vmem [shape: bf16[9,4,128], index: 1, kind: input, shape index: {}]   ;;  %s4649_s2 = inlined_call_operand.vmem [shape: f32[1,128], index: 2, kind: input, shape index: {}, may-alias: {2,4,6}]   ;;  %s4650_s3 = inlined_call_operand.vmem [shape: bf16[9,128,128], index: 3, kind: input, shape index: {}]   ;;  %s4651_s4 = inlined_call_operand.vmem [shape: f32[1,128], index: 4, kind: input, shape index: {}, may-alias: {2,4,6}]   ;;  %s4652_s5 = inlined_call_operand.vmem [shape: bf16[4,128], index: 5, kind: input, shape index: {}]   ;;  %s4653_s6 = inlined_call_operand.vmem [shape: f32[1,128], index: 6, kind: input, shape index: {}, may-alias: {2,4,6}]   ;;  %s4654_s7 = inlined_call_operand.vmem [shape: f32[128,128], index: 7, kind: output, shape index: {}]  }
   0x1 LB: > { %s2775_s25 = sadd.s32 4294967295, %s3841_s24   ;;  %p2779_p0 = scmp.ge.s32.totalorder %s3841_s24, 1  ;;  %s3841_s24 = sphi %s3884_s24, %s17_s24  }
   0x2   : > { %p239_p1 = scmp.lt.s32.totalorder %s3841_s24, 3 }
   0x4   : > { %p240_p2 = pnand %p2779_p0, %p239_p1 }
   0x5   : > { %v2792_v0 = vld [vmem:[%s4648_s1 + $0x2] sm:$0x3] (!%p240_p2)  ;;  %vm327_vm0 = vcmask (!%p240_p2), 1041408   ;;  %s272_s28 = smul.u32 (!%p240_p2), 36, %s2775_s25  ;;  %v298_v2 = vld [vmem:[%s4648_s1] sm:$0x3] (!%p240_p2) }
   0x6   : > { %243 = sbr.rel (%p240_p2) target bundleno = 791 (0x317), region = 48  ;;  %3744 = vmatprep.subr.msk.bf16.mxu0 (!%p240_p2), %vm327_vm0, %v2792_v0  ;;  %v329_v1 = vsel (!%p240_p2), %vm327_vm0, %v2792_v0, 0  ;;  %vm314_vm1 = vcmask (!%p240_p2), 31744   ;;  %v409_v12 = vsel (!%p240_p2), %vm327_vm0, %v298_v2, 0  ;;  %v2801_v15 = vld [vmem:[%s4648_s1 + $0x4] sm:$0x3] (!%p240_p2) }
   0x7   : > { %3261 = vmatpush3.bf16.msra.mxu0 (!%p240_p2), %v329_v1  ;;  %p273_p3 = scmp.lt.s32.totalorder (!%p240_p2), %s272_s28, 71  ;;  %v503_v48 = vsel (!%p240_p2), %vm327_vm0, %v2801_v15, 0  ;;  %v2814_v53 = vld [vmem:[%s4648_s1 + $0x6] sm:$0x3] (!%p240_p2)  ;;  %v1258_v58 = vld [vmem:[%s4652_s5] sm:$0x3] (!%p240_p2) }
   0x8   : > { %3745 = vmatprep.subr.msk.bf16.mxu0 (!%p240_p2), %vm327_vm0, %v298_v2  ;;  %v3764_v59 = vld [vmem:[%s4650_s3 + $0x80] sm:$0xff] (!%p240_p2)   ;;  %3753 = vmatprep.subr.msk.bf16.mxu1 (!%p240_p2), %vm327_vm0, %v1258_v58  ;;  %v1279_v61 = vsel (!%p240_p2), %vm327_vm0, %v1258_v58, 0  ;;  %v2827_v62 = vld [vmem:[%s4648_s1 + $0x8] sm:$0x3] (!%p240_p2) }
   0x9   : > { %3351 = vmatpush3.bf16.msra.mxu1 (!%p240_p2), %v1279_v61  ;;  %v3766_v0 = vld [vmem:[%s4650_s3 + $0x88] sm:$0xff] (!%p240_p2)  }
   0xa   : > { %3408 = vmatprep.subr.bf16.mxu1 (!%p240_p2), %v3764_v59  ;;  %v2840_v61 = vld [vmem:[%s4648_s1 + $0xa] sm:$0x3] (!%p240_p2) }
   0xd   : > { %s4656_s28 = smov (!%p273_p3, %s272_s28), 71 }
   0xe   : > { %s3101_s8 = sshll.u32 %s4656_s28, 4 }
   0xf   : > { %s3906_s11 = scalar_lea.vmem %s4647_s0, %s3101_s8  ;;  %s2782_s8 = sshll.u32 %s2775_s25, 3 }
  0x10   : > { %v2784_v3 = vld [vmem:[%s3906_s11 + $0x90] sm:$0xff]  ;;  %v3910_v4 = vld [vmem:[%s3906_s11 + $0xa0] sm:$0xff]  ;;  %p280_p4 = scmp.lt.s32.totalorder %s2782_s8, 15 }
  0x11   : > { %v3913_v5 = vld [vmem:[%s3906_s11 + $0xb0] sm:$0xff]  ;;  %v308_v6 = vpack.c.bf16 %v3910_v4, %v2784_v3  ;;  %v3917_v7 = vld [vmem:[%s3906_s11 + $0xc0] sm:$0xff]  ;;  %v606_v3 = vsel %vm327_vm0, %v2814_v53, 0 }
  0x12   : > { %v3920_v8 = vld [vmem:[%s3906_s11 + $0xd0] sm:$0xff]  ;;  %v3923_v9 = vld [vmem:[%s3906_s11 + $0xe0] sm:$0xff]  ;;  %v998_v10 = vpack.c.bf16 %v3913_v5, %v3910_v4  ;;  %v309_v11 = vpack.c.bf16 %v3917_v7, %v3913_v5  ;;  %v3765_v4 = vld [vmem:[%s4650_s3 + $0x48] sm:$0xff]   ;;  %s4658_s8 = smov (!%p280_p4, %s2782_s8), 15 }
  0x13   : > { %v310_v13 = vpack.c.bf16 %v3923_v9, %v3920_v8  ;;  %v3933_v14 = vld [vmem:[%s3906_s11 + $0xf0] sm:$0xff]  ;;  %v999_v16 = vpack.c.bf16 %v3920_v8, %v3917_v7  ;;  %3262 = vmatprep.mubr.msk.bf16.mxu0 %vm314_vm1, %v308_v6  ;;  %v3945_v18 = vld [vmem:[%s3906_s11 + $0x20] sm:$0xff]  ;;  %v709_v6 = vsel %vm327_vm0, %v2827_v62, 0  ;;  %v3769_v7 = vld [vmem:[%s4650_s3 + $0x58] sm:$0xff]   ;;  %s2783_s12 = sshll.u32 %s4658_s8, 3 }
  0x14   : > { %v3942_v17 = vld [vmem:[%s3906_s11 + $0x10] sm:$0xff]  ;;  %v1000_v20 = vpack.c.bf16 %v3933_v14, %v3923_v9  ;;  %3263 = vmatmul.mubr.msk.bf16.vlgmr.msra.gmra.mrb[0].mxu0 %vm314_vm1, %v309_v11  ;;  %v3954_v21 = vld [vmem:[%s3906_s11 + $0x40] sm:$0xff]  ;;  %v3773_v9 = vld [vmem:[%s4650_s3 + $0x68] sm:$0xff]   ;;  %s4634_s14 = scalar_lea.vmem %s4654_s7, %s2783_s12 }
  0x15   : > { %v3948_v19 = vld [vmem:[%s3906_s11 + $0x30] sm:$0xff]  ;;  %v3960_v23 = vld [vmem:[%s3906_s11 + $0x60] sm:$0xff]  ;;  %v895_v24 = vpack.c.bf16 %v3945_v18, %v3942_v17  ;;  %3271 = vmatpush3.bf16.msra.mxu0 %v409_v12  ;;  %3266 = vmatprep.mubr.msk.bf16.mxu0 %vm314_vm1, %v310_v13 }
  0x16   : > { %v3957_v22 = vld [vmem:[%s3906_s11 + $0x50] sm:$0xff]  ;;  %v3966_v25 = vld [vmem:[%s3906_s11 + $0x100] sm:$0xff]  ;;  %v896_v28 = vpack.c.bf16 %v3954_v21, %v3948_v19  ;;  %3746 = vmatprep.subr.msk.bf16.mxu0 %vm327_vm0, %v2801_v15  ;;  %v295_v47 = vpack.c.bf16 %v3948_v19, %v3945_v18  ;;  %v3774_v19 = vld [vmem:[%s4650_s3 + $0xa8] sm:$0xff]  }
  0x17   : > { %v286_v26 = vld [vmem:[%s3906_s11] sm:$0xff]  ;;  %v3970_v27 = vld [vmem:[%s3906_s11 + $0x11] sm:$0xff]  ;;  %v897_v29 = vpack.c.bf16 %v3960_v23, %v3957_v22  ;;  %v311_v37 = vpack.c.bf16 %v3966_v25, %v3933_v14  ;;  %v296_v52 = vpack.c.bf16 %v3957_v22, %v3954_v21 }
  0x18   : > { %v3978_v30 = vld [vmem:[%s3906_s11 + $0x21] sm:$0xff]  ;;  %v3981_v31 = vld [vmem:[%s3906_s11 + $0x31] sm:$0xff]  ;;  %v294_v39 = vpack.c.bf16 %v3942_v17, %v286_v26 }
  0x19   : > { %v3984_v32 = vld [vmem:[%s3906_s11 + $0x41] sm:$0xff]  ;;  %v3987_v33 = vld [vmem:[%s3906_s11 + $0x51] sm:$0xff]  ;;  %v1100_v35 = vpack.c.bf16 %v3978_v30, %v3970_v27 }
  0x1a   : > { %v3990_v34 = vld [vmem:[%s3906_s11 + $0x61] sm:$0xff]  ;;  %v1101_v36 = vpack.c.bf16 %v3984_v32, %v3981_v31  ;;  %v2819_v40 = vld [vmem:[%s3906_s11 + $0x1b0] sm:$0xff] }
  0x1b   : > { %v1102_v38 = vpack.c.bf16 %v3990_v34, %v3987_v33  ;;  %v2820_v41 = vld [vmem:[%s3906_s11 + $0x1c0] sm:$0xff]  ;;  %v4008_v43 = vld [vmem:[%s3906_s11 + $0x70] sm:$0xff] }
  0x1c   : > { %3267 = vmatmul.mubr.msk.bf16.gmra.mrb[4].mxu0 %vm314_vm1, %v311_v37  ;;  %v4004_v42 = vpack.c.bf16 %v2820_v41, %v2819_v40  ;;  %v4013_v44 = vld [vmem:[%s3906_s11 + $0x71] sm:$0xff]  ;;  %v2822_v46 = vld [vmem:[%s3906_s11 + $0x1e0] sm:$0xff]  ;;  %v297_v15 = vpack.c.bf16 %v4008_v43, %v3960_v23  ;;  %v485_v40 = vpack.c.bf16 %v3981_v31, %v3978_v30  ;;  %v486_v41 = vpack.c.bf16 %v3987_v33, %v3984_v32 }
  0x1d   : > { %3272 = vmatprep.mubr.msk.bf16.mxu0 %vm314_vm1, %v294_v39  ;;  %v2821_v45 = vld [vmem:[%s3906_s11 + $0x1d0] sm:$0xff]  ;;  %v4021_v49 = vld [vmem:[%s3906_s11 + $0x80] sm:$0xff]  ;;  %v3770_v37 = vld [vmem:[%s4650_s3 + $0x98] sm:$0xff]  }
  0x1e   : > { %3352 = vmatprep.mubr.msk.bf16.mxu1 %vm314_vm1, %v4004_v42  ;;  %v4024_v50 = vld [vmem:[%s3906_s11 + $0x110] sm:$0xff]  ;;  %v4027_v51 = vld [vmem:[%s3906_s11 + $0x81] sm:$0xff]  ;;  %v898_v55 = vpack.c.bf16 %v4021_v49, %v4008_v43  ;;  %v691_v63 = vpack.c.bf16 %v2822_v46, %v2821_v45  ;;  %v3778_v23 = vld [vmem:[%s4650_s3 + $0xb8] sm:$0xff]  }
  0x1f   : > { %v2823_v54 = vld [vmem:[%s3906_s11 + $0x1f0] sm:$0xff]  ;;  %v1001_v56 = vpack.c.bf16 %v4024_v50, %v3966_v25  ;;  %v1103_v57 = vpack.c.bf16 %v4027_v51, %v4013_v44  ;;  %v2824_v60 = vld [vmem:[%s3906_s11 + $0x200] sm:$0xff] }
  0x20   : > { %v692_v1 = vpack.c.bf16 %v2824_v60, %v2823_v54  ;;  %v476_v2 = vld [vmem:[%s3906_s11 + $0x1] sm:$0xff]  ;;  %3353 = vmatmul.mubr.msk.bf16.vlgmr.msra.gmra.mrb[0].mxu1 %vm314_vm1, %v691_v63  ;;  %v2825_v11 = vld [vmem:[%s3906_s11 + $0x210] sm:$0xff]  ;;  %v2884_v25 = vld [vmem:[%s4649_s2] ss:$0 sm:$0xff] }
  0x21   : > { %v2826_v12 = vld [vmem:[%s3906_s11 + $0x220] sm:$0xff]  ;;  %3409 = vmatpush3.bf16.msra.mxu1 %v3764_v59  ;;  %v3768_v13 = vld [vmem:[%s4650_s3 + $0x90] sm:$0xff]   ;;  %v484_v26 = vpack.c.bf16 %v3970_v27, %v476_v2 }
  0x22   : > { %3356 = vmatprep.mubr.msk.bf16.mxu1 %vm314_vm1, %v692_v1  ;;  %3410 = vmatprep.subr.bf16.mxu1 %v3766_v0  ;;  %v693_v39 = vpack.c.bf16 %v2826_v12, %v2825_v11  ;;  %v2806_v45 = vld [vmem:[%s3906_s11 + $0x120] sm:$0xff]  ;;  %v2807_v46 = vld [vmem:[%s3906_s11 + $0x130] sm:$0xff] }
  0x23   : > { %v2810_v54 = vld [vmem:[%s3906_s11 + $0x160] sm:$0xff]  ;;  %v2811_v58 = vld [vmem:[%s3906_s11 + $0x170] sm:$0xff] }
  0x24   : > { %3273 = vmatmul.mubr.msk.bf16.vlgmr.msra.gmra.mrb[0].mxu0 %vm314_vm1, %v295_v47  ;;  %v487_v47 = vpack.c.bf16 %v4013_v44, %v3990_v34  ;;  %v589_v60 = vpack.c.bf16 %v2811_v58, %v2810_v54  ;;  %v2832_v11 = vld [vmem:[%s3906_s11 + $0x121] sm:$0xff]  ;;  %v2833_v12 = vld [vmem:[%s3906_s11 + $0x131] sm:$0xff] }
  0x25   : > { %3281 = vmatpush3.bf16.msra.mxu0 %v503_v48  ;;  %3276 = vmatprep.mubr.msk.bf16.mxu0 %vm314_vm1, %v296_v52  ;;  %v587_v48 = vpack.c.bf16 %v2807_v46, %v2806_v45  ;;  %v2808_v52 = vld [vmem:[%s3906_s11 + $0x140] sm:$0xff]  ;;  %v2839_v45 = vld [vmem:[%s3906_s11 + $0x191] sm:$0xff] }
  0x26   : > { %3747 = vmatprep.subr.msk.bf16.mxu0 %vm327_vm0, %v2814_v53  ;;  %3411 = vmatpush3.bf16.msra.mxu1 %v3766_v0  ;;  %v2809_v53 = vld [vmem:[%s3906_s11 + $0x150] sm:$0xff]  ;;  %v3763_v18 = vld [vmem:[%s4650_s3 + $0x40] sm:$0xff]  }
  0x27   : > { %3412 = vmatprep.subr.bf16.mxu1 %v3768_v13  ;;  %v588_v59 = vpack.c.bf16 %v2809_v53, %v2808_v52  ;;  %v2813_v0 = vld [vmem:[%s3906_s11 + $0x190] sm:$0xff]  ;;  %v3771_v8 = vld [vmem:[%s4650_s3 + $0x60] sm:$0xff]  }
  0x28   : > { %3357 = vmatmul.mubr.msk.bf16.gmra.mrb[4].mxu1 %vm314_vm1, %v693_v39  ;;  %v3767_v5 = vld [vmem:[%s4650_s3 + $0x50] sm:$0xff]   ;;  %v3772_v14 = vld [vmem:[%s4650_s3 + $0xa0] sm:$0xff]  }
  0x29   : > { %v3776_v21 = vld [vmem:[%s4650_s3 + $0xb0] sm:$0xff]   ;;  %v3779_v22 = vld [vmem:[%s4650_s3] sm:$0xff]  }
  0x2a   : > { %3413 = vmatpush3.bf16.msra.mxu1 %v3768_v13  ;;  %v792_v13 = vpack.c.bf16 %v2833_v12, %v2832_v11  ;;  %v3783_v11 = vld [vmem:[%s4650_s3 + $0x10] sm:$0xff]  }
  0x2b   : > { %3414 = vmatprep.subr.bf16.mxu1 %v3770_v37 }
  0x2c   : > { %3277 = vmatmul.mubr.msk.bf16.gmra.mrb[4].mxu0 %vm314_vm1, %v297_v15  ;;  %v2835_v15 = vld [vmem:[%s3906_s11 + $0x151] sm:$0xff] }
  0x2d   : > { %3282 = vmatprep.mubr.msk.bf16.mxu0 %vm314_vm1, %v484_v26  ;;  %v2836_v26 = vld [vmem:[%s3906_s11 + $0x161] sm:$0xff] }
  0x2e   : > { %3415 = vmatpush3.bf16.msra.mxu1 %v3770_v37  ;;  %v2837_v37 = vld [vmem:[%s3906_s11 + $0x171] sm:$0xff] }
  0x2f   : > { %3416 = vmatprep.subr.bf16.mxu1 %v3772_v14 }
  0x32   : > { %3417 = vmatpush3.bf16.msra.mxu1 %v3772_v14 }
  0x33   : > { %3418 = vmatprep.subr.bf16.mxu1 %v3774_v19 }
  0x34   : > { %3283 = vmatmul.mubr.msk.bf16.vlgmr.msra.gmra.mrb[0].mxu0 %vm314_vm1, %v485_v40 }
  0x35   : > { %3291 = vmatpush3.bf16.msra.mxu0 %v606_v3  ;;  %3286 = vmatprep.mubr.msk.bf16.mxu0 %vm314_vm1, %v486_v41  ;;  %v811_v3 = vsel %vm327_vm0, %v2840_v61, 0 }
  0x36   : > { %3748 = vmatprep.subr.msk.bf16.mxu0 %vm327_vm0, %v2827_v62  ;;  %v2812_v62 = vld [vmem:[%s3906_s11 + $0x180] sm:$0xff]  ;;  %3419 = vmatpush3.bf16.msra.mxu1 %v3774_v19  ;;  %v3786_v19 = vld [vmem:[%s4650_s3 + $0xd8] sm:$0xff]  }
  0x37   : > { %v590_v2 = vpack.c.bf16 %v2813_v0, %v2812_v62  ;;  %3420 = vmatprep.subr.bf16.mxu1 %v3776_v21 }
  0x3a   : > { %3421 = vmatpush3.bf16.msra.mxu1 %v3776_v21  ;;  %v3789_v21 = vld [vmem:[%s4650_s3 + $0x28] sm:$0xff]  }
  0x3b   : > { %3422 = vmatprep.subr.bf16.mxu1 %v3778_v23 }
  0x3c   : > { %3287 = vmatmul.mubr.msk.bf16.gmra.mrb[4].mxu0 %vm314_vm1, %v487_v47 }
  0x3d   : > { %3292 = vmatprep.mubr.msk.bf16.mxu0 %vm314_vm1, %v587_v48  ;;  %v2879_v48 = vld [vmem:[%s4648_s1 + $0x10] sm:$0x3] }
  0x3e   : > { %v1119_v17 = vsel %vm327_vm0, %v2879_v48, 0  ;;  %3423 = vmatpush3.bf16.msra.mxu1 %v3778_v23  ;;  %v3788_v23 = vld [vmem:[%s4650_s3 + $0xe0] sm:$0xff]  }
  0x44   : > { %3293 = vmatmul.mubr.msk.bf16.vlgmr.msra.gmra.mrb[0].mxu0 %vm314_vm1, %v588_v59 }
  0x45   : > { %3301 = vmatpush3.bf16.msra.mxu0 %v709_v6  ;;  %3296 = vmatprep.mubr.msk.bf16.mxu0 %vm314_vm1, %v589_v60  ;;  %v2853_v6 = vld [vmem:[%s4648_s1 + $0xc] sm:$0x3] }
  0x46   : > { %3749 = vmatprep.subr.msk.bf16.mxu0 %vm327_vm0, %v2840_v61  ;;  %v914_v41 = vsel %vm327_vm0, %v2853_v6, 0 }
  0x4c   : > { %3297 = vmatmul.mubr.msk.bf16.gmra.mrb[4].mxu0 %vm314_vm1, %v590_v2 }
  0x4d   : > { %3302 = vmatprep.mubr.msk.bf16.mxu0 %vm314_vm1, %v4004_v42  ;;  %v2834_v42 = vld [vmem:[%s3906_s11 + $0x141] sm:$0xff] }
  0x4e   : > { %v793_v40 = vpack.c.bf16 %v2835_v15, %v2834_v42 }
  0x54   : > { %3303 = vmatmul.mubr.msk.bf16.vlgmr.msra.gmra.mrb[0].mxu0 %vm314_vm1, %v691_v63  ;;  %v794_v63 = vpack.c.bf16 %v2837_v37, %v2836_v26 }
  0x55   : > { %3311 = vmatpush3.bf16.msra.mxu0 %v811_v3  ;;  %3306 = vmatprep.mubr.msk.bf16.mxu0 %vm314_vm1, %v692_v1  ;;  %v2866_v1 = vld [vmem:[%s4648_s1 + $0xe] sm:$0x3] }
  0x56   : > { %3750 = vmatprep.subr.msk.bf16.mxu0 %vm327_vm0, %v2853_v6  ;;  %v1017_v47 = vsel %vm327_vm0, %v2866_v1, 0 }
  0x5c   : > { %3307 = vmatmul.mubr.msk.bf16.gmra.mrb[4].mxu0 %vm314_vm1, %v693_v39  ;;  %v2838_v39 = vld [vmem:[%s3906_s11 + $0x181] sm:$0xff] }
  0x5d   : > { %3312 = vmatprep.mubr.msk.bf16.mxu0 %vm314_vm1, %v792_v13  ;;  %v795_v46 = vpack.c.bf16 %v2839_v45, %v2838_v39  ;;  %v3782_v39 = vld [vmem:[%s4650_s3 + $0xc8] sm:$0xff]  }
  0x64   : > { %3313 = vmatmul.mubr.msk.bf16.vlgmr.msra.gmra.mrb[0].mxu0 %vm314_vm1, %v793_v40 }
  0x65   : > { %3321 = vmatpush3.bf16.msra.mxu0 %v914_v41  ;;  %3316 = vmatprep.mubr.msk.bf16.mxu0 %vm314_vm1, %v794_v63 }
  0x66   : > { %3751 = vmatprep.subr.msk.bf16.mxu0 %vm327_vm0, %v2866_v1 }
  0x6c   : > { %3317 = vmatmul.mubr.msk.bf16.gmra.mrb[4].mxu0 %vm314_vm1, %v795_v46  ;;  %v3785_v46 = vld [vmem:[%s4650_s3 + $0x18] sm:$0xff]  }
  0x6d   : > { %3322 = vmatprep.mubr.msk.bf16.mxu0 %vm314_vm1, %v895_v24  ;;  %v4247_v24 = vld [vmem:[%s4650_s3 + $0xc0] sm:$0xff]  }
  0x6e   : > { %3432 = vmatprep.subr.bf16.mxu1 %v4247_v24 }
  0x74   : > { %3323 = vmatmul.mubr.msk.bf16.vlgmr.msra.gmra.mrb[0].mxu0 %vm314_vm1, %v896_v28 }
  0x75   : > { %3331 = vmatpush3.bf16.msra.mxu0 %v1017_v47  ;;  %3326 = vmatprep.mubr.msk.bf16.mxu0 %vm314_vm1, %v897_v29 }
  0x76   : > { %3752 = vmatprep.subr.msk.bf16.mxu0 %vm327_vm0, %v2879_v48 }
  0x7c   : > { %3327 = vmatmul.mubr.msk.bf16.gmra.mrb[4].mxu0 %vm314_vm1, %v898_v55 }
  0x7d   : > { %3332 = vmatprep.mubr.msk.bf16.mxu0 %vm314_vm1, %v998_v10  ;;  %v3843_v10 = vmov 0.0  }
  0x7e   : > { %1223 = vst [vmem:[#allocation2 + $0x30] sm:$0xff] %v3843_v10  ;;  %1224 = vst [vmem:[#allocation2 + $0x38] sm:$0x3] %v3843_v10 }
  0x7f   : > { %1217 = vst [vmem:[#allocation2] sm:$0xff] %v3843_v10  ;;  %1218 = vst [vmem:[#allocation2 + $0x8] sm:$0x3] %v3843_v10 }
  0x80   : > { %1219 = vst [vmem:[#allocation2 + $0x10] sm:$0xff] %v3843_v10  ;;  %1220 = vst [vmem:[#allocation2 + $0x18] sm:$0x3] %v3843_v10 }
  0x81   : > { %1221 = vst [vmem:[#allocation2 + $0x20] sm:$0xff] %v3843_v10  ;;  %1222 = vst [vmem:[#allocation2 + $0x28] sm:$0x3] %v3843_v10 }
  0x82   : > { %1225 = vst [vmem:[#allocation2 + $0x40] sm:$0xff] %v3843_v10  ;;  %1226 = vst [vmem:[#allocation2 + $0x48] sm:$0x3] %v3843_v10 }
  0x83   : > { %1227 = vst [vmem:[#allocation2 + $0x50] sm:$0xff] %v3843_v10  ;;  %1228 = vst [vmem:[#allocation2 + $0x58] sm:$0x3] %v3843_v10 }
  0x84   : > { %3333 = vmatmul.mubr.msk.bf16.vlgmr.msra.gmra.mrb[0].mxu0 %vm314_vm1, %v999_v16  ;;  %1229 = vst [vmem:[#allocation2 + $0x60] sm:$0xff] %v3843_v10  ;;  %1230 = vst [vmem:[#allocation2 + $0x68] sm:$0x3] %v3843_v10  ;;  %v3775_v16 = vld [vmem:[%s4650_s3 + $0x70] sm:$0xff]  }
  0x85   : > { %3341 = vmatpush3.bf16.msra.mxu0 %v1119_v17  ;;  %3336 = vmatprep.mubr.msk.bf16.mxu0 %vm314_vm1, %v1000_v20  ;;  %1231 = vst [vmem:[#allocation2 + $0x70] sm:$0xff] %v3843_v10  ;;  %1232 = vst [vmem:[#allocation2 + $0x78] sm:$0x3] %v3843_v10  ;;  %v3777_v20 = vld [vmem:[%s4650_s3 + $0x78] sm:$0xff]  }
  0x86   : > { %3360 = vmatprep.subr.bf16.mxu0 %v3763_v18  ;;  %1233 = vst [vmem:[#allocation2 + $0x80] sm:$0xff] %v3843_v10  ;;  %1234 = vst [vmem:[#allocation2 + $0x88] sm:$0x3] %v3843_v10  ;;  %v1629_v62 = vld [vmem:[#allocation2 + $0x2] sm:$0xff] }
  0x87   : > { %1235 = vst [vmem:[#allocation2 + $0x90] sm:$0xff] %v3843_v10  ;;  %1236 = vst [vmem:[#allocation2 + $0x98] sm:$0x3] %v3843_v10 }
  0x8c   : > { %3337 = vmatmul.mubr.msk.bf16.gmra.mrb[4].mxu0 %vm314_vm1, %v1001_v56  ;;  %v3781_v56 = vld [vmem:[%s4650_s3 + $0x8] sm:$0xff]  }
  0x8d   : > { %3342 = vmatprep.mubr.msk.bf16.mxu0 %vm314_vm1, %v1100_v35  ;;  %v1374_v35 = vld [vmem:[#allocation2 + $0x1] sm:$0xff] }
  0x94   : > { %3343 = vmatmul.mubr.msk.bf16.vlgmr.msra.gmra.mrb[0].mxu0 %vm314_vm1, %v1101_v36 }
  0x95   : > { %3346 = vmatprep.mubr.msk.bf16.mxu0 %vm314_vm1, %v1102_v38  ;;  %3361 = vmatpush3.bf16.msra.mxu0 %v3763_v18  ;;  %v3784_v18 = vld [vmem:[%s4650_s3 + $0xd0] sm:$0xff]  }
  0x96   : > { %3362 = vmatprep.subr.bf16.mxu0 %v3765_v4 }
  0x99   : > { %3363 = vmatpush3.bf16.msra.mxu0 %v3765_v4 }
  0x9a   : > { %3364 = vmatprep.subr.bf16.mxu0 %v3767_v5 }
  0x9c   : > { %3347 = vmatmul.mubr.msk.bf16.gmra.mrb[4].mxu0 %vm314_vm1, %v1103_v57 }
  0x9d   : > { %3365 = vmatpush3.bf16.msra.mxu0 %v3767_v5  ;;  %v3787_v5 = vld [vmem:[%s4650_s3 + $0x20] sm:$0xff]  }
  0x9e   : > { %3366 = vmatprep.subr.bf16.mxu0 %v3769_v7 }
  0xa1   : > { %3367 = vmatpush3.bf16.msra.mxu0 %v3769_v7 }
  0xa2   : > { %3368 = vmatprep.subr.bf16.mxu0 %v3771_v8 }
  0xa5   : > { %3369 = vmatpush3.bf16.msra.mxu0 %v3771_v8 }
  0xa6   : > { %3370 = vmatprep.subr.bf16.mxu0 %v3773_v9 }
  0xa9   : > { %3371 = vmatpush3.bf16.msra.mxu0 %v3773_v9 }
  0xaa   : > { %3372 = vmatprep.subr.bf16.mxu0 %v3775_v16 }
  0xad   : > { %3373 = vmatpush3.bf16.msra.mxu0 %v3775_v16 }
  0xae   : > { %3374 = vmatprep.subr.bf16.mxu0 %v3777_v20 }
  0xb1   : > { %3375 = vmatpush3.bf16.msra.mxu0 %v3777_v20 }
  0xb2   : > { %3384 = vmatprep.subr.bf16.mxu0 %v3779_v22 }
 0x167   : > { %v3344_v27 = vpop.f32.mrb[0].mxu0 }
 0x168   : > { %v1203_v28 = vadd.f32 %v3344_v27, %v2884_v25  ;;  %v1155_v29 = vpop.f32.mrb[1].mxu0  ;;  %v3793_v27 = vld [vmem:[%s4650_s3 + $0x38] sm:$0xff]  }
 0x169   : > { %v1201_v30 = vadd.f32 %v2884_v25, %v1155_v29  ;;  %v3345_v31 = vpop.f32.mrb[2].mxu0  ;;  %v4381_v29 = vld [vmem:[%s4650_s3 + $0x200] sm:$0xff]  }
 0x16a   : > { %v4253_v32 = vmax.f32 %v1203_v28, 0.0  ;;  %v1204_v33 = vadd.f32 %v3345_v31, %v2884_v25  ;;  %v1158_v34 = vpop.f32.mrb[3].mxu0  ;;  %v3792_v28 = vld [vmem:[%s4650_s3 + $0xf0] sm:$0xff]   ;;  %v3794_v31 = vld [vmem:[%s4650_s3 + $0xf8] sm:$0xff]  }
 0x16b   : > { %v4255_v36 = vmax.f32 %v1201_v30, 0.0  ;;  %v1202_v38 = vadd.f32 %v2884_v25, %v1158_v34 }
 0x16c   : > { %1240 = vst [vmem:[#allocation2 + $0x31] sm:$0xff] %v4253_v32  ;;  %v4258_v43 = vmax.f32 %v1204_v33, 0.0 }
 0x16d   : > { %1238 = vst [vmem:[#allocation2 + $0x11] sm:$0xff] %v4255_v36  ;;  %v4261_v44 = vmax.f32 %v1202_v38, 0.0  ;;  %v1382_v49 = vpack.c.bf16 %v4255_v36, %v1374_v35 }
 0x16e   : > { %1241 = vst [vmem:[#allocation2 + $0x41] sm:$0xff] %v4258_v43  ;;  %v1938_v50 = vpack.c.bf16 %v4258_v43, %v4253_v32 }
 0x16f   : > { %1239 = vst [vmem:[#allocation2 + $0x21] sm:$0xff] %v4261_v44  ;;  %v3348_v51 = vpop.f32.mrb[4].mxu0  ;;  %3376 = vmatprep.mubr.bf16.mxu0 %v1382_v49  ;;  %v4270_v55 = vpack.c.bf16 %v4253_v32, %v4261_v44  ;;  %v1937_v57 = vpack.c.bf16 %v4261_v44, %v4255_v36  ;;  %v4394_v49 = vld [vmem:[%s4650_s3 + $0x208] sm:$0xff]   ;;  %v4461_v44 = vpop.f32.mrb[0].mxu1  ;;  %v3814_v32 = vld [vmem:[%s4650_s3 + $0x158] sm:$0xff]  }
 0x170   : > { %v1207_v52 = vadd.f32 %v3348_v51, %v2884_v25  ;;  %v1171_v53 = vpop.f32.mrb[5].mxu0  ;;  %v3795_v51 = vld [vmem:[%s4650_s3 + $0x100] sm:$0xff]   ;;  %v3805_v36 = vld [vmem:[%s4650_s3 + $0x128] sm:$0xff]  }
 0x171   : > { %v1205_v54 = vadd.f32 %v2884_v25, %v1171_v53  ;;  %v3349_v58 = vpop.f32.mrb[6].mxu0  ;;  %3377 = vmatmul.mubr.bf16.vlgmr.msra.gmra.mrb[8].mxu0 %v4270_v55 }
 0x172   : > { %v4278_v59 = vmax.f32 %v1207_v52, 0.0  ;;  %v1208_v60 = vadd.f32 %v3349_v58, %v2884_v25  ;;  %v1174_v61 = vpop.f32.mrb[7].mxu0  ;;  %3385 = vmatpush3.bf16.msra.mxu0 %v3779_v22  ;;  %v4406_v52 = vld [vmem:[%s4650_s3 + $0x210] sm:$0xff]  }
 0x173   : > { %v4280_v0 = vmax.f32 %v1205_v54, 0.0  ;;  %v1206_v2 = vadd.f32 %v2884_v25, %v1174_v61  ;;  %3386 = vmatprep.subr.bf16.mxu0 %v3781_v56  ;;  %v4294_v42 = vld [vmem:[#allocation2 + $0x32] sm:$0xff]  ;;  %v3790_v25 = vld [vmem:[%s4650_s3 + $0xe8] sm:$0xff]  }
 0x174   : > { %1244 = vst [vmem:[#allocation2 + $0x71] sm:$0xff] %v4278_v59  ;;  %v4283_v3 = vmax.f32 %v1208_v60, 0.0  ;;  %v4285_v6 = vld [vmem:[#allocation2 + $0x12] sm:$0xff]  ;;  %v3797_v54 = vld [vmem:[%s4650_s3 + $0x108] sm:$0xff]  }
 0x175   : > { %1242 = vst [vmem:[#allocation2 + $0x51] sm:$0xff] %v4280_v0  ;;  %v4291_v12 = vmax.f32 %v1206_v2, 0.0  ;;  %v1637_v13 = vpack.c.bf16 %v4285_v6, %v1629_v62  ;;  %v4298_v15 = vpack.c.bf16 %v4280_v0, %v4258_v43  ;;  %v4300_v26 = vld [vmem:[#allocation2 + $0x42] sm:$0xff]  ;;  %v1347_v40 = vld [vmem:[#allocation2 + $0x10] sm:$0xff]  ;;  %v4418_v62 = vld [vmem:[%s4650_s3 + $0x218] sm:$0xff]  }
 0x176   : > { %1245 = vst [vmem:[#allocation2 + $0x81] sm:$0xff] %v4283_v3  ;;  %v4303_v37 = vld [vmem:[#allocation2 + $0x22] sm:$0xff]  ;;  %3387 = vmatpush3.bf16.msra.mxu0 %v3781_v56  ;;  %v1940_v63 = vpack.c.bf16 %v4283_v3, %v4278_v59  ;;  %v2088_v41 = vpack.c.bf16 %v4300_v26, %v4294_v42  ;;  %v1354_v17 = vpack.c.bf16 %v1347_v40, %v3843_v10  ;;  %v1349_v33 = vld [vmem:[#allocation2 + $0x30] sm:$0xff] }
 0x177   : > { %1243 = vst [vmem:[#allocation2 + $0x61] sm:$0xff] %v4291_v12  ;;  %3424 = vmatprep.mubr.bf16.mxu1 %v1637_v13  ;;  %v4312_v1 = vpack.c.bf16 %v4294_v42, %v4303_v37  ;;  %3380 = vmatprep.mubr.bf16.mxu0 %v4298_v15  ;;  %v4320_v45 = vpack.c.bf16 %v4278_v59, %v4291_v12  ;;  %v1780_v8 = vld [vmem:[#allocation2 + $0x20] sm:$0xff]  ;;  %v3799_v2 = vld [vmem:[%s4650_s3 + $0x110] sm:$0xff]   ;;  %v3822_v42 = vld [vmem:[%s4650_s3 + $0x198] sm:$0xff]  }
 0x178   : > { %3388 = vmatprep.subr.bf16.mxu0 %v3783_v11  ;;  %v1939_v47 = vpack.c.bf16 %v4291_v12, %v4280_v0  ;;  %v2087_v48 = vpack.c.bf16 %v4303_v37, %v4285_v6  ;;  %v1787_v20 = vpack.c.bf16 %v1780_v8, %v1347_v40  ;;  %v4386_v34 = vpack.c.bf16 %v1349_v33, %v1780_v8  ;;  %v1782_v35 = vld [vmem:[#allocation2 + $0x40] sm:$0xff]  ;;  %v3817_v59 = vld [vmem:[%s4650_s3 + $0x170] sm:$0xff]   ;;  %v3818_v0 = vld [vmem:[%s4650_s3 + $0x178] sm:$0xff]  }
 0x179   : > { %3425 = vmatmul.mubr.bf16.vlgmr.msra.gmra.mrb[8].mxu1 %v4312_v1  ;;  %3381 = vmatmul.mubr.bf16.gmra.mrb[12].mxu0 %v4320_v45  ;;  %v1788_v53 = vpack.c.bf16 %v1782_v35, %v1349_v33  ;;  %v4432_v13 = vld [vmem:[%s4650_s3 + $0x220] sm:$0xff]   ;;  %v3820_v12 = vld [vmem:[%s4650_s3 + $0x188] sm:$0xff]   ;;  %v3821_v37 = vld [vmem:[%s4650_s3 + $0x190] sm:$0xff]  }
 0x17a   : > { %3433 = vmatpush3.bf16.msra.mxu1 %v4247_v24  ;;  %3389 = vmatpush3.bf16.msra.mxu0 %v3783_v11  ;;  %v3791_v24 = vld [vmem:[%s4650_s3 + $0x30] sm:$0xff]   ;;  %v3815_v43 = vld [vmem:[%s4650_s3 + $0x160] sm:$0xff]  }
 0x17b   : > { %3434 = vmatprep.subr.bf16.mxu1 %v3782_v39  ;;  %3400 = vmatprep.mubr.bf16.mxu0 %v1354_v17  ;;  %v4347_v14 = vld [vmem:[#allocation2 + $0x72] sm:$0xff]  ;;  %v3819_v6 = vld [vmem:[%s4650_s3 + $0x180] sm:$0xff]  }
 0x17c   : > { %v4336_v4 = vld [vmem:[#allocation2 + $0x52] sm:$0xff]  ;;  %3390 = vmatprep.subr.bf16.mxu0 %v3785_v46  ;;  %v3831_v33 = vld [vmem:[%s4650_s3 + $0x1e0] sm:$0xff]  }
 0x17d   : > { %v4343_v7 = vpack.c.bf16 %v4336_v4, %v4300_v26  ;;  %v1351_v30 = vld [vmem:[#allocation2 + $0x50] sm:$0xff]  ;;  %v4424_v11 = vld [vmem:[#allocation2 + $0x80] sm:$0xff] }
 0x17e   : > { %3435 = vmatpush3.bf16.msra.mxu1 %v3782_v39  ;;  %v4345_v9 = vld [vmem:[#allocation2 + $0x62] sm:$0xff]  ;;  %3391 = vmatpush3.bf16.msra.mxu0 %v3785_v46  ;;  %v4389_v38 = vpack.c.bf16 %v1351_v30, %v1782_v35  ;;  %v1353_v60 = vld [vmem:[#allocation2 + $0x70] sm:$0xff]  ;;  %v3801_v39 = vld [vmem:[%s4650_s3 + $0x118] sm:$0xff]  }
 0x17f   : > { %3428 = vmatprep.mubr.bf16.mxu1 %v4343_v7  ;;  %3436 = vmatprep.subr.bf16.mxu1 %v3784_v18  ;;  %v4352_v16 = vpack.c.bf16 %v4347_v14, %v4345_v9  ;;  %v2089_v22 = vpack.c.bf16 %v4345_v9, %v4336_v4  ;;  %v1784_v56 = vld [vmem:[#allocation2 + $0x60] sm:$0xff]  ;;  %v1790_v40 = vpack.c.bf16 %v4424_v11, %v1353_v60  ;;  %v4456_v17 = vld [vmem:[%s4650_s3 + $0x230] sm:$0xff]   ;;  %v3826_v4 = vld [vmem:[%s4650_s3 + $0x1b8] sm:$0xff]  }
 0x180   : > { %3392 = vmatprep.subr.bf16.mxu0 %v3787_v5  ;;  %v1789_v58 = vpack.c.bf16 %v1784_v56, %v1351_v30  ;;  %v4412_v61 = vpack.c.bf16 %v1353_v60, %v1784_v56  ;;  %v3803_v46 = vld [vmem:[%s4650_s3 + $0x120] sm:$0xff]   ;;  %v2241_v30 = vpack.c.bf16 %v3843_v10, %v4424_v11  ;;  %v3832_v10 = vld [vmem:[%s4650_s3 + $0x1e8] sm:$0xff]   ;;  %v2387_v35 = vld [vmem:[#allocation2 + $0x91] sm:$0xff] }
 0x181   : > { %3429 = vmatmul.mubr.bf16.gmra.mrb[12].mxu1 %v4352_v16  ;;  %v3823_v26 = vld [vmem:[%s4650_s3 + $0x1a0] sm:$0xff]  }
 0x182   : > { %3437 = vmatpush3.bf16.msra.mxu1 %v3784_v18  ;;  %3448 = vmatprep.mubr.bf16.mxu1 %v1787_v20  ;;  %v4470_v18 = vpop.f32.mrb[1].mxu1  ;;  %v3809_v20 = vld [vmem:[%s4650_s3 + $0x138] sm:$0xff]   ;;  %v3827_v9 = vld [vmem:[%s4650_s3 + $0x1c0] sm:$0xff]  }
 0x183   : > { %3438 = vmatprep.subr.bf16.mxu1 %v3786_v19  ;;  %3393 = vmatpush3.bf16.msra.mxu0 %v3787_v5  ;;  %v3807_v5 = vld [vmem:[%s4650_s3 + $0x130] sm:$0xff]   ;;  %v4475_v8 = vpop.f32.mrb[2].mxu1 }
 0x184   : > { %3394 = vmatprep.subr.bf16.mxu0 %v3789_v21 }
 0x186   : > { %3439 = vmatpush3.bf16.msra.mxu1 %v3786_v19  ;;  %v4478_v19 = vpop.f32.mrb[3].mxu1 }
 0x187   : > { %3440 = vmatprep.subr.bf16.mxu1 %v3788_v23  ;;  %3395 = vmatpush3.bf16.msra.mxu0 %v3789_v21  ;;  %v3811_v21 = vld [vmem:[%s4650_s3 + $0x140] sm:$0xff]  }
 0x188   : > { %3396 = vmatprep.subr.bf16.mxu0 %v3791_v24 }
 0x18a   : > { %3441 = vmatpush3.bf16.msra.mxu1 %v3788_v23  ;;  %v3812_v23 = vld [vmem:[%s4650_s3 + $0x148] sm:$0xff]  }
 0x18b   : > { %3442 = vmatprep.subr.bf16.mxu1 %v3790_v25  ;;  %3397 = vmatpush3.bf16.msra.mxu0 %v3791_v24  ;;  %v4495_v24 = vpop.f32.mrb[4].mxu1 }
 0x18c   : > { %3398 = vmatprep.subr.bf16.mxu0 %v3793_v27 }
 0x18e   : > { %3443 = vmatpush3.bf16.msra.mxu1 %v3790_v25  ;;  %v4500_v25 = vpop.f32.mrb[5].mxu1 }
 0x18f   : > { %3444 = vmatprep.subr.bf16.mxu1 %v3792_v28  ;;  %3399 = vmatpush3.bf16.msra.mxu0 %v3793_v27  ;;  %v4505_v27 = vpop.f32.mrb[6].mxu1 }
 0x190   : > { %3552 = vmatprep.subr.bf16.mxu0 %v4381_v29 }
 0x192   : > { %3445 = vmatpush3.bf16.msra.mxu1 %v3792_v28  ;;  %3401 = vmatmul.mubr.bf16.vlgmr.msra.gmra.mrb[8].mxu0 %v4386_v34  ;;  %v4507_v28 = vpop.f32.mrb[7].mxu1 }
 0x193   : > { %3446 = vmatprep.subr.bf16.mxu1 %v3794_v31  ;;  %3404 = vmatprep.mubr.bf16.mxu0 %v4389_v38 }
 0x194   : > { %3553 = vmatpush3.bf16.msra.mxu0 %v4381_v29 }
 0x195   : > { %3554 = vmatprep.subr.bf16.mxu0 %v4394_v49 }
 0x196   : > { %3447 = vmatpush3.bf16.msra.mxu1 %v3794_v31  ;;  %v3830_v31 = vld [vmem:[%s4650_s3 + $0x1d8] sm:$0xff]  }
 0x197   : > { %3456 = vmatprep.subr.bf16.mxu1 %v3795_v51 }
 0x198   : > { %3555 = vmatpush3.bf16.msra.mxu0 %v4394_v49 }
 0x199   : > { %3449 = vmatmul.mubr.bf16.vlgmr.msra.gmra.mrb[8].mxu1 %v1788_v53  ;;  %3556 = vmatprep.subr.bf16.mxu0 %v4406_v52 }
 0x19a   : > { %3452 = vmatprep.mubr.bf16.mxu1 %v1789_v58  ;;  %3457 = vmatpush3.bf16.msra.mxu1 %v3795_v51 }
 0x19b   : > { %3458 = vmatprep.subr.bf16.mxu1 %v3797_v54  ;;  %3405 = vmatmul.mubr.bf16.gmra.mrb[12].mxu0 %v4412_v61 }
 0x19c   : > { %3557 = vmatpush3.bf16.msra.mxu0 %v4406_v52  ;;  %3568 = vmatprep.mubr.bf16.mxu0 %v4312_v1  ;;  %v4443_v1 = vld [vmem:[%s4650_s3 + $0x228] sm:$0xff]  }
 0x19d   : > { %3558 = vmatprep.subr.bf16.mxu0 %v4418_v62 }
 0x19e   : > { %3459 = vmatpush3.bf16.msra.mxu1 %v3797_v54 }
 0x19f   : > { %3460 = vmatprep.subr.bf16.mxu1 %v3799_v2 }
 0x1a0   : > { %3559 = vmatpush3.bf16.msra.mxu0 %v4418_v62 }
 0x1a1   : > { %3453 = vmatmul.mubr.bf16.gmra.mrb[12].mxu1 %v1790_v40  ;;  %3560 = vmatprep.subr.bf16.mxu0 %v4432_v13 }
 0x1a2   : > { %3461 = vmatpush3.bf16.msra.mxu1 %v3799_v2  ;;  %3472 = vmatprep.mubr.bf16.mxu1 %v1937_v57  ;;  %v4468_v57 = vld [vmem:[%s4650_s3 + $0x238] sm:$0xff]  }
 0x1a3   : > { %3462 = vmatprep.subr.bf16.mxu1 %v3801_v39 }
 0x1a4   : > { %3561 = vmatpush3.bf16.msra.mxu0 %v4432_v13 }
 0x1a5   : > { %3562 = vmatprep.subr.bf16.mxu0 %v4443_v1 }
 0x1a6   : > { %3463 = vmatpush3.bf16.msra.mxu1 %v3801_v39 }
 0x1a7   : > { %3464 = vmatprep.subr.bf16.mxu1 %v3803_v46 }
 0x1a8   : > { %3563 = vmatpush3.bf16.msra.mxu0 %v4443_v1 }
 0x1a9   : > { %3564 = vmatprep.subr.bf16.mxu0 %v4456_v17 }
 0x1aa   : > { %3465 = vmatpush3.bf16.msra.mxu1 %v3803_v46 }
 0x1ab   : > { %3466 = vmatprep.subr.bf16.mxu1 %v3805_v36 }
 0x1ac   : > { %3565 = vmatpush3.bf16.msra.mxu0 %v4456_v17 }
 0x1ad   : > { %3566 = vmatprep.subr.bf16.mxu0 %v4468_v57 }
 0x1ae   : > { %3467 = vmatpush3.bf16.msra.mxu1 %v3805_v36 }
 0x1af   : > { %3468 = vmatprep.subr.bf16.mxu1 %v3807_v5 }
 0x1b0   : > { %3567 = vmatpush3.bf16.msra.mxu0 %v4468_v57 }
 0x1b2   : > { %3469 = vmatpush3.bf16.msra.mxu1 %v3807_v5 }
 0x1b3   : > { %3470 = vmatprep.subr.bf16.mxu1 %v3809_v20  ;;  %3569 = vmatmul.mubr.bf16.vlgmr.msra.gmra.mrb[16].mxu0 %v4343_v7  ;;  %v3813_v7 = vld [vmem:[%s4650_s3 + $0x150] sm:$0xff]  }
 0x1b6   : > { %3471 = vmatpush3.bf16.msra.mxu1 %v3809_v20 }
 0x1b7   : > { %3480 = vmatprep.subr.bf16.mxu1 %v3811_v21 }
 0x1b9   : > { %3473 = vmatmul.mubr.bf16.vlgmr.msra.gmra.mrb[8].mxu1 %v1938_v50  ;;  %v3816_v50 = vld [vmem:[%s4650_s3 + $0x168] sm:$0xff]  }
 0x1ba   : > { %3476 = vmatprep.mubr.bf16.mxu1 %v1939_v47  ;;  %3481 = vmatpush3.bf16.msra.mxu1 %v3811_v21 }
 0x1bb   : > { %3482 = vmatprep.subr.bf16.mxu1 %v3812_v23 }
 0x1be   : > { %3483 = vmatpush3.bf16.msra.mxu1 %v3812_v23 }
 0x1bf   : > { %3484 = vmatprep.subr.bf16.mxu1 %v3813_v7 }
 0x1c1   : > { %3477 = vmatmul.mubr.bf16.gmra.mrb[12].mxu1 %v1940_v63  ;;  %v4545_v63 = vld [vmem:[#allocation2 + $0x82] sm:$0xff] }
 0x1c2   : > { %3485 = vmatpush3.bf16.msra.mxu1 %v3813_v7  ;;  %3496 = vmatprep.mubr.bf16.mxu1 %v2087_v48  ;;  %v2090_v47 = vpack.c.bf16 %v4545_v63, %v4347_v14  ;;  %v3825_v48 = vld [vmem:[%s4650_s3 + $0x1b0] sm:$0xff]   ;;  %v3828_v14 = vld [vmem:[%s4650_s3 + $0x1c8] sm:$0xff]  }
 0x1c3   : > { %3486 = vmatprep.subr.bf16.mxu1 %v3814_v32 }
 0x1c6   : > { %3487 = vmatpush3.bf16.msra.mxu1 %v3814_v32 }
 0x1c7   : > { %3488 = vmatprep.subr.bf16.mxu1 %v3815_v43 }
 0x1ca   : > { %3489 = vmatpush3.bf16.msra.mxu1 %v3815_v43 }
 0x1cb   : > { %3490 = vmatprep.subr.bf16.mxu1 %v3816_v50 }
 0x1ce   : > { %3491 = vmatpush3.bf16.msra.mxu1 %v3816_v50 }
 0x1cf   : > { %3492 = vmatprep.subr.bf16.mxu1 %v3817_v59 }
 0x1d2   : > { %3493 = vmatpush3.bf16.msra.mxu1 %v3817_v59 }
 0x1d3   : > { %3494 = vmatprep.subr.bf16.mxu1 %v3818_v0 }
 0x1d6   : > { %3495 = vmatpush3.bf16.msra.mxu1 %v3818_v0 }
 0x1d7   : > { %3504 = vmatprep.subr.bf16.mxu1 %v3819_v6 }
 0x1d9   : > { %3497 = vmatmul.mubr.bf16.vlgmr.msra.gmra.mrb[8].mxu1 %v2088_v41  ;;  %v3824_v41 = vld [vmem:[%s4650_s3 + $0x1a8] sm:$0xff]  }
 0x1da   : > { %3500 = vmatprep.mubr.bf16.mxu1 %v2089_v22  ;;  %3505 = vmatpush3.bf16.msra.mxu1 %v3819_v6  ;;  %v3829_v22 = vld [vmem:[%s4650_s3 + $0x1d0] sm:$0xff]  }
 0x1db   : > { %3506 = vmatprep.subr.bf16.mxu1 %v3820_v12 }
 0x1de   : > { %3507 = vmatpush3.bf16.msra.mxu1 %v3820_v12 }
 0x1df   : > { %3508 = vmatprep.subr.bf16.mxu1 %v3821_v37 }
 0x1e1   : > { %3501 = vmatmul.mubr.bf16.gmra.mrb[12].mxu1 %v2090_v47 }
 0x1e2   : > { %3509 = vmatpush3.bf16.msra.mxu1 %v3821_v37  ;;  %3520 = vmatprep.mubr.bf16.mxu1 %v4386_v34  ;;  %v3833_v34 = vld [vmem:[%s4650_s3 + $0x1f0] sm:$0xff]  }
 0x1e3   : > { %3510 = vmatprep.subr.bf16.mxu1 %v3822_v42 }
 0x1e6   : > { %3511 = vmatpush3.bf16.msra.mxu1 %v3822_v42 }
 0x1e7   : > { %3512 = vmatprep.subr.bf16.mxu1 %v3823_v26 }
 0x1ea   : > { %3513 = vmatpush3.bf16.msra.mxu1 %v3823_v26 }
 0x1eb   : > { %3514 = vmatprep.subr.bf16.mxu1 %v3824_v41 }
 0x1ee   : > { %3515 = vmatpush3.bf16.msra.mxu1 %v3824_v41 }
 0x1ef   : > { %3516 = vmatprep.subr.bf16.mxu1 %v3825_v48 }
 0x1f2   : > { %3517 = vmatpush3.bf16.msra.mxu1 %v3825_v48 }
 0x1f3   : > { %3518 = vmatprep.subr.bf16.mxu1 %v3826_v4 }
 0x1f6   : > { %3519 = vmatpush3.bf16.msra.mxu1 %v3826_v4 }
 0x1f7   : > { %3528 = vmatprep.subr.bf16.mxu1 %v3827_v9 }
 0x1f9   : > { %3521 = vmatmul.mubr.bf16.vlgmr.msra.gmra.mrb[8].mxu1 %v4389_v38  ;;  %v2391_v38 = vpack.c.bf16 %v2387_v35, %v4283_v3  ;;  %v2537_v3 = vld [vmem:[#allocation2 + $0x92] sm:$0xff] }
 0x1fa   : > { %3524 = vmatprep.mubr.bf16.mxu1 %v4412_v61  ;;  %3529 = vmatpush3.bf16.msra.mxu1 %v3827_v9 }
 0x1fb   : > { %3530 = vmatprep.subr.bf16.mxu1 %v3828_v14 }
 0x1fe   : > { %3531 = vmatpush3.bf16.msra.mxu1 %v3828_v14 }
 0x1ff   : > { %3532 = vmatprep.subr.bf16.mxu1 %v3829_v22 }
 0x201   : > { %3525 = vmatmul.mubr.bf16.gmra.mrb[12].mxu1 %v2241_v30 }
 0x202   : > { %3533 = vmatpush3.bf16.msra.mxu1 %v3829_v22  ;;  %3544 = vmatprep.mubr.bf16.mxu1 %v4270_v55  ;;  %v3834_v55 = vld [vmem:[%s4650_s3 + $0x1f8] sm:$0xff]  }
 0x203   : > { %3534 = vmatprep.subr.bf16.mxu1 %v3830_v31 }
 0x206   : > { %3535 = vmatpush3.bf16.msra.mxu1 %v3830_v31 }
 0x207   : > { %3536 = vmatprep.subr.bf16.mxu1 %v3831_v33 }
 0x20a   : > { %3537 = vmatpush3.bf16.msra.mxu1 %v3831_v33 }
 0x20b   : > { %3538 = vmatprep.subr.bf16.mxu1 %v3832_v10 }
 0x20e   : > { %3539 = vmatpush3.bf16.msra.mxu1 %v3832_v10 }
 0x20f   : > { %3540 = vmatprep.subr.bf16.mxu1 %v3833_v34 }
 0x212   : > { %3541 = vmatpush3.bf16.msra.mxu1 %v3833_v34 }
 0x213   : > { %3542 = vmatprep.subr.bf16.mxu1 %v3834_v55 }
 0x216   : > { %3543 = vmatpush3.bf16.msra.mxu1 %v3834_v55 }
 0x217   : > { %3576 = vmatprep.subr.bf16.mxu1 %v4381_v29 }
 0x219   : > { %3545 = vmatmul.mubr.bf16.vlgmr.msra.gmra.mrb[8].mxu1 %v4298_v15  ;;  %v2541_v15 = vpack.c.bf16 %v2537_v3, %v4545_v63 }
 0x21a   : > { %3548 = vmatprep.mubr.bf16.mxu1 %v4320_v45  ;;  %3584 = vmatpush3.bf16.msra.mxu1 %v4381_v29  ;;  %v2893_v45 = vld [vmem:[%s4653_s6] ss:$0 sm:$0xff] }
 0x21b   : > { %3577 = vmatprep.subr.bf16.mxu1 %v4394_v49  ;;  %v1316_v29 = vadd.f32 %v2893_v45, %v4470_v18  ;;  %v1327_v51 = vadd.f32 %v4475_v8, %v2893_v45  ;;  %v1319_v53 = vadd.f32 %v2893_v45, %v4478_v19  ;;  %v1340_v2 = vadd.f32 %v4495_v24, %v2893_v45 }
 0x21c   : > { %v1332_v11 = vadd.f32 %v2893_v45, %v4500_v25  ;;  %v1343_v40 = vadd.f32 %v4505_v27, %v2893_v45  ;;  %v1335_v46 = vadd.f32 %v2893_v45, %v4507_v28  ;;  %v3098_v25 = vld [vmem:[%s4651_s4] ss:$0 sm:$0xff] }
 0x21e   : > { %3585 = vmatpush3.bf16.msra.mxu1 %v4394_v49 }
 0x21f   : > { %3578 = vmatprep.subr.bf16.mxu1 %v4406_v52 }
 0x221   : > { %3549 = vmatmul.mubr.bf16.gmra.mrb[12].mxu1 %v2391_v38 }
 0x222   : > { %3586 = vmatpush3.bf16.msra.mxu1 %v4406_v52  ;;  %3572 = vmatprep.mubr.bf16.mxu1 %v4352_v16  ;;  %v1324_v16 = vadd.f32 %v4461_v44, %v2893_v45 }
 0x223   : > { %3579 = vmatprep.subr.bf16.mxu1 %v4418_v62 }
 0x226   : > { %3587 = vmatpush3.bf16.msra.mxu1 %v4418_v62 }
 0x227   : > { %3580 = vmatprep.subr.bf16.mxu1 %v4432_v13 }
 0x22a   : > { %3588 = vmatpush3.bf16.msra.mxu1 %v4432_v13 }
 0x22b   : > { %3581 = vmatprep.subr.bf16.mxu1 %v4443_v1 }
 0x22e   : > { %3589 = vmatpush3.bf16.msra.mxu1 %v4443_v1 }
 0x22f   : > { %3582 = vmatprep.subr.bf16.mxu1 %v4456_v17 }
 0x232   : > { %3590 = vmatpush3.bf16.msra.mxu1 %v4456_v17 }
 0x233   : > { %3583 = vmatprep.subr.bf16.mxu1 %v4468_v57 }
 0x236   : > { %3591 = vmatpush3.bf16.msra.mxu1 %v4468_v57 }
 0x239   : > { %3573 = vmatmul.mubr.bf16.vlgmr.msra.gmra.mrb[12].mxu1 %v2541_v15 }
 0x265   : > { %v3402_v49 = vpop.f32.mrb[8].mxu0 }
 0x266   : > { %v3593_v56 = vadd.f32 %v3402_v49, %v1324_v16  ;;  %v1598_v52 = vpop.f32.mrb[9].mxu0 }
 0x267   : > { %v3598_v54 = vadd.f32 %v1598_v52, %v1316_v29  ;;  %v3403_v58 = vpop.f32.mrb[10].mxu0 }
 0x268   : > { %v3603_v60 = vadd.f32 %v3403_v58, %v1327_v51  ;;  %v1601_v61 = vpop.f32.mrb[11].mxu0 }
 0x269   : > { %v3608_v62 = vadd.f32 %v1601_v61, %v1319_v53 }
 0x26e   : > { %v3406_v13 = vpop.f32.mrb[12].mxu0 }
 0x26f   : > { %v3613_v39 = vadd.f32 %v3406_v13, %v1340_v2  ;;  %v1614_v1 = vpop.f32.mrb[13].mxu0 }
 0x270   : > { %v3617_v17 = vadd.f32 %v1614_v1, %v1332_v11  ;;  %v3407_v36 = vpop.f32.mrb[14].mxu0 }
 0x271   : > { %v3621_v44 = vadd.f32 %v3407_v36, %v1343_v40  ;;  %v1617_v57 = vpop.f32.mrb[15].mxu0 }
 0x272   : > { %v3625_v18 = vadd.f32 %v1617_v57, %v1335_v46 }
 0x286   : > { %v3570_v5 = vpop.f32.mrb[16].mxu0 }
 0x287   : > { %v2641_v8 = vpop.f32.mrb[17].mxu0 }
 0x288   : > { %v3571_v19 = vpop.f32.mrb[18].mxu0 }
 0x289   : > { %v2644_v20 = vpop.f32.mrb[19].mxu0 }
 0x2ec   : > { %v3546_v21 = vpop.f32.mrb[8].mxu1 }
 0x2ed   : > { %v3594_v23 = vadd.f32 %v3593_v56, %v3546_v21  ;;  %v2491_v24 = vpop.f32.mrb[9].mxu1 }
 0x2ee   : > { %v3599_v7 = vadd.f32 %v3598_v54, %v2491_v24  ;;  %v3547_v27 = vpop.f32.mrb[10].mxu1 }
 0x2ef   : > { %v3595_v28 = vadd.f32 %v3594_v23, %v3570_v5  ;;  %v3604_v32 = vadd.f32 %v3603_v60, %v3547_v27  ;;  %v2494_v43 = vpop.f32.mrb[11].mxu1 }
 0x2f0   : > { %v3600_v50 = vadd.f32 %v3599_v7, %v2641_v8  ;;  %v3609_v59 = vadd.f32 %v3608_v62, %v2494_v43 }
 0x2f1   : > { %v3596_v0 = vadd.f32 %v3595_v28, %v3098_v25  ;;  %v3605_v6 = vadd.f32 %v3604_v32, %v3571_v19 }
 0x2f2   : > { %v3601_v12 = vadd.f32 %v3600_v50, %v3098_v25  ;;  %v3610_v37 = vadd.f32 %v3609_v59, %v2644_v20 }
 0x2f3   : > { %v2705_v63 = vmax.f32 %v3596_v0, 0.0  ;;  %v3606_v47 = vadd.f32 %v3605_v6, %v3098_v25 }
 0x2f4   : > { %v2703_v42 = vmax.f32 %v3601_v12, 0.0  ;;  %v3611_v26 = vadd.f32 %v3610_v37, %v3098_v25 }
 0x2f5   : > { %2713 = vst [vmem:[%s4634_s14 + $0x10] sm:$0xff] %v2705_v63  ;;  %v2706_v41 = vmax.f32 %v3606_v47, 0.0 }
 0x2f6   : > { %2711 = vst [vmem:[%s4634_s14] sm:$0xff] %v2703_v42  ;;  %v2704_v48 = vmax.f32 %v3611_v26, 0.0 }
 0x2f7   : > { %2714 = vst [vmem:[%s4634_s14 + $0x18] sm:$0xff] %v2706_v41 }
 0x2f8   : > { %2712 = vst [vmem:[%s4634_s14 + $0x8] sm:$0xff] %v2704_v48 }
 0x30c   : > { %v3574_v4 = vpop.f32.mrb[12].mxu1 }
 0x30d   : > { %v3614_v9 = vadd.f32 %v3613_v39, %v3574_v4  ;;  %v2657_v14 = vpop.f32.mrb[13].mxu1 }
 0x30e   : > { %v3618_v22 = vadd.f32 %v3617_v17, %v2657_v14  ;;  %v3575_v30 = vpop.f32.mrb[14].mxu1 }
 0x30f   : > { %v3615_v31 = vadd.f32 %v3614_v9, %v3098_v25  ;;  %v3622_v33 = vadd.f32 %v3621_v44, %v3575_v30  ;;  %v2660_v10 = vpop.f32.mrb[15].mxu1 }
 0x310   : > { %v3619_v34 = vadd.f32 %v3618_v22, %v3098_v25  ;;  %v3626_v55 = vadd.f32 %v3625_v18, %v2660_v10 }
 0x311   : > { %v2709_v35 = vmax.f32 %v3615_v31, 0.0  ;;  %v3623_v38 = vadd.f32 %v3622_v33, %v3098_v25 }
 0x312   : > { %v2707_v3 = vmax.f32 %v3619_v34, 0.0  ;;  %v3627_v15 = vadd.f32 %v3626_v55, %v3098_v25 }
 0x313   : > { %2717 = vst [vmem:[%s4634_s14 + $0x30] sm:$0xff] %v2709_v35  ;;  %v2710_v45 = vmax.f32 %v3623_v38, 0.0 }
 0x314   : > { %2715 = vst [vmem:[%s4634_s14 + $0x20] sm:$0xff] %v2707_v3  ;;  %v2708_v16 = vmax.f32 %v3627_v15, 0.0 }
 0x315   : > { %2718 = vst [vmem:[%s4634_s14 + $0x38] sm:$0xff] %v2710_v45 }
 0x316   : > { %2716 = vst [vmem:[%s4634_s14 + $0x28] sm:$0xff] %v2708_v16 }
 0x317 PF: > { %s17_s24 = sadd.s32 1, %s3841_s24  }
 0x318   : > { %p14_p5 = scmp.ge.s32.totalorder %s17_s24, 4  }
 0x31a   :  { %16 = sbr.rel (!%p14_p5) target bundleno = 1 (0x1), region = 101 }

// kernel: _lambda_.3
= control target key start
LH: loop header
LB: loop body
LE: loop exit
PB: predicated region body
PF: predicated region fallthrough
CT: control target
= control target key end

     0   :  { %s3873_s24 = smov 0   ;;  %s4520_s0 = inlined_call_operand.vmem [shape: f32[20,10,8], index: 0, kind: input, shape index: {}]   ;;  %s4521_s1 = inlined_call_operand.vmem [shape: bf16[9,8,128], index: 1, kind: input, shape index: {}]   ;;  %s4522_s2 = inlined_call_operand.vmem [shape: f32[1,128], index: 2, kind: input, shape index: {}, may-alias: {2,4}]   ;;  %s4523_s3 = inlined_call_operand.vmem [shape: bf16[9,128,128], index: 3, kind: input, shape index: {}]   ;;  %s4524_s4 = inlined_call_operand.vmem [shape: f32[1,128], index: 4, kind: input, shape index: {}, may-alias: {2,4}]   ;;  %s4525_s5 = inlined_call_operand.vmem [shape: bf16[8,128], index: 5, kind: input, shape index: {}]   ;;  %s4526_s6 = inlined_call_operand.vmem [shape: f32[1,128], index: 6, kind: input, shape index: {}]   ;;  %s4527_s7 = inlined_call_operand.vmem [shape: f32[128,128], index: 7, kind: output, shape index: {}]  }
   0x1 LB: > { %s2772_s25 = sadd.s32 4294967295, %s3830_s24   ;;  %p2776_p0 = scmp.ge.s32.totalorder %s3830_s24, 1  ;;  %s3830_s24 = sphi %s3873_s24, %s17_s24  }
   0x2   : > { %p239_p1 = scmp.lt.s32.totalorder %s3830_s24, 3 }
   0x4   : > { %p240_p2 = pnand %p2776_p0, %p239_p1 }
   0x5   : > { %v2781_v0 = vld [vmem:[%s4521_s1 + $0x4] sm:$0xf] (!%p240_p2)  ;;  %vm326_vm0 = vcmask (!%p240_p2), 1043456   ;;  %s272_s28 = smul.u32 (!%p240_p2), 10, %s2772_s25  ;;  %v298_v2 = vld [vmem:[%s4521_s1] sm:$0xf] (!%p240_p2) }
   0x6   : > { %243 = sbr.rel (%p240_p2) target bundleno = 791 (0x317), region = 48  ;;  %3733 = vmatprep.subr.msk.bf16.mxu0 (!%p240_p2), %vm326_vm0, %v2781_v0  ;;  %v328_v1 = vsel (!%p240_p2), %vm326_vm0, %v2781_v0, 0  ;;  %vm313_vm1 = vcmask (!%p240_p2), 64512   ;;  %v408_v12 = vsel (!%p240_p2), %vm326_vm0, %v298_v2, 0  ;;  %v2790_v14 = vld [vmem:[%s4521_s1 + $0x8] sm:$0xf] (!%p240_p2) }
   0x7   : > { %3250 = vmatpush3.bf16.msra.mxu0 (!%p240_p2), %v328_v1  ;;  %p273_p3 = scmp.lt.s32.totalorder (!%p240_p2), %s272_s28, 19  ;;  %v2803_v24 = vld [vmem:[%s4521_s1 + $0xc] sm:$0xf] (!%p240_p2)  ;;  %v2816_v25 = vld [vmem:[%s4521_s1 + $0x10] sm:$0xf] (!%p240_p2)  ;;  %v3753_v27 = vld [vmem:[%s4523_s3 + $0x80] sm:$0xff] (!%p240_p2)  }
   0x8   : > { %3734 = vmatprep.subr.msk.bf16.mxu0 (!%p240_p2), %vm326_vm0, %v298_v2  ;;  %v1255_v26 = vld [vmem:[%s4525_s5] sm:$0xf] (!%p240_p2)  ;;  %v502_v33 = vsel (!%p240_p2), %vm326_vm0, %v2790_v14, 0  ;;  %v3755_v35 = vld [vmem:[%s4523_s3 + $0x88] sm:$0xff] (!%p240_p2)   ;;  %v605_v37 = vsel (!%p240_p2), %vm326_vm0, %v2803_v24, 0  ;;  %v707_v38 = vsel (!%p240_p2), %vm326_vm0, %v2816_v25, 0 }
   0x9   : > { %3742 = vmatprep.subr.msk.bf16.mxu1 (!%p240_p2), %vm326_vm0, %v1255_v26  ;;  %v1276_v31 = vsel (!%p240_p2), %vm326_vm0, %v1255_v26, 0  ;;  %v3757_v41 = vld [vmem:[%s4523_s3 + $0x90] sm:$0xff] (!%p240_p2)   ;;  %v3759_v46 = vld [vmem:[%s4523_s3 + $0x98] sm:$0xff] (!%p240_p2)   ;;  %v3763_v26 = vld [vmem:[%s4523_s3 + $0xa8] sm:$0xff] (!%p240_p2)  }
   0xa   : > { %3340 = vmatpush3.bf16.msra.mxu1 (!%p240_p2), %v1276_v31  ;;  %v2829_v62 = vld [vmem:[%s4521_s1 + $0x14] sm:$0xf] (!%p240_p2)  ;;  %v2842_v2 = vld [vmem:[%s4521_s1 + $0x18] sm:$0xf] (!%p240_p2)  ;;  %v4120_v31 = vld [vmem:[%s4523_s3 + $0xc0] sm:$0xff] (!%p240_p2)  }
   0xb   : > { %3397 = vmatprep.subr.bf16.mxu1 (!%p240_p2), %v3753_v27  ;;  %v809_v1 = vsel (!%p240_p2), %vm326_vm0, %v2829_v62, 0 }
   0xd   : > { %s4529_s28 = smov (!%p273_p3, %s272_s28), 19 }
   0xe   : > { %s3090_s8 = sshll.u32 %s4529_s28, 4 }
   0xf   : > { %s3895_s11 = scalar_lea.vmem %s4520_s0, %s3090_s8  ;;  %s2779_s8 = sshll.u32 %s2772_s25, 3 }
  0x10   : > { %v299_v3 = vld [vmem:[%s3895_s11 + $0x1] sm:$0xff]  ;;  %v300_v4 = vld [vmem:[%s3895_s11 + $0x11] sm:$0xff]  ;;  %p280_p4 = scmp.lt.s32.totalorder %s2779_s8, 15 }
  0x11   : > { %v301_v5 = vld [vmem:[%s3895_s11 + $0x21] sm:$0xff]  ;;  %v307_v6 = vpack.c.bf16 %v300_v4, %v299_v3  ;;  %v302_v7 = vld [vmem:[%s3895_s11 + $0x31] sm:$0xff] }
  0x12   : > { %v303_v8 = vld [vmem:[%s3895_s11 + $0x41] sm:$0xff]  ;;  %v304_v9 = vld [vmem:[%s3895_s11 + $0x51] sm:$0xff]  ;;  %v3903_v10 = vpack.c.bf16 %v301_v5, %v300_v4  ;;  %v3905_v11 = vpack.c.bf16 %v302_v7, %v301_v5  ;;  %s4531_s8 = smov (!%p280_p4, %s2779_s8), 15 }
  0x13   : > { %v3908_v13 = vpack.c.bf16 %v304_v9, %v303_v8  ;;  %3251 = vmatprep.mubr.msk.bf16.mxu0 %vm313_vm1, %v307_v6  ;;  %v305_v15 = vld [vmem:[%s3895_s11 + $0x61] sm:$0xff]  ;;  %v306_v16 = vld [vmem:[%s3895_s11 + $0x71] sm:$0xff]  ;;  %v689_v34 = vpack.c.bf16 %v303_v8, %v302_v7  ;;  %v912_v6 = vsel %vm326_vm0, %v2842_v2, 0  ;;  %v2855_v7 = vld [vmem:[%s4521_s1 + $0x1c] sm:$0xf]  ;;  %s2780_s12 = sshll.u32 %s4531_s8, 3 }
  0x14   : > { %3341 = vmatprep.mubr.msk.bf16.mxu1 %vm313_vm1, %v3903_v10  ;;  %3252 = vmatmul.mubr.msk.bf16.vlgmr.msra.gmra.mrb[0].mxu0 %vm313_vm1, %v3905_v11  ;;  %v286_v17 = vld [vmem:[%s3895_s11] sm:$0xff]  ;;  %v3924_v18 = vld [vmem:[%s3895_s11 + $0x10] sm:$0xff]  ;;  %v3927_v19 = vpack.c.bf16 %v306_v16, %v305_v15  ;;  %v690_v39 = vpack.c.bf16 %v305_v15, %v304_v9  ;;  %s4507_s14 = scalar_lea.vmem %s4527_s7, %s2780_s12 }
  0x15   : > { %3260 = vmatpush3.bf16.msra.mxu0 %v408_v12  ;;  %3255 = vmatprep.mubr.msk.bf16.mxu0 %vm313_vm1, %v3908_v13  ;;  %v294_v20 = vpack.c.bf16 %v3924_v18, %v286_v17  ;;  %v3931_v21 = vld [vmem:[%s3895_s11 + $0x81] sm:$0xff]  ;;  %v3934_v22 = vld [vmem:[%s3895_s11 + $0x91] sm:$0xff] }
  0x16   : > { %3735 = vmatprep.subr.msk.bf16.mxu0 %vm326_vm0, %v2790_v14  ;;  %v998_v23 = vpack.c.bf16 %v3934_v22, %v3931_v21  ;;  %v288_v28 = vld [vmem:[%s3895_s11 + $0x20] sm:$0xff]  ;;  %v289_v29 = vld [vmem:[%s3895_s11 + $0x30] sm:$0xff]  ;;  %3342 = vmatmul.mubr.msk.bf16.vlgmr.msra.gmra.mrb[0].mxu1 %vm313_vm1, %v689_v34  ;;  %v691_v47 = vpack.c.bf16 %v3931_v21, %v306_v16  ;;  %v3762_v22 = vld [vmem:[%s4523_s3 + $0x68] sm:$0xff]  }
  0x17   : > { %v290_v30 = vld [vmem:[%s3895_s11 + $0x40] sm:$0xff]  ;;  %v291_v32 = vld [vmem:[%s3895_s11 + $0x50] sm:$0xff]  ;;  %v3963_v36 = vpack.c.bf16 %v289_v29, %v288_v28  ;;  %3398 = vmatpush3.bf16.msra.mxu1 %v3753_v27  ;;  %3345 = vmatprep.mubr.msk.bf16.mxu1 %vm313_vm1, %v690_v39  ;;  %v586_v59 = vpack.c.bf16 %v288_v28, %v3924_v18  ;;  %v3766_v27 = vld [vmem:[%s4523_s3 + $0x78] sm:$0xff]  }
  0x18   : > { %v3967_v40 = vpack.c.bf16 %v291_v32, %v290_v30  ;;  %v292_v42 = vld [vmem:[%s3895_s11 + $0x60] sm:$0xff]  ;;  %v293_v43 = vld [vmem:[%s3895_s11 + $0x70] sm:$0xff]  ;;  %3399 = vmatprep.subr.bf16.mxu1 %v3755_v35  ;;  %v587_v60 = vpack.c.bf16 %v290_v30, %v289_v29  ;;  %v3767_v30 = vld [vmem:[%s4523_s3 + $0xb8] sm:$0xff]  }
  0x19   : > { %v475_v44 = vld [vmem:[%s3895_s11 + $0x2] sm:$0xff]  ;;  %v476_v45 = vld [vmem:[%s3895_s11 + $0x12] sm:$0xff]  ;;  %v297_v48 = vpack.c.bf16 %v293_v43, %v292_v42  ;;  %v588_v61 = vpack.c.bf16 %v292_v42, %v291_v32  ;;  %v2873_v32 = vld [vmem:[%s4522_s2] ss:$0 sm:$0xff] }
  0x1a   : > { %v483_v49 = vpack.c.bf16 %v476_v45, %v475_v44  ;;  %v477_v50 = vld [vmem:[%s3895_s11 + $0x22] sm:$0xff]  ;;  %v478_v51 = vld [vmem:[%s3895_s11 + $0x32] sm:$0xff] }
  0x1b   : > { %3400 = vmatpush3.bf16.msra.mxu1 %v3755_v35  ;;  %v479_v52 = vld [vmem:[%s3895_s11 + $0x42] sm:$0xff]  ;;  %v480_v53 = vld [vmem:[%s3895_s11 + $0x52] sm:$0xff]  ;;  %v484_v54 = vpack.c.bf16 %v478_v51, %v477_v50  ;;  %v790_v3 = vpack.c.bf16 %v477_v50, %v476_v45 }
  0x1c   : > { %3256 = vmatmul.mubr.msk.bf16.gmra.mrb[4].mxu0 %vm313_vm1, %v3927_v19  ;;  %3401 = vmatprep.subr.bf16.mxu1 %v3757_v41  ;;  %v485_v55 = vpack.c.bf16 %v480_v53, %v479_v52  ;;  %v481_v56 = vld [vmem:[%s3895_s11 + $0x62] sm:$0xff]  ;;  %v482_v57 = vld [vmem:[%s3895_s11 + $0x72] sm:$0xff]  ;;  %v791_v4 = vpack.c.bf16 %v479_v52, %v478_v51 }
  0x1d   : > { %3261 = vmatprep.mubr.msk.bf16.mxu0 %vm313_vm1, %v294_v20  ;;  %v486_v58 = vpack.c.bf16 %v482_v57, %v481_v56  ;;  %v2802_v63 = vld [vmem:[%s3895_s11 + $0x80] sm:$0xff]  ;;  %v792_v5 = vpack.c.bf16 %v481_v56, %v480_v53  ;;  %v2841_v14 = vld [vmem:[%s3895_s11 + $0x90] sm:$0xff]  ;;  %v3758_v20 = vld [vmem:[%s4523_s3 + $0x58] sm:$0xff]  }
  0x1e   : > { %3346 = vmatmul.mubr.msk.bf16.gmra.mrb[4].mxu1 %vm313_vm1, %v691_v47  ;;  %v589_v0 = vpack.c.bf16 %v2802_v63, %v293_v43  ;;  %v2828_v8 = vld [vmem:[%s3895_s11 + $0x82] sm:$0xff]  ;;  %v896_v15 = vpack.c.bf16 %v2841_v14, %v2802_v63  ;;  %v3756_v18 = vld [vmem:[%s4523_s3 + $0x50] sm:$0xff]  }
  0x1f   : > { %3402 = vmatpush3.bf16.msra.mxu1 %v3757_v41  ;;  %v793_v9 = vpack.c.bf16 %v2828_v8, %v482_v57  ;;  %v2868_v12 = vld [vmem:[%s4521_s1 + $0x20] sm:$0xf]  ;;  %v3765_v28 = vld [vmem:[%s4523_s3 + $0xb0] sm:$0xff]   ;;  %v3770_v50 = vld [vmem:[%s4523_s3 + $0x8] sm:$0xff]  }
  0x20   : > { %3403 = vmatprep.subr.bf16.mxu1 %v3759_v46  ;;  %v1116_v16 = vsel %vm326_vm0, %v2868_v12, 0  ;;  %v3752_v17 = vld [vmem:[%s4523_s3 + $0x40] sm:$0xff]  }
  0x21   : > { %v3760_v21 = vld [vmem:[%s4523_s3 + $0x60] sm:$0xff]  }
  0x22   : > { %v3768_v29 = vld [vmem:[%s4523_s3] sm:$0xff]  }
  0x23   : > { %3404 = vmatpush3.bf16.msra.mxu1 %v3759_v46 }
  0x24   : > { %3262 = vmatmul.mubr.msk.bf16.vlgmr.msra.gmra.mrb[0].mxu0 %vm313_vm1, %v3963_v36 }
  0x25   : > { %3270 = vmatpush3.bf16.msra.mxu0 %v502_v33  ;;  %3265 = vmatprep.mubr.msk.bf16.mxu0 %vm313_vm1, %v3967_v40 }
  0x26   : > { %3736 = vmatprep.subr.msk.bf16.mxu0 %vm326_vm0, %v2803_v24  ;;  %v3761_v24 = vld [vmem:[%s4523_s3 + $0xa0] sm:$0xff]  }
  0x27   : > { %3405 = vmatprep.subr.bf16.mxu1 %v3761_v24 }
  0x28   : > { %3406 = vmatpush3.bf16.msra.mxu1 %v3761_v24 }
  0x29   : > { %3407 = vmatprep.subr.bf16.mxu1 %v3763_v26 }
  0x2c   : > { %3266 = vmatmul.mubr.msk.bf16.gmra.mrb[4].mxu0 %vm313_vm1, %v297_v48  ;;  %3408 = vmatpush3.bf16.msra.mxu1 %v3763_v26  ;;  %v3775_v26 = vld [vmem:[%s4523_s3 + $0xd8] sm:$0xff]  }
  0x2d   : > { %3271 = vmatprep.mubr.msk.bf16.mxu0 %vm313_vm1, %v483_v49  ;;  %3409 = vmatprep.subr.bf16.mxu1 %v3765_v28 }
  0x30   : > { %3410 = vmatpush3.bf16.msra.mxu1 %v3765_v28  ;;  %v3778_v28 = vld [vmem:[%s4523_s3 + $0x28] sm:$0xff]  }
  0x31   : > { %3411 = vmatprep.subr.bf16.mxu1 %v3767_v30 }
  0x34   : > { %3272 = vmatmul.mubr.msk.bf16.vlgmr.msra.gmra.mrb[0].mxu0 %vm313_vm1, %v484_v54  ;;  %3412 = vmatpush3.bf16.msra.mxu1 %v3767_v30  ;;  %v3777_v30 = vld [vmem:[%s4523_s3 + $0xe0] sm:$0xff]  }
  0x35   : > { %3280 = vmatpush3.bf16.msra.mxu0 %v605_v37  ;;  %3275 = vmatprep.mubr.msk.bf16.mxu0 %vm313_vm1, %v485_v55 }
  0x36   : > { %3737 = vmatprep.subr.msk.bf16.mxu0 %vm326_vm0, %v2816_v25  ;;  %v3764_v25 = vld [vmem:[%s4523_s3 + $0x70] sm:$0xff]   ;;  %3421 = vmatprep.subr.bf16.mxu1 %v4120_v31 }
  0x3c   : > { %3276 = vmatmul.mubr.msk.bf16.gmra.mrb[4].mxu0 %vm313_vm1, %v486_v58 }
  0x3d   : > { %3281 = vmatprep.mubr.msk.bf16.mxu0 %vm313_vm1, %v586_v59 }
  0x44   : > { %3282 = vmatmul.mubr.msk.bf16.vlgmr.msra.gmra.mrb[0].mxu0 %vm313_vm1, %v587_v60 }
  0x45   : > { %3290 = vmatpush3.bf16.msra.mxu0 %v707_v38  ;;  %3285 = vmatprep.mubr.msk.bf16.mxu0 %vm313_vm1, %v588_v61 }
  0x46   : > { %3738 = vmatprep.subr.msk.bf16.mxu0 %vm326_vm0, %v2829_v62 }
  0x4c   : > { %3286 = vmatmul.mubr.msk.bf16.gmra.mrb[4].mxu0 %vm313_vm1, %v589_v0  ;;  %v3772_v0 = vld [vmem:[%s4523_s3 + $0x10] sm:$0xff]  }
  0x4d   : > { %3291 = vmatprep.mubr.msk.bf16.mxu0 %vm313_vm1, %v3903_v10  ;;  %v1014_v10 = vsel %vm326_vm0, %v2855_v7, 0 }
  0x54   : > { %3292 = vmatmul.mubr.msk.bf16.vlgmr.msra.gmra.mrb[0].mxu0 %vm313_vm1, %v689_v34 }
  0x55   : > { %3300 = vmatpush3.bf16.msra.mxu0 %v809_v1  ;;  %3295 = vmatprep.mubr.msk.bf16.mxu0 %vm313_vm1, %v690_v39 }
  0x56   : > { %3739 = vmatprep.subr.msk.bf16.mxu0 %vm326_vm0, %v2842_v2 }
  0x5c   : > { %3296 = vmatmul.mubr.msk.bf16.gmra.mrb[4].mxu0 %vm313_vm1, %v691_v47 }
  0x5d   : > { %3301 = vmatprep.mubr.msk.bf16.mxu0 %vm313_vm1, %v790_v3 }
  0x64   : > { %3302 = vmatmul.mubr.msk.bf16.vlgmr.msra.gmra.mrb[0].mxu0 %vm313_vm1, %v791_v4 }
  0x65   : > { %3310 = vmatpush3.bf16.msra.mxu0 %v912_v6  ;;  %3305 = vmatprep.mubr.msk.bf16.mxu0 %vm313_vm1, %v792_v5 }
  0x66   : > { %3740 = vmatprep.subr.msk.bf16.mxu0 %vm326_vm0, %v2855_v7 }
  0x6c   : > { %3306 = vmatmul.mubr.msk.bf16.gmra.mrb[4].mxu0 %vm313_vm1, %v793_v9 }
  0x6d   : > { %3311 = vmatprep.mubr.msk.bf16.mxu0 %vm313_vm1, %v3963_v36 }
  0x74   : > { %3312 = vmatmul.mubr.msk.bf16.vlgmr.msra.gmra.mrb[0].mxu0 %vm313_vm1, %v3967_v40 }
  0x75   : > { %3320 = vmatpush3.bf16.msra.mxu0 %v1014_v10  ;;  %3315 = vmatprep.mubr.msk.bf16.mxu0 %vm313_vm1, %v297_v48 }
  0x76   : > { %3741 = vmatprep.subr.msk.bf16.mxu0 %vm326_vm0, %v2868_v12  ;;  %v3771_v12 = vld [vmem:[%s4523_s3 + $0xc8] sm:$0xff]  }
  0x7c   : > { %3316 = vmatmul.mubr.msk.bf16.gmra.mrb[4].mxu0 %vm313_vm1, %v896_v15  ;;  %v3774_v15 = vld [vmem:[%s4523_s3 + $0x18] sm:$0xff]  }
  0x7d   : > { %3321 = vmatprep.mubr.msk.bf16.mxu0 %vm313_vm1, %v3905_v11  ;;  %v3754_v11 = vld [vmem:[%s4523_s3 + $0x48] sm:$0xff]  }
  0x84   : > { %3322 = vmatmul.mubr.msk.bf16.vlgmr.msra.gmra.mrb[0].mxu0 %vm313_vm1, %v3908_v13  ;;  %v2867_v13 = vld [vmem:[%s3895_s11 + $0x92] sm:$0xff] }
  0x85   : > { %3330 = vmatpush3.bf16.msra.mxu0 %v1116_v16  ;;  %3325 = vmatprep.mubr.msk.bf16.mxu0 %vm313_vm1, %v3927_v19  ;;  %v1100_v19 = vpack.c.bf16 %v2867_v13, %v2828_v8  ;;  %v3773_v13 = vld [vmem:[%s4523_s3 + $0xd0] sm:$0xff]  }
  0x86   : > { %3349 = vmatprep.subr.bf16.mxu0 %v3752_v17 }
  0x8c   : > { %3326 = vmatmul.mubr.msk.bf16.gmra.mrb[4].mxu0 %vm313_vm1, %v998_v23  ;;  %v3832_v23 = vmov 0.0  }
  0x8d   : > { %3331 = vmatprep.mubr.msk.bf16.mxu0 %vm313_vm1, %v484_v54  ;;  %1220 = vst [vmem:[#allocation2 + $0x30] sm:$0xff] %v3832_v23  ;;  %1221 = vst [vmem:[#allocation2 + $0x38] sm:$0x3] %v3832_v23 }
  0x8e   : > { %1214 = vst [vmem:[#allocation2] sm:$0xff] %v3832_v23  ;;  %1215 = vst [vmem:[#allocation2 + $0x8] sm:$0x3] %v3832_v23 }
  0x8f   : > { %1216 = vst [vmem:[#allocation2 + $0x10] sm:$0xff] %v3832_v23  ;;  %1217 = vst [vmem:[#allocation2 + $0x18] sm:$0x3] %v3832_v23 }
  0x90   : > { %1218 = vst [vmem:[#allocation2 + $0x20] sm:$0xff] %v3832_v23  ;;  %1219 = vst [vmem:[#allocation2 + $0x28] sm:$0x3] %v3832_v23 }
  0x91   : > { %1222 = vst [vmem:[#allocation2 + $0x40] sm:$0xff] %v3832_v23  ;;  %1223 = vst [vmem:[#allocation2 + $0x48] sm:$0x3] %v3832_v23 }
  0x92   : > { %1224 = vst [vmem:[#allocation2 + $0x50] sm:$0xff] %v3832_v23  ;;  %1225 = vst [vmem:[#allocation2 + $0x58] sm:$0x3] %v3832_v23 }
  0x93   : > { %1226 = vst [vmem:[#allocation2 + $0x60] sm:$0xff] %v3832_v23  ;;  %1227 = vst [vmem:[#allocation2 + $0x68] sm:$0x3] %v3832_v23 }
  0x94   : > { %3332 = vmatmul.mubr.msk.bf16.vlgmr.msra.gmra.mrb[0].mxu0 %vm313_vm1, %v485_v55  ;;  %1228 = vst [vmem:[#allocation2 + $0x70] sm:$0xff] %v3832_v23  ;;  %1229 = vst [vmem:[#allocation2 + $0x78] sm:$0x3] %v3832_v23 }
  0x95   : > { %3335 = vmatprep.mubr.msk.bf16.mxu0 %vm313_vm1, %v486_v58  ;;  %3350 = vmatpush3.bf16.msra.mxu0 %v3752_v17  ;;  %1230 = vst [vmem:[#allocation2 + $0x80] sm:$0xff] %v3832_v23  ;;  %1231 = vst [vmem:[#allocation2 + $0x88] sm:$0x3] %v3832_v23  ;;  %v1371_v41 = vld [vmem:[#allocation2 + $0x1] sm:$0xff] }
  0x96   : > { %3351 = vmatprep.subr.bf16.mxu0 %v3754_v11  ;;  %1232 = vst [vmem:[#allocation2 + $0x90] sm:$0xff] %v3832_v23  ;;  %1233 = vst [vmem:[#allocation2 + $0x98] sm:$0x3] %v3832_v23  ;;  %v1626_v59 = vld [vmem:[#allocation2 + $0x2] sm:$0xff] }
  0x99   : > { %3352 = vmatpush3.bf16.msra.mxu0 %v3754_v11 }
  0x9a   : > { %3353 = vmatprep.subr.bf16.mxu0 %v3756_v18 }
  0x9c   : > { %3336 = vmatmul.mubr.msk.bf16.gmra.mrb[4].mxu0 %vm313_vm1, %v1100_v19  ;;  %v3776_v19 = vld [vmem:[%s4523_s3 + $0x20] sm:$0xff]  }
  0x9d   : > { %3354 = vmatpush3.bf16.msra.mxu0 %v3756_v18 }
  0x9e   : > { %3355 = vmatprep.subr.bf16.mxu0 %v3758_v20 }
  0xa1   : > { %3356 = vmatpush3.bf16.msra.mxu0 %v3758_v20 }
  0xa2   : > { %3357 = vmatprep.subr.bf16.mxu0 %v3760_v21 }
  0xa5   : > { %3358 = vmatpush3.bf16.msra.mxu0 %v3760_v21 }
  0xa6   : > { %3359 = vmatprep.subr.bf16.mxu0 %v3762_v22 }
  0xa9   : > { %3360 = vmatpush3.bf16.msra.mxu0 %v3762_v22 }
  0xaa   : > { %3361 = vmatprep.subr.bf16.mxu0 %v3764_v25 }
  0xad   : > { %3362 = vmatpush3.bf16.msra.mxu0 %v3764_v25 }
  0xae   : > { %3363 = vmatprep.subr.bf16.mxu0 %v3766_v27 }
  0xb1   : > { %3364 = vmatpush3.bf16.msra.mxu0 %v3766_v27 }
  0xb2   : > { %3373 = vmatprep.subr.bf16.mxu0 %v3768_v29 }
 0x167   : > { %v3333_v33 = vpop.f32.mrb[0].mxu0 }
 0x168   : > { %v1200_v34 = vadd.f32 %v3333_v33, %v2873_v32  ;;  %v1152_v35 = vpop.f32.mrb[1].mxu0  ;;  %v3782_v33 = vld [vmem:[%s4523_s3 + $0x38] sm:$0xff]  }
 0x169   : > { %v1198_v36 = vadd.f32 %v2873_v32, %v1152_v35  ;;  %v3334_v37 = vpop.f32.mrb[2].mxu0  ;;  %v4254_v35 = vld [vmem:[%s4523_s3 + $0x200] sm:$0xff]  }
 0x16a   : > { %v4126_v38 = vmax.f32 %v1200_v34, 0.0  ;;  %v1201_v39 = vadd.f32 %v3334_v37, %v2873_v32  ;;  %v1155_v40 = vpop.f32.mrb[3].mxu0  ;;  %v3781_v34 = vld [vmem:[%s4523_s3 + $0xf0] sm:$0xff]   ;;  %v3783_v37 = vld [vmem:[%s4523_s3 + $0xf8] sm:$0xff]  }
 0x16b   : > { %v4128_v42 = vmax.f32 %v1198_v36, 0.0  ;;  %v1199_v43 = vadd.f32 %v2873_v32, %v1155_v40 }
 0x16c   : > { %1237 = vst [vmem:[#allocation2 + $0x31] sm:$0xff] %v4126_v38  ;;  %v4131_v44 = vmax.f32 %v1201_v39, 0.0 }
 0x16d   : > { %1235 = vst [vmem:[#allocation2 + $0x11] sm:$0xff] %v4128_v42  ;;  %v4134_v45 = vmax.f32 %v1199_v43, 0.0  ;;  %v1379_v46 = vpack.c.bf16 %v4128_v42, %v1371_v41 }
 0x16e   : > { %1238 = vst [vmem:[#allocation2 + $0x41] sm:$0xff] %v4131_v44  ;;  %v1935_v47 = vpack.c.bf16 %v4131_v44, %v4126_v38 }
 0x16f   : > { %1236 = vst [vmem:[#allocation2 + $0x21] sm:$0xff] %v4134_v45  ;;  %v3337_v48 = vpop.f32.mrb[4].mxu0  ;;  %3365 = vmatprep.mubr.bf16.mxu0 %v1379_v46  ;;  %v4143_v49 = vpack.c.bf16 %v4126_v38, %v4134_v45  ;;  %v1934_v51 = vpack.c.bf16 %v4134_v45, %v4128_v42  ;;  %v4267_v46 = vld [vmem:[%s4523_s3 + $0x208] sm:$0xff]   ;;  %v4334_v45 = vpop.f32.mrb[0].mxu1  ;;  %v3803_v38 = vld [vmem:[%s4523_s3 + $0x158] sm:$0xff]  }
 0x170   : > { %v1204_v52 = vadd.f32 %v3337_v48, %v2873_v32  ;;  %v1168_v53 = vpop.f32.mrb[5].mxu0  ;;  %v3784_v48 = vld [vmem:[%s4523_s3 + $0x100] sm:$0xff]   ;;  %v3794_v42 = vld [vmem:[%s4523_s3 + $0x128] sm:$0xff]  }
 0x171   : > { %v1202_v54 = vadd.f32 %v2873_v32, %v1168_v53  ;;  %v3338_v55 = vpop.f32.mrb[6].mxu0  ;;  %3366 = vmatmul.mubr.bf16.vlgmr.msra.gmra.mrb[8].mxu0 %v4143_v49 }
 0x172   : > { %v4151_v56 = vmax.f32 %v1204_v52, 0.0  ;;  %v1205_v57 = vadd.f32 %v3338_v55, %v2873_v32  ;;  %v1171_v58 = vpop.f32.mrb[7].mxu0  ;;  %3374 = vmatpush3.bf16.msra.mxu0 %v3768_v29  ;;  %v4279_v52 = vld [vmem:[%s4523_s3 + $0x210] sm:$0xff]  }
 0x173   : > { %v4153_v60 = vmax.f32 %v1202_v54, 0.0  ;;  %v1203_v61 = vadd.f32 %v2873_v32, %v1171_v58  ;;  %3375 = vmatprep.subr.bf16.mxu0 %v3770_v50  ;;  %v4167_v3 = vld [vmem:[#allocation2 + $0x32] sm:$0xff]  ;;  %v3779_v32 = vld [vmem:[%s4523_s3 + $0xe8] sm:$0xff]  }
 0x174   : > { %1241 = vst [vmem:[#allocation2 + $0x71] sm:$0xff] %v4151_v56  ;;  %v4156_v62 = vmax.f32 %v1205_v57, 0.0  ;;  %v4158_v63 = vld [vmem:[#allocation2 + $0x12] sm:$0xff]  ;;  %v3786_v54 = vld [vmem:[%s4523_s3 + $0x108] sm:$0xff]  }
 0x175   : > { %1239 = vst [vmem:[#allocation2 + $0x51] sm:$0xff] %v4153_v60  ;;  %v4164_v1 = vmax.f32 %v1203_v61, 0.0  ;;  %v1634_v2 = vpack.c.bf16 %v4158_v63, %v1626_v59  ;;  %v4171_v4 = vpack.c.bf16 %v4153_v60, %v4131_v44  ;;  %v4173_v5 = vld [vmem:[#allocation2 + $0x42] sm:$0xff]  ;;  %v1344_v7 = vld [vmem:[#allocation2 + $0x10] sm:$0xff]  ;;  %v4291_v59 = vld [vmem:[%s4523_s3 + $0x218] sm:$0xff]  }
 0x176   : > { %1242 = vst [vmem:[#allocation2 + $0x81] sm:$0xff] %v4156_v62  ;;  %v4176_v6 = vld [vmem:[#allocation2 + $0x22] sm:$0xff]  ;;  %3376 = vmatpush3.bf16.msra.mxu0 %v3770_v50  ;;  %v1937_v8 = vpack.c.bf16 %v4156_v62, %v4151_v56  ;;  %v2085_v9 = vpack.c.bf16 %v4173_v5, %v4167_v3  ;;  %v1351_v11 = vpack.c.bf16 %v1344_v7, %v3832_v23  ;;  %v1346_v39 = vld [vmem:[#allocation2 + $0x30] sm:$0xff] }
 0x177   : > { %1240 = vst [vmem:[#allocation2 + $0x61] sm:$0xff] %v4164_v1  ;;  %3413 = vmatprep.mubr.bf16.mxu1 %v1634_v2  ;;  %v4185_v10 = vpack.c.bf16 %v4167_v3, %v4176_v6  ;;  %3369 = vmatprep.mubr.bf16.mxu0 %v4171_v4  ;;  %v4193_v14 = vpack.c.bf16 %v4151_v56, %v4164_v1  ;;  %v1777_v21 = vld [vmem:[#allocation2 + $0x20] sm:$0xff]  ;;  %v3788_v61 = vld [vmem:[%s4523_s3 + $0x110] sm:$0xff]   ;;  %v3811_v3 = vld [vmem:[%s4523_s3 + $0x198] sm:$0xff]  }
 0x178   : > { %3377 = vmatprep.subr.bf16.mxu0 %v3772_v0  ;;  %v1936_v16 = vpack.c.bf16 %v4164_v1, %v4153_v60  ;;  %v2084_v17 = vpack.c.bf16 %v4176_v6, %v4158_v63  ;;  %v1784_v27 = vpack.c.bf16 %v1777_v21, %v1344_v7  ;;  %v4259_v40 = vpack.c.bf16 %v1346_v39, %v1777_v21  ;;  %v1779_v41 = vld [vmem:[#allocation2 + $0x40] sm:$0xff]  ;;  %v3806_v56 = vld [vmem:[%s4523_s3 + $0x170] sm:$0xff]   ;;  %v3807_v60 = vld [vmem:[%s4523_s3 + $0x178] sm:$0xff]  }
 0x179   : > { %3414 = vmatmul.mubr.bf16.vlgmr.msra.gmra.mrb[8].mxu1 %v4185_v10  ;;  %3370 = vmatmul.mubr.bf16.gmra.mrb[12].mxu0 %v4193_v14  ;;  %v1785_v53 = vpack.c.bf16 %v1779_v41, %v1346_v39  ;;  %v4305_v2 = vld [vmem:[%s4523_s3 + $0x220] sm:$0xff]   ;;  %v3809_v1 = vld [vmem:[%s4523_s3 + $0x188] sm:$0xff]   ;;  %v3810_v6 = vld [vmem:[%s4523_s3 + $0x190] sm:$0xff]  }
 0x17a   : > { %3422 = vmatpush3.bf16.msra.mxu1 %v4120_v31  ;;  %3378 = vmatpush3.bf16.msra.mxu0 %v3772_v0  ;;  %v3780_v31 = vld [vmem:[%s4523_s3 + $0x30] sm:$0xff]   ;;  %v3804_v44 = vld [vmem:[%s4523_s3 + $0x160] sm:$0xff]  }
 0x17b   : > { %3423 = vmatprep.subr.bf16.mxu1 %v3771_v12  ;;  %3389 = vmatprep.mubr.bf16.mxu0 %v1351_v11  ;;  %v4220_v24 = vld [vmem:[#allocation2 + $0x72] sm:$0xff]  ;;  %v3808_v63 = vld [vmem:[%s4523_s3 + $0x180] sm:$0xff]  }
 0x17c   : > { %v4209_v18 = vld [vmem:[#allocation2 + $0x52] sm:$0xff]  ;;  %3379 = vmatprep.subr.bf16.mxu0 %v3774_v15  ;;  %v3820_v39 = vld [vmem:[%s4523_s3 + $0x1e0] sm:$0xff]  }
 0x17d   : > { %v4216_v20 = vpack.c.bf16 %v4209_v18, %v4173_v5  ;;  %v1348_v36 = vld [vmem:[#allocation2 + $0x50] sm:$0xff]  ;;  %v4297_v0 = vld [vmem:[#allocation2 + $0x80] sm:$0xff] }
 0x17e   : > { %3424 = vmatpush3.bf16.msra.mxu1 %v3771_v12  ;;  %v4218_v22 = vld [vmem:[#allocation2 + $0x62] sm:$0xff]  ;;  %3380 = vmatpush3.bf16.msra.mxu0 %v3774_v15  ;;  %v4262_v43 = vpack.c.bf16 %v1348_v36, %v1779_v41  ;;  %v1350_v57 = vld [vmem:[#allocation2 + $0x70] sm:$0xff]  ;;  %v3790_v12 = vld [vmem:[%s4523_s3 + $0x118] sm:$0xff]  }
 0x17f   : > { %3417 = vmatprep.mubr.bf16.mxu1 %v4216_v20  ;;  %3425 = vmatprep.subr.bf16.mxu1 %v3773_v13  ;;  %v4225_v25 = vpack.c.bf16 %v4220_v24, %v4218_v22  ;;  %v2086_v29 = vpack.c.bf16 %v4218_v22, %v4209_v18  ;;  %v1781_v50 = vld [vmem:[#allocation2 + $0x60] sm:$0xff]  ;;  %v1787_v7 = vpack.c.bf16 %v4297_v0, %v1350_v57  ;;  %v4329_v11 = vld [vmem:[%s4523_s3 + $0x230] sm:$0xff]   ;;  %v3815_v18 = vld [vmem:[%s4523_s3 + $0x1b8] sm:$0xff]  }
 0x180   : > { %3381 = vmatprep.subr.bf16.mxu0 %v3776_v19  ;;  %v1786_v55 = vpack.c.bf16 %v1781_v50, %v1348_v36  ;;  %v4285_v58 = vpack.c.bf16 %v1350_v57, %v1781_v50  ;;  %v3792_v15 = vld [vmem:[%s4523_s3 + $0x120] sm:$0xff]   ;;  %v2238_v36 = vpack.c.bf16 %v3832_v23, %v4297_v0  ;;  %v3821_v23 = vld [vmem:[%s4523_s3 + $0x1e8] sm:$0xff]   ;;  %v2384_v41 = vld [vmem:[#allocation2 + $0x91] sm:$0xff] }
 0x181   : > { %3418 = vmatmul.mubr.bf16.gmra.mrb[12].mxu1 %v4225_v25  ;;  %v3812_v5 = vld [vmem:[%s4523_s3 + $0x1a0] sm:$0xff]  }
 0x182   : > { %3426 = vmatpush3.bf16.msra.mxu1 %v3773_v13  ;;  %3437 = vmatprep.mubr.bf16.mxu1 %v1784_v27  ;;  %v4343_v13 = vpop.f32.mrb[1].mxu1  ;;  %v3798_v27 = vld [vmem:[%s4523_s3 + $0x138] sm:$0xff]   ;;  %v3816_v22 = vld [vmem:[%s4523_s3 + $0x1c0] sm:$0xff]  }
 0x183   : > { %3427 = vmatprep.subr.bf16.mxu1 %v3775_v26  ;;  %3382 = vmatpush3.bf16.msra.mxu0 %v3776_v19  ;;  %v3796_v19 = vld [vmem:[%s4523_s3 + $0x130] sm:$0xff]   ;;  %v4348_v21 = vpop.f32.mrb[2].mxu1 }
 0x184   : > { %3383 = vmatprep.subr.bf16.mxu0 %v3778_v28 }
 0x186   : > { %3428 = vmatpush3.bf16.msra.mxu1 %v3775_v26  ;;  %v4351_v26 = vpop.f32.mrb[3].mxu1 }
 0x187   : > { %3429 = vmatprep.subr.bf16.mxu1 %v3777_v30  ;;  %3384 = vmatpush3.bf16.msra.mxu0 %v3778_v28  ;;  %v3800_v28 = vld [vmem:[%s4523_s3 + $0x140] sm:$0xff]  }
 0x188   : > { %3385 = vmatprep.subr.bf16.mxu0 %v3780_v31 }
 0x18a   : > { %3430 = vmatpush3.bf16.msra.mxu1 %v3777_v30  ;;  %v3801_v30 = vld [vmem:[%s4523_s3 + $0x148] sm:$0xff]  }
 0x18b   : > { %3431 = vmatprep.subr.bf16.mxu1 %v3779_v32  ;;  %3386 = vmatpush3.bf16.msra.mxu0 %v3780_v31  ;;  %v4368_v31 = vpop.f32.mrb[4].mxu1 }
 0x18c   : > { %3387 = vmatprep.subr.bf16.mxu0 %v3782_v33 }
 0x18e   : > { %3432 = vmatpush3.bf16.msra.mxu1 %v3779_v32  ;;  %v4373_v32 = vpop.f32.mrb[5].mxu1 }
 0x18f   : > { %3433 = vmatprep.subr.bf16.mxu1 %v3781_v34  ;;  %3388 = vmatpush3.bf16.msra.mxu0 %v3782_v33  ;;  %v4378_v33 = vpop.f32.mrb[6].mxu1 }
 0x190   : > { %3541 = vmatprep.subr.bf16.mxu0 %v4254_v35 }
 0x192   : > { %3434 = vmatpush3.bf16.msra.mxu1 %v3781_v34  ;;  %3390 = vmatmul.mubr.bf16.vlgmr.msra.gmra.mrb[8].mxu0 %v4259_v40  ;;  %v4380_v34 = vpop.f32.mrb[7].mxu1 }
 0x193   : > { %3435 = vmatprep.subr.bf16.mxu1 %v3783_v37  ;;  %3393 = vmatprep.mubr.bf16.mxu0 %v4262_v43 }
 0x194   : > { %3542 = vmatpush3.bf16.msra.mxu0 %v4254_v35 }
 0x195   : > { %3543 = vmatprep.subr.bf16.mxu0 %v4267_v46 }
 0x196   : > { %3436 = vmatpush3.bf16.msra.mxu1 %v3783_v37  ;;  %v3819_v37 = vld [vmem:[%s4523_s3 + $0x1d8] sm:$0xff]  }
 0x197   : > { %3445 = vmatprep.subr.bf16.mxu1 %v3784_v48 }
 0x198   : > { %3544 = vmatpush3.bf16.msra.mxu0 %v4267_v46 }
 0x199   : > { %3438 = vmatmul.mubr.bf16.vlgmr.msra.gmra.mrb[8].mxu1 %v1785_v53  ;;  %3545 = vmatprep.subr.bf16.mxu0 %v4279_v52 }
 0x19a   : > { %3441 = vmatprep.mubr.bf16.mxu1 %v1786_v55  ;;  %3446 = vmatpush3.bf16.msra.mxu1 %v3784_v48 }
 0x19b   : > { %3447 = vmatprep.subr.bf16.mxu1 %v3786_v54  ;;  %3394 = vmatmul.mubr.bf16.gmra.mrb[12].mxu0 %v4285_v58 }
 0x19c   : > { %3546 = vmatpush3.bf16.msra.mxu0 %v4279_v52  ;;  %3557 = vmatprep.mubr.bf16.mxu0 %v4185_v10  ;;  %v4316_v10 = vld [vmem:[%s4523_s3 + $0x228] sm:$0xff]  }
 0x19d   : > { %3547 = vmatprep.subr.bf16.mxu0 %v4291_v59 }
 0x19e   : > { %3448 = vmatpush3.bf16.msra.mxu1 %v3786_v54 }
 0x19f   : > { %3449 = vmatprep.subr.bf16.mxu1 %v3788_v61 }
 0x1a0   : > { %3548 = vmatpush3.bf16.msra.mxu0 %v4291_v59 }
 0x1a1   : > { %3442 = vmatmul.mubr.bf16.gmra.mrb[12].mxu1 %v1787_v7  ;;  %3549 = vmatprep.subr.bf16.mxu0 %v4305_v2 }
 0x1a2   : > { %3450 = vmatpush3.bf16.msra.mxu1 %v3788_v61  ;;  %3461 = vmatprep.mubr.bf16.mxu1 %v1934_v51  ;;  %v4341_v51 = vld [vmem:[%s4523_s3 + $0x238] sm:$0xff]  }
 0x1a3   : > { %3451 = vmatprep.subr.bf16.mxu1 %v3790_v12 }
 0x1a4   : > { %3550 = vmatpush3.bf16.msra.mxu0 %v4305_v2 }
 0x1a5   : > { %3551 = vmatprep.subr.bf16.mxu0 %v4316_v10 }
 0x1a6   : > { %3452 = vmatpush3.bf16.msra.mxu1 %v3790_v12 }
 0x1a7   : > { %3453 = vmatprep.subr.bf16.mxu1 %v3792_v15 }
 0x1a8   : > { %3552 = vmatpush3.bf16.msra.mxu0 %v4316_v10 }
 0x1a9   : > { %3553 = vmatprep.subr.bf16.mxu0 %v4329_v11 }
 0x1aa   : > { %3454 = vmatpush3.bf16.msra.mxu1 %v3792_v15 }
 0x1ab   : > { %3455 = vmatprep.subr.bf16.mxu1 %v3794_v42 }
 0x1ac   : > { %3554 = vmatpush3.bf16.msra.mxu0 %v4329_v11 }
 0x1ad   : > { %3555 = vmatprep.subr.bf16.mxu0 %v4341_v51 }
 0x1ae   : > { %3456 = vmatpush3.bf16.msra.mxu1 %v3794_v42 }
 0x1af   : > { %3457 = vmatprep.subr.bf16.mxu1 %v3796_v19 }
 0x1b0   : > { %3556 = vmatpush3.bf16.msra.mxu0 %v4341_v51 }
 0x1b2   : > { %3458 = vmatpush3.bf16.msra.mxu1 %v3796_v19 }
 0x1b3   : > { %3459 = vmatprep.subr.bf16.mxu1 %v3798_v27  ;;  %3558 = vmatmul.mubr.bf16.vlgmr.msra.gmra.mrb[16].mxu0 %v4216_v20  ;;  %v3802_v20 = vld [vmem:[%s4523_s3 + $0x150] sm:$0xff]  }
 0x1b6   : > { %3460 = vmatpush3.bf16.msra.mxu1 %v3798_v27 }
 0x1b7   : > { %3469 = vmatprep.subr.bf16.mxu1 %v3800_v28 }
 0x1b9   : > { %3462 = vmatmul.mubr.bf16.vlgmr.msra.gmra.mrb[8].mxu1 %v1935_v47  ;;  %v3805_v47 = vld [vmem:[%s4523_s3 + $0x168] sm:$0xff]  }
 0x1ba   : > { %3465 = vmatprep.mubr.bf16.mxu1 %v1936_v16  ;;  %3470 = vmatpush3.bf16.msra.mxu1 %v3800_v28 }
 0x1bb   : > { %3471 = vmatprep.subr.bf16.mxu1 %v3801_v30 }
 0x1be   : > { %3472 = vmatpush3.bf16.msra.mxu1 %v3801_v30 }
 0x1bf   : > { %3473 = vmatprep.subr.bf16.mxu1 %v3802_v20 }
 0x1c1   : > { %3466 = vmatmul.mubr.bf16.gmra.mrb[12].mxu1 %v1937_v8  ;;  %v4418_v8 = vld [vmem:[#allocation2 + $0x82] sm:$0xff] }
 0x1c2   : > { %3474 = vmatpush3.bf16.msra.mxu1 %v3802_v20  ;;  %3485 = vmatprep.mubr.bf16.mxu1 %v2084_v17  ;;  %v2087_v16 = vpack.c.bf16 %v4418_v8, %v4220_v24  ;;  %v3814_v17 = vld [vmem:[%s4523_s3 + $0x1b0] sm:$0xff]   ;;  %v3817_v24 = vld [vmem:[%s4523_s3 + $0x1c8] sm:$0xff]  }
 0x1c3   : > { %3475 = vmatprep.subr.bf16.mxu1 %v3803_v38 }
 0x1c6   : > { %3476 = vmatpush3.bf16.msra.mxu1 %v3803_v38 }
 0x1c7   : > { %3477 = vmatprep.subr.bf16.mxu1 %v3804_v44 }
 0x1ca   : > { %3478 = vmatpush3.bf16.msra.mxu1 %v3804_v44 }
 0x1cb   : > { %3479 = vmatprep.subr.bf16.mxu1 %v3805_v47 }
 0x1ce   : > { %3480 = vmatpush3.bf16.msra.mxu1 %v3805_v47 }
 0x1cf   : > { %3481 = vmatprep.subr.bf16.mxu1 %v3806_v56 }
 0x1d2   : > { %3482 = vmatpush3.bf16.msra.mxu1 %v3806_v56 }
 0x1d3   : > { %3483 = vmatprep.subr.bf16.mxu1 %v3807_v60 }
 0x1d6   : > { %3484 = vmatpush3.bf16.msra.mxu1 %v3807_v60 }
 0x1d7   : > { %3493 = vmatprep.subr.bf16.mxu1 %v3808_v63 }
 0x1d9   : > { %3486 = vmatmul.mubr.bf16.vlgmr.msra.gmra.mrb[8].mxu1 %v2085_v9  ;;  %v3813_v9 = vld [vmem:[%s4523_s3 + $0x1a8] sm:$0xff]  }
 0x1da   : > { %3489 = vmatprep.mubr.bf16.mxu1 %v2086_v29  ;;  %3494 = vmatpush3.bf16.msra.mxu1 %v3808_v63  ;;  %v3818_v29 = vld [vmem:[%s4523_s3 + $0x1d0] sm:$0xff]  }
 0x1db   : > { %3495 = vmatprep.subr.bf16.mxu1 %v3809_v1 }
 0x1de   : > { %3496 = vmatpush3.bf16.msra.mxu1 %v3809_v1 }
 0x1df   : > { %3497 = vmatprep.subr.bf16.mxu1 %v3810_v6 }
 0x1e1   : > { %3490 = vmatmul.mubr.bf16.gmra.mrb[12].mxu1 %v2087_v16 }
 0x1e2   : > { %3498 = vmatpush3.bf16.msra.mxu1 %v3810_v6  ;;  %3509 = vmatprep.mubr.bf16.mxu1 %v4259_v40  ;;  %v3822_v40 = vld [vmem:[%s4523_s3 + $0x1f0] sm:$0xff]  }
 0x1e3   : > { %3499 = vmatprep.subr.bf16.mxu1 %v3811_v3 }
 0x1e6   : > { %3500 = vmatpush3.bf16.msra.mxu1 %v3811_v3 }
 0x1e7   : > { %3501 = vmatprep.subr.bf16.mxu1 %v3812_v5 }
 0x1ea   : > { %3502 = vmatpush3.bf16.msra.mxu1 %v3812_v5 }
 0x1eb   : > { %3503 = vmatprep.subr.bf16.mxu1 %v3813_v9 }
 0x1ee   : > { %3504 = vmatpush3.bf16.msra.mxu1 %v3813_v9 }
 0x1ef   : > { %3505 = vmatprep.subr.bf16.mxu1 %v3814_v17 }
 0x1f2   : > { %3506 = vmatpush3.bf16.msra.mxu1 %v3814_v17 }
 0x1f3   : > { %3507 = vmatprep.subr.bf16.mxu1 %v3815_v18 }
 0x1f6   : > { %3508 = vmatpush3.bf16.msra.mxu1 %v3815_v18 }
 0x1f7   : > { %3517 = vmatprep.subr.bf16.mxu1 %v3816_v22 }
 0x1f9   : > { %3510 = vmatmul.mubr.bf16.vlgmr.msra.gmra.mrb[8].mxu1 %v4262_v43  ;;  %v2388_v43 = vpack.c.bf16 %v2384_v41, %v4156_v62  ;;  %v2534_v62 = vld [vmem:[#allocation2 + $0x92] sm:$0xff] }
 0x1fa   : > { %3513 = vmatprep.mubr.bf16.mxu1 %v4285_v58  ;;  %3518 = vmatpush3.bf16.msra.mxu1 %v3816_v22 }
 0x1fb   : > { %3519 = vmatprep.subr.bf16.mxu1 %v3817_v24 }
 0x1fe   : > { %3520 = vmatpush3.bf16.msra.mxu1 %v3817_v24 }
 0x1ff   : > { %3521 = vmatprep.subr.bf16.mxu1 %v3818_v29 }
 0x201   : > { %3514 = vmatmul.mubr.bf16.gmra.mrb[12].mxu1 %v2238_v36 }
 0x202   : > { %3522 = vmatpush3.bf16.msra.mxu1 %v3818_v29  ;;  %3533 = vmatprep.mubr.bf16.mxu1 %v4143_v49  ;;  %v3823_v49 = vld [vmem:[%s4523_s3 + $0x1f8] sm:$0xff]  }
 0x203   : > { %3523 = vmatprep.subr.bf16.mxu1 %v3819_v37 }
 0x206   : > { %3524 = vmatpush3.bf16.msra.mxu1 %v3819_v37 }
 0x207   : > { %3525 = vmatprep.subr.bf16.mxu1 %v3820_v39 }
 0x20a   : > { %3526 = vmatpush3.bf16.msra.mxu1 %v3820_v39 }
 0x20b   : > { %3527 = vmatprep.subr.bf16.mxu1 %v3821_v23 }
 0x20e   : > { %3528 = vmatpush3.bf16.msra.mxu1 %v3821_v23 }
 0x20f   : > { %3529 = vmatprep.subr.bf16.mxu1 %v3822_v40 }
 0x212   : > { %3530 = vmatpush3.bf16.msra.mxu1 %v3822_v40 }
 0x213   : > { %3531 = vmatprep.subr.bf16.mxu1 %v3823_v49 }
 0x216   : > { %3532 = vmatpush3.bf16.msra.mxu1 %v3823_v49 }
 0x217   : > { %3565 = vmatprep.subr.bf16.mxu1 %v4254_v35 }
 0x219   : > { %3534 = vmatmul.mubr.bf16.vlgmr.msra.gmra.mrb[8].mxu1 %v4171_v4  ;;  %v2538_v4 = vpack.c.bf16 %v2534_v62, %v4418_v8 }
 0x21a   : > { %3537 = vmatprep.mubr.bf16.mxu1 %v4193_v14  ;;  %3573 = vmatpush3.bf16.msra.mxu1 %v4254_v35  ;;  %v2882_v14 = vld [vmem:[%s4526_s6] ss:$0 sm:$0xff] }
 0x21b   : > { %3566 = vmatprep.subr.bf16.mxu1 %v4267_v46  ;;  %v1313_v35 = vadd.f32 %v2882_v14, %v4343_v13  ;;  %v1324_v48 = vadd.f32 %v4348_v21, %v2882_v14  ;;  %v1316_v53 = vadd.f32 %v2882_v14, %v4351_v26  ;;  %v1337_v61 = vadd.f32 %v4368_v31, %v2882_v14 }
 0x21c   : > { %v1329_v0 = vadd.f32 %v2882_v14, %v4373_v32  ;;  %v1340_v7 = vadd.f32 %v4378_v33, %v2882_v14  ;;  %v1332_v15 = vadd.f32 %v2882_v14, %v4380_v34  ;;  %v3087_v32 = vld [vmem:[%s4524_s4] ss:$0 sm:$0xff] }
 0x21e   : > { %3574 = vmatpush3.bf16.msra.mxu1 %v4267_v46 }
 0x21f   : > { %3567 = vmatprep.subr.bf16.mxu1 %v4279_v52 }
 0x221   : > { %3538 = vmatmul.mubr.bf16.gmra.mrb[12].mxu1 %v2388_v43 }
 0x222   : > { %3575 = vmatpush3.bf16.msra.mxu1 %v4279_v52  ;;  %3561 = vmatprep.mubr.bf16.mxu1 %v4225_v25  ;;  %v1321_v25 = vadd.f32 %v4334_v45, %v2882_v14 }
 0x223   : > { %3568 = vmatprep.subr.bf16.mxu1 %v4291_v59 }
 0x226   : > { %3576 = vmatpush3.bf16.msra.mxu1 %v4291_v59 }
 0x227   : > { %3569 = vmatprep.subr.bf16.mxu1 %v4305_v2 }
 0x22a   : > { %3577 = vmatpush3.bf16.msra.mxu1 %v4305_v2 }
 0x22b   : > { %3570 = vmatprep.subr.bf16.mxu1 %v4316_v10 }
 0x22e   : > { %3578 = vmatpush3.bf16.msra.mxu1 %v4316_v10 }
 0x22f   : > { %3571 = vmatprep.subr.bf16.mxu1 %v4329_v11 }
 0x232   : > { %3579 = vmatpush3.bf16.msra.mxu1 %v4329_v11 }
 0x233   : > { %3572 = vmatprep.subr.bf16.mxu1 %v4341_v51 }
 0x236   : > { %3580 = vmatpush3.bf16.msra.mxu1 %v4341_v51 }
 0x239   : > { %3562 = vmatmul.mubr.bf16.vlgmr.msra.gmra.mrb[12].mxu1 %v2538_v4 }
 0x265   : > { %v3391_v46 = vpop.f32.mrb[8].mxu0 }
 0x266   : > { %v3582_v50 = vadd.f32 %v3391_v46, %v1321_v25  ;;  %v1595_v52 = vpop.f32.mrb[9].mxu0 }
 0x267   : > { %v3587_v54 = vadd.f32 %v1595_v52, %v1313_v35  ;;  %v3392_v55 = vpop.f32.mrb[10].mxu0 }
 0x268   : > { %v3592_v57 = vadd.f32 %v3392_v55, %v1324_v48  ;;  %v1598_v58 = vpop.f32.mrb[11].mxu0 }
 0x269   : > { %v3597_v59 = vadd.f32 %v1598_v58, %v1316_v53 }
 0x26e   : > { %v3395_v2 = vpop.f32.mrb[12].mxu0 }
 0x26f   : > { %v3602_v12 = vadd.f32 %v3395_v2, %v1337_v61  ;;  %v1611_v10 = vpop.f32.mrb[13].mxu0 }
 0x270   : > { %v3606_v11 = vadd.f32 %v1611_v10, %v1329_v0  ;;  %v3396_v42 = vpop.f32.mrb[14].mxu0 }
 0x271   : > { %v3610_v45 = vadd.f32 %v3396_v42, %v1340_v7  ;;  %v1614_v51 = vpop.f32.mrb[15].mxu0 }
 0x272   : > { %v3614_v13 = vadd.f32 %v1614_v51, %v1332_v15 }
 0x286   : > { %v3559_v19 = vpop.f32.mrb[16].mxu0 }
 0x287   : > { %v2638_v21 = vpop.f32.mrb[17].mxu0 }
 0x288   : > { %v3560_v26 = vpop.f32.mrb[18].mxu0 }
 0x289   : > { %v2641_v27 = vpop.f32.mrb[19].mxu0 }
 0x2ec   : > { %v3535_v28 = vpop.f32.mrb[8].mxu1 }
 0x2ed   : > { %v3583_v30 = vadd.f32 %v3582_v50, %v3535_v28  ;;  %v2488_v31 = vpop.f32.mrb[9].mxu1 }
 0x2ee   : > { %v3588_v20 = vadd.f32 %v3587_v54, %v2488_v31  ;;  %v3536_v33 = vpop.f32.mrb[10].mxu1 }
 0x2ef   : > { %v3584_v34 = vadd.f32 %v3583_v30, %v3559_v19  ;;  %v3593_v38 = vadd.f32 %v3592_v57, %v3536_v33  ;;  %v2491_v44 = vpop.f32.mrb[11].mxu1 }
 0x2f0   : > { %v3589_v47 = vadd.f32 %v3588_v20, %v2638_v21  ;;  %v3598_v56 = vadd.f32 %v3597_v59, %v2491_v44 }
 0x2f1   : > { %v3585_v60 = vadd.f32 %v3584_v34, %v3087_v32  ;;  %v3594_v63 = vadd.f32 %v3593_v38, %v3560_v26 }
 0x2f2   : > { %v3590_v1 = vadd.f32 %v3589_v47, %v3087_v32  ;;  %v3599_v6 = vadd.f32 %v3598_v56, %v2641_v27 }
 0x2f3   : > { %v2702_v8 = vmax.f32 %v3585_v60, 0.0  ;;  %v3595_v16 = vadd.f32 %v3594_v63, %v3087_v32 }
 0x2f4   : > { %v2700_v3 = vmax.f32 %v3590_v1, 0.0  ;;  %v3600_v5 = vadd.f32 %v3599_v6, %v3087_v32 }
 0x2f5   : > { %2710 = vst [vmem:[%s4507_s14 + $0x10] sm:$0xff] %v2702_v8  ;;  %v2703_v9 = vmax.f32 %v3595_v16, 0.0 }
 0x2f6   : > { %2708 = vst [vmem:[%s4507_s14] sm:$0xff] %v2700_v3  ;;  %v2701_v17 = vmax.f32 %v3600_v5, 0.0 }
 0x2f7   : > { %2711 = vst [vmem:[%s4507_s14 + $0x18] sm:$0xff] %v2703_v9 }
 0x2f8   : > { %2709 = vst [vmem:[%s4507_s14 + $0x8] sm:$0xff] %v2701_v17 }
 0x30c   : > { %v3563_v18 = vpop.f32.mrb[12].mxu1 }
 0x30d   : > { %v3603_v22 = vadd.f32 %v3602_v12, %v3563_v18  ;;  %v2654_v24 = vpop.f32.mrb[13].mxu1 }
 0x30e   : > { %v3607_v29 = vadd.f32 %v3606_v11, %v2654_v24  ;;  %v3564_v36 = vpop.f32.mrb[14].mxu1 }
 0x30f   : > { %v3604_v37 = vadd.f32 %v3603_v22, %v3087_v32  ;;  %v3611_v39 = vadd.f32 %v3610_v45, %v3564_v36  ;;  %v2657_v23 = vpop.f32.mrb[15].mxu1 }
 0x310   : > { %v3608_v40 = vadd.f32 %v3607_v29, %v3087_v32  ;;  %v3615_v49 = vadd.f32 %v3614_v13, %v2657_v23 }
 0x311   : > { %v2706_v41 = vmax.f32 %v3604_v37, 0.0  ;;  %v3612_v43 = vadd.f32 %v3611_v39, %v3087_v32 }
 0x312   : > { %v2704_v62 = vmax.f32 %v3608_v40, 0.0  ;;  %v3616_v4 = vadd.f32 %v3615_v49, %v3087_v32 }
 0x313   : > { %2714 = vst [vmem:[%s4507_s14 + $0x30] sm:$0xff] %v2706_v41  ;;  %v2707_v14 = vmax.f32 %v3612_v43, 0.0 }
 0x314   : > { %2712 = vst [vmem:[%s4507_s14 + $0x20] sm:$0xff] %v2704_v62  ;;  %v2705_v25 = vmax.f32 %v3616_v4, 0.0 }
 0x315   : > { %2715 = vst [vmem:[%s4507_s14 + $0x38] sm:$0xff] %v2707_v14 }
 0x316   : > { %2713 = vst [vmem:[%s4507_s14 + $0x28] sm:$0xff] %v2705_v25 }
 0x317 PF: > { %s17_s24 = sadd.s32 1, %s3830_s24  }
 0x318   : > { %p14_p5 = scmp.ge.s32.totalorder %s17_s24, 4  }
 0x31a   :  { %16 = sbr.rel (!%p14_p5) target bundleno = 1 (0x1), region = 98 }

</bundles_post_ra>
